<compile_context>
chip_gen: v7x
topology: tpu7x:2x2x1
jax: 0.10.0
libtpu: 0.0.40
codegen_flags: <defaults>
</compile_context>

<pallas_src>
import functools

import numpy as np
import jax
import jax.numpy as jnp
from jax.experimental import pallas as pl
from jax.experimental.pallas import tpu as pltpu


# -----------------------------------------------------------------------------
# Small helpers
# -----------------------------------------------------------------------------
def _nbytes(shape, dtype):
    n = 1
    for d in shape:
        n *= int(d)
    return n * np.dtype(dtype).itemsize


def _vmem_limit(per_step_bytes):
    # per_step_bytes already includes double-buffering of the pipelined blocks
    # plus scratch; add compiler headroom and clamp to a range safe on v5e/v6e/v7x.
    return int(min(max(per_step_bytes + (8 << 20), 16 << 20), 64 << 20))


# -----------------------------------------------------------------------------
# Kernel 1: downsampling basic block (stride-2 conv1, projection shortcut)
#   inputs: 4 stride-2 phase views of the zero-padded input (bf16),
#           folded weights (bf16) and biases (f32)
#   output: relu(conv_bn2(relu(conv_bn1(x))) + conv_bn_sc(x))   as bf16 (B, OH*OW, Cout)
# -----------------------------------------------------------------------------
def _block_kernel_ds(xE_ref, xA_ref, xB_ref, xD_ref,
                     w1_ref, b1_ref, wsc_ref, bsc_ref, w2_ref, b2_ref,
                     o_ref, xe_s, xa_s, xb_s, xd_s, h_s):
    _, M, Cout = o_ref.shape
    Cin = w1_ref.shape[1]
    OH = xe_s.shape[0] - 1
    OW = xe_s.shape[1] - 1

    # Stage the bf16 phase blocks into f32 VMEM scratch once (aligned full copies);
    # all halo/tap slicing below is then done on f32 refs.
    xe_s[...] = xE_ref[0].astype(jnp.float32)
    xa_s[...] = xA_ref[0].astype(jnp.float32)
    xb_s[...] = xB_ref[0].astype(jnp.float32)
    xd_s[...] = xD_ref[0].astype(jnp.float32)

    # conv1: 3x3, stride 2, pad 1  ==  9 tap GEMMs over the phase views.
    # tap (i, j) -> (phase, row_offset, col_offset); see phase construction in glue.
    tap_src = ((xe_s, 0, 0), (xa_s, 0, 0), (xe_s, 0, 1),
               (xb_s, 0, 0), (xd_s, 0, 0), (xb_s, 0, 1),
               (xe_s, 1, 0), (xa_s, 1, 0), (xe_s, 1, 1))
    acc = jnp.broadcast_to(b1_ref[...], (M, Cout)).astype(jnp.float32)
    for k, (src, ro, co) in enumerate(tap_src):
        t = src[ro:ro + OH, co:co + OW, :].reshape(M, Cin).astype(jnp.bfloat16)
        acc = acc + jnp.dot(t, w1_ref[k], preferred_element_type=jnp.float32)
    h = jnp.maximum(acc, 0.0)                      # ReLU(conv1 + folded BN1)

    # Stash h into a zero-padded VMEM scratch so conv2 taps are plain slices.
    h_s[...] = jnp.zeros(h_s.shape, h_s.dtype)
    h_s[1:OH + 1, 1:OW + 1, :] = h.reshape(OH, OW, Cout)

    # Projection shortcut: 1x1 stride-2 conv == a single GEMM on the odd/odd phase.
    rs = xd_s[0:OH, 0:OW, :].reshape(M, Cin).astype(jnp.bfloat16)
    res = jnp.dot(rs, wsc_ref[...], preferred_element_type=jnp.float32) + bsc_ref[...]

    # conv2: 3x3, stride 1, pad 1 over h; fused residual add + final ReLU.
    acc2 = jnp.broadcast_to(b2_ref[...], (M, Cout)).astype(jnp.float32)
    for k in range(9):
        i, j = k // 3, k % 3
        t = h_s[i:i + OH, j:j + OW, :].reshape(M, Cout).astype(jnp.bfloat16)
        acc2 = acc2 + jnp.dot(t, w2_ref[k], preferred_element_type=jnp.float32)
    y = jnp.maximum(acc2 + res, 0.0)
    o_ref[...] = y.reshape(1, M, Cout).astype(o_ref.dtype)


# -----------------------------------------------------------------------------
# Kernel 2: identity basic block (stride 1, no shortcut, Cin == Cout)
# -----------------------------------------------------------------------------
def _block_kernel_id(xp_ref, w1_ref, b1_ref, w2_ref, b2_ref,
                     o_ref, xp_s, h_s):
    _, M, Cout = o_ref.shape
    Cin = w1_ref.shape[1]
    OH = h_s.shape[0] - 2
    OW = h_s.shape[1] - 2

    # Stage padded input (bf16) into f32 scratch once.
    xp_s[...] = xp_ref[0].astype(jnp.float32)

    # conv1: 3x3, stride 1, pad 1.
    acc = jnp.broadcast_to(b1_ref[...], (M, Cout)).astype(jnp.float32)
    for k in range(9):
        i, j = k // 3, k % 3
        t = xp_s[i:i + OH, j:j + OW, :].reshape(M, Cin).astype(jnp.bfloat16)
        acc = acc + jnp.dot(t, w1_ref[k], preferred_element_type=jnp.float32)
    h = jnp.maximum(acc, 0.0)

    h_s[...] = jnp.zeros(h_s.shape, h_s.dtype)
    h_s[1:OH + 1, 1:OW + 1, :] = h.reshape(OH, OW, Cout)

    # Identity shortcut = the (unpadded) input itself.
    res = xp_s[1:OH + 1, 1:OW + 1, :].reshape(M, Cin)

    # conv2 + residual add + final ReLU.
    acc2 = jnp.broadcast_to(b2_ref[...], (M, Cout)).astype(jnp.float32)
    for k in range(9):
        i, j = k // 3, k % 3
        t = h_s[i:i + OH, j:j + OW, :].reshape(M, Cout).astype(jnp.bfloat16)
        acc2 = acc2 + jnp.dot(t, w2_ref[k], preferred_element_type=jnp.float32)
    y = jnp.maximum(acc2 + res, 0.0)
    o_ref[...] = y.reshape(1, M, Cout).astype(o_ref.dtype)


# -----------------------------------------------------------------------------
# JAX glue: one pallas_call per ResNetBasicBlock (NHWC, bf16 activations)
# -----------------------------------------------------------------------------
def _fused_basic_block(x, bp):
    B, H, W, Cin = x.shape
    Cout = bp["b1"].shape[-1]

    if "wsc" in bp:                                   # downsampling + projection shortcut
        OH = (H - 1) // 2 + 1
        OW = (W - 1) // 2 + 1
        M = OH * OW
        xp = jnp.pad(x, ((0, 0), (1, 1), (1, 1), (0, 0)))
        # Stride-2 phase views of the padded input (single 1x read/write in XLA,
        # no 9x im2col).  xE/xA/xB/xD = (even,even)/(even,odd)/(odd,even)/(odd,odd).
        xE = xp[:, 0::2, 0::2, :][:, :OH + 1, :OW + 1, :]
        xA = xp[:, 0::2, 1::2, :][:, :OH + 1, :OW + 1, :]
        xB = xp[:, 1::2, 0::2, :][:, :OH + 1, :OW + 1, :]
        xD = xp[:, 1::2, 1::2, :][:, :OH + 1, :OW + 1, :]

        phase_spec = pl.BlockSpec((1, OH + 1, OW + 1, Cin), lambda b: (b, 0, 0, 0))
        bias_spec = pl.BlockSpec((1, Cout), lambda b: (0, 0))

        block_bytes = (4 * _nbytes((1, OH + 1, OW + 1, Cin), jnp.bfloat16)
                       + _nbytes((9, Cin, Cout), jnp.bfloat16)
                       + _nbytes((Cin, Cout), jnp.bfloat16)
                       + _nbytes((9, Cout, Cout), jnp.bfloat16)
                       + 3 * _nbytes((1, Cout), jnp.float32)
                       + _nbytes((1, M, Cout), jnp.bfloat16))
        scratch_bytes = (4 * _nbytes((OH + 1, OW + 1, Cin), jnp.float32)
                         + _nbytes((OH + 2, OW + 2, Cout), jnp.float32))

        out = pl.pallas_call(
            _block_kernel_ds,
            out_shape=jax.ShapeDtypeStruct((B, M, Cout), jnp.bfloat16),
            grid=(B,),
            in_specs=[phase_spec, phase_spec, phase_spec, phase_spec,
                      pl.BlockSpec((9, Cin, Cout), lambda b: (0, 0, 0)),
                      bias_spec,
                      pl.BlockSpec((Cin, Cout), lambda b: (0, 0)),
                      bias_spec,
                      pl.BlockSpec((9, Cout, Cout), lambda b: (0, 0, 0)),
                      bias_spec],
            out_specs=pl.BlockSpec((1, M, Cout), lambda b: (b, 0, 0)),
            scratch_shapes=[pltpu.VMEM((OH + 1, OW + 1, Cin), jnp.float32)
                            for _ in range(4)]
                           + [pltpu.VMEM((OH + 2, OW + 2, Cout), jnp.float32)],
            compiler_params=pltpu.CompilerParams(
                dimension_semantics=("parallel",),
                vmem_limit_bytes=_vmem_limit(2 * block_bytes + scratch_bytes),
            ),
        )(xE, xA, xB, xD, bp["w1"], bp["b1"], bp["wsc"], bp["bsc"],
          bp["w2"], bp["b2"])
    else:                                              # identity block (stride 1)
        OH, OW = H, W
        M = OH * OW
        xp = jnp.pad(x, ((0, 0), (1, 1), (1, 1), (0, 0)))
        bias_spec = pl.BlockSpec((1, Cout), lambda b: (0, 0))

        block_bytes = (_nbytes((1, OH + 2, OW + 2, Cin), jnp.bfloat16)
                       + _nbytes((9, Cin, Cout), jnp.bfloat16)
                       + _nbytes((9, Cout, Cout), jnp.bfloat16)
                       + 2 * _nbytes((1, Cout), jnp.float32)
                       + _nbytes((1, M, Cout), jnp.bfloat16))
        scratch_bytes = (_nbytes((OH + 2, OW + 2, Cin), jnp.float32)
                         + _nbytes((OH + 2, OW + 2, Cout), jnp.float32))

        out = pl.pallas_call(
            _block_kernel_id,
            out_shape=jax.ShapeDtypeStruct((B, M, Cout), jnp.bfloat16),
            grid=(B,),
            in_specs=[pl.BlockSpec((1, OH + 2, OW + 2, Cin), lambda b: (b, 0, 0, 0)),
                      pl.BlockSpec((9, Cin, Cout), lambda b: (0, 0, 0)),
                      bias_spec,
                      pl.BlockSpec((9, Cout, Cout), lambda b: (0, 0, 0)),
                      bias_spec],
            out_specs=pl.BlockSpec((1, M, Cout), lambda b: (b, 0, 0)),
            scratch_shapes=[pltpu.VMEM((OH + 2, OW + 2, Cin), jnp.float32),
                            pltpu.VMEM((OH + 2, OW + 2, Cout), jnp.float32)],
            compiler_params=pltpu.CompilerParams(
                dimension_semantics=("parallel",),
                vmem_limit_bytes=_vmem_limit(2 * block_bytes + scratch_bytes),
            ),
        )(xp, bp["w1"], bp["b1"], bp["w2"], bp["b2"])

    return out.reshape(B, OH, OW, Cout)


# -----------------------------------------------------------------------------
# ResNetLayer: parameters (eval-mode BN folded into weights) + forward
# -----------------------------------------------------------------------------
def _build_params(key, in_channels, out_channels, n, eps=1e-5):
    keys = iter(jax.random.split(key, 64))

    def conv_w(kh, kw, cin, cout):
        fan_in = kh * kw * cin
        return (jax.random.normal(next(keys), (kh, kw, cin, cout), jnp.float32)
                / jnp.sqrt(float(fan_in)))

    def bn(c):
        gamma = 1.0 + 0.1 * jax.random.normal(next(keys), (c,), jnp.float32)
        beta = 0.1 * jax.random.normal(next(keys), (c,), jnp.float32)
        mean = 0.1 * jax.random.normal(next(keys), (c,), jnp.float32)
        var = 1.0 + 0.1 * jax.random.uniform(next(keys), (c,), jnp.float32)
        scale = gamma / jnp.sqrt(var + eps)
        bias = beta - mean * scale
        return scale, bias

    def fold3(w, scale):        # fold BN scale into 3x3 weights (f32), cast bf16
        wf = (w * scale[None, None, None, :]).astype(jnp.bfloat16)
        return wf.reshape(9, w.shape[2], w.shape[3])

    blocks = []
    for b in range(n):
        cin = in_channels if b == 0 else out_channels
        bp = {}
        w1 = conv_w(3, 3, cin, out_channels)
        s1, b1 = bn(out_channels)
        w2 = conv_w(3, 3, out_channels, out_channels)
        s2, b2 = bn(out_channels)
        bp["w1"] = fold3(w1, s1)
        bp["b1"] = b1.reshape(1, -1)
        bp["w2"] = fold3(w2, s2)
        bp["b2"] = b2.reshape(1, -1)
        if cin != out_channels:            # should_apply_shortcut (expansion = 1)
            wsc = conv_w(1, 1, cin, out_channels)
            ssc, bsc = bn(out_channels)
            bp["wsc"] = (wsc[0, 0] * ssc[None, :]).astype(jnp.bfloat16)
            bp["bsc"] = bsc.reshape(1, -1)
        blocks.append(bp)
    return {"blocks": blocks}


def resnet_layer_forward(x_nchw, params):
    """x_nchw: (B, Cin, H, W) -> (B, Cout, H', W') (same semantics as ResNetLayer)."""
    x = jnp.transpose(x_nchw, (0, 2, 3, 1)).astype(jnp.bfloat16)   # NHWC, bf16
    for bp in params["blocks"]:
        x = _fused_basic_block(x, bp)
    return jnp.transpose(x.astype(jnp.float32), (0, 3, 1, 2))      # NCHW, f32


# -----------------------------------------------------------------------------
# Main
# -----------------------------------------------------------------------------
if __name__ == "__main__":
    key = jax.random.PRNGKey(0)
    kx, kp = jax.random.split(key)

    # Module-consistent small configuration: ResNetLayer(16, 32, n=2)
    B, Cin, H, W = 2, 16, 16, 16
    Cout, n_blocks = 32, 2

    x = jax.random.normal(kx, (B, Cin, H, W), jnp.float32)   # NCHW like PyTorch
    params = _build_params(kp, Cin, Cout, n_blocks)

    fwd = jax.jit(functools.partial(resnet_layer_forward, params=params))
    out = fwd(x)
    jax.block_until_ready(out)

    expected_hw = H // 2 if Cin != Cout else H
    assert out.shape == (B, Cout, expected_hw, expected_hw), out.shape
    assert bool(jnp.all(jnp.isfinite(out)))
    print("KERNEL_OK")
</pallas_src>

<mosaic_0001>
module attributes {stable_mosaic.version = 11 : i64} {
  func.func @_block_kernel_ds(%arg0: i32, %arg1: memref<1x9x9x16xbf16, #tpu.memory_space<vmem>>, %arg2: memref<1x9x9x16xbf16, #tpu.memory_space<vmem>>, %arg3: memref<1x9x9x16xbf16, #tpu.memory_space<vmem>>, %arg4: memref<1x9x9x16xbf16, #tpu.memory_space<vmem>>, %arg5: memref<9x16x32xbf16, #tpu.memory_space<vmem>>, %arg6: memref<1x32xf32, #tpu.memory_space<vmem>>, %arg7: memref<16x32xbf16, #tpu.memory_space<vmem>>, %arg8: memref<1x32xf32, #tpu.memory_space<vmem>>, %arg9: memref<9x32x32xbf16, #tpu.memory_space<vmem>>, %arg10: memref<1x32xf32, #tpu.memory_space<vmem>>, %arg11: memref<1x64x32xbf16, #tpu.memory_space<vmem>>, %arg12: memref<9x9x16xf32, #tpu.memory_space<vmem>>, %arg13: memref<9x9x16xf32, #tpu.memory_space<vmem>>, %arg14: memref<9x9x16xf32, #tpu.memory_space<vmem>>, %arg15: memref<9x9x16xf32, #tpu.memory_space<vmem>>, %arg16: memref<10x10x32xf32, #tpu.memory_space<vmem>>) attributes {dimension_semantics = [#tpu.dimension_semantics<parallel>], iteration_bounds = array<i64: 2>, scalar_prefetch = 0 : i64, scratch_operands = 5 : i64, tpu.core_type = #tpu.core_type<tc>, window_params = [{transform_indices = @transform_0, window_bounds = array<i64: 1, 9, 9, 16>}, {transform_indices = @transform_1, window_bounds = array<i64: 1, 9, 9, 16>}, {transform_indices = @transform_2, window_bounds = array<i64: 1, 9, 9, 16>}, {transform_indices = @transform_3, window_bounds = array<i64: 1, 9, 9, 16>}, {pipeline_mode = #tpu.pipeline_mode<synchronous>, transform_indices = @transform_4, window_bounds = array<i64: 9, 16, 32>}, {pipeline_mode = #tpu.pipeline_mode<synchronous>, transform_indices = @transform_5, window_bounds = array<i64: 1, 32>}, {pipeline_mode = #tpu.pipeline_mode<synchronous>, transform_indices = @transform_6, window_bounds = array<i64: 16, 32>}, {pipeline_mode = #tpu.pipeline_mode<synchronous>, transform_indices = @transform_7, window_bounds = array<i64: 1, 32>}, {pipeline_mode = #tpu.pipeline_mode<synchronous>, transform_indices = @transform_8, window_bounds = array<i64: 9, 32, 32>}, {pipeline_mode = #tpu.pipeline_mode<synchronous>, transform_indices = @transform_9, window_bounds = array<i64: 1, 32>}, {transform_indices = @transform_10, window_bounds = array<i64: 1, 64, 32>}]} {
    %c0 = arith.constant 0 : index
    %c0_0 = arith.constant 0 : index
    %c0_1 = arith.constant 0 : index
    %c0_2 = arith.constant 0 : index
    %0 = vector.load %arg1[%c0, %c0_0, %c0_1, %c0_2] : memref<1x9x9x16xbf16, #tpu.memory_space<vmem>>, vector<1x9x9x16xbf16>
    %1 = vector.shape_cast %0 : vector<1x9x9x16xbf16> to vector<9x9x16xbf16>
    %2 = arith.extf %1 : vector<9x9x16xbf16> to vector<9x9x16xf32>
    %c0_3 = arith.constant 0 : index
    %c0_4 = arith.constant 0 : index
    %c0_5 = arith.constant 0 : index
    %3 = vector.load %arg12[%c0_3, %c0_4, %c0_5] : memref<9x9x16xf32, #tpu.memory_space<vmem>>, vector<9x9x16xf32>
    tpu.vector_store %arg12[%c0_3, %c0_4, %c0_5], %2 {strides = array<i32>} : memref<9x9x16xf32, #tpu.memory_space<vmem>>, vector<9x9x16xf32>,
    %c0_6 = arith.constant 0 : index
    %c0_7 = arith.constant 0 : index
    %c0_8 = arith.constant 0 : index
    %c0_9 = arith.constant 0 : index
    %4 = vector.load %arg2[%c0_6, %c0_7, %c0_8, %c0_9] : memref<1x9x9x16xbf16, #tpu.memory_space<vmem>>, vector<1x9x9x16xbf16>
    %5 = vector.shape_cast %4 : vector<1x9x9x16xbf16> to vector<9x9x16xbf16>
    %6 = arith.extf %5 : vector<9x9x16xbf16> to vector<9x9x16xf32>
    %c0_10 = arith.constant 0 : index
    %c0_11 = arith.constant 0 : index
    %c0_12 = arith.constant 0 : index
    %7 = vector.load %arg13[%c0_10, %c0_11, %c0_12] : memref<9x9x16xf32, #tpu.memory_space<vmem>>, vector<9x9x16xf32>
    tpu.vector_store %arg13[%c0_10, %c0_11, %c0_12], %6 {strides = array<i32>} : memref<9x9x16xf32, #tpu.memory_space<vmem>>, vector<9x9x16xf32>,
    %c0_13 = arith.constant 0 : index
    %c0_14 = arith.constant 0 : index
    %c0_15 = arith.constant 0 : index
    %c0_16 = arith.constant 0 : index
    %8 = vector.load %arg3[%c0_13, %c0_14, %c0_15, %c0_16] : memref<1x9x9x16xbf16, #tpu.memory_space<vmem>>, vector<1x9x9x16xbf16>
    %9 = vector.shape_cast %8 : vector<1x9x9x16xbf16> to vector<9x9x16xbf16>
    %10 = arith.extf %9 : vector<9x9x16xbf16> to vector<9x9x16xf32>
    %c0_17 = arith.constant 0 : index
    %c0_18 = arith.constant 0 : index
    %c0_19 = arith.constant 0 : index
    %11 = vector.load %arg14[%c0_17, %c0_18, %c0_19] : memref<9x9x16xf32, #tpu.memory_space<vmem>>, vector<9x9x16xf32>
    tpu.vector_store %arg14[%c0_17, %c0_18, %c0_19], %10 {strides = array<i32>} : memref<9x9x16xf32, #tpu.memory_space<vmem>>, vector<9x9x16xf32>,
    %c0_20 = arith.constant 0 : index
    %c0_21 = arith.constant 0 : index
    %c0_22 = arith.constant 0 : index
    %c0_23 = arith.constant 0 : index
    %12 = vector.load %arg4[%c0_20, %c0_21, %c0_22, %c0_23] : memref<1x9x9x16xbf16, #tpu.memory_space<vmem>>, vector<1x9x9x16xbf16>
    %13 = vector.shape_cast %12 : vector<1x9x9x16xbf16> to vector<9x9x16xbf16>
    %14 = arith.extf %13 : vector<9x9x16xbf16> to vector<9x9x16xf32>
    %c0_24 = arith.constant 0 : index
    %c0_25 = arith.constant 0 : index
    %c0_26 = arith.constant 0 : index
    %15 = vector.load %arg15[%c0_24, %c0_25, %c0_26] : memref<9x9x16xf32, #tpu.memory_space<vmem>>, vector<9x9x16xf32>
    tpu.vector_store %arg15[%c0_24, %c0_25, %c0_26], %14 {strides = array<i32>} : memref<9x9x16xf32, #tpu.memory_space<vmem>>, vector<9x9x16xf32>,
    %c0_27 = arith.constant 0 : index
    %c0_28 = arith.constant 0 : index
    %16 = vector.load %arg6[%c0_27, %c0_28] : memref<1x32xf32, #tpu.memory_space<vmem>>, vector<1x32xf32>
    %17 = vector.shape_cast %16 : vector<1x32xf32> to vector<1x32xf32>
    %18 = vector.broadcast %17 : vector<1x32xf32> to vector<64x32xf32>
    %c0_29 = arith.constant 0 : index
    %c0_30 = arith.constant 0 : index
    %c0_31 = arith.constant 0 : index
    %19 = vector.load %arg12[%c0_29, %c0_30, %c0_31] : memref<9x9x16xf32, #tpu.memory_space<vmem>>, vector<8x8x16xf32>
    %20 = vector.shape_cast %19 : vector<8x8x16xf32> to vector<64x16xf32>
    %21 = arith.truncf %20 : vector<64x16xf32> to vector<64x16xbf16>
    %c0_32 = arith.constant 0 : index
    %c0_33 = arith.constant 0 : index
    %c0_34 = arith.constant 0 : index
    %22 = vector.load %arg5[%c0_32, %c0_33, %c0_34] : memref<9x16x32xbf16, #tpu.memory_space<vmem>>, vector<1x16x32xbf16>
    %23 = vector.shape_cast %22 : vector<1x16x32xbf16> to vector<16x32xbf16>
    %cst = arith.constant dense<0.000000e+00> : vector<64x32xf32>
    %24 = tpu.matmul %21, %23, %cst {dimension_numbers = #tpu.dot_dimension_numbers<[1], [0], [0], [1], [0, 0, 1, 1], [], []>} : vector<64x16xbf16>, vector<16x32xbf16>, vector<64x32xf32> -> vector<64x32xf32>
    %25 = arith.addf %18, %24 : vector<64x32xf32>
    %c0_35 = arith.constant 0 : index
    %c0_36 = arith.constant 0 : index
    %c0_37 = arith.constant 0 : index
    %26 = vector.load %arg13[%c0_35, %c0_36, %c0_37] : memref<9x9x16xf32, #tpu.memory_space<vmem>>, vector<8x8x16xf32>
    %27 = vector.shape_cast %26 : vector<8x8x16xf32> to vector<64x16xf32>
    %28 = arith.truncf %27 : vector<64x16xf32> to vector<64x16xbf16>
    %c1 = arith.constant 1 : index
    %c0_38 = arith.constant 0 : index
    %c0_39 = arith.constant 0 : index
    %29 = vector.load %arg5[%c1, %c0_38, %c0_39] : memref<9x16x32xbf16, #tpu.memory_space<vmem>>, vector<1x16x32xbf16>
    %30 = vector.shape_cast %29 : vector<1x16x32xbf16> to vector<16x32xbf16>
    %cst_40 = arith.constant dense<0.000000e+00> : vector<64x32xf32>
    %31 = tpu.matmul %28, %30, %cst_40 {dimension_numbers = #tpu.dot_dimension_numbers<[1], [0], [0], [1], [0, 0, 1, 1], [], []>} : vector<64x16xbf16>, vector<16x32xbf16>, vector<64x32xf32> -> vector<64x32xf32>
    %32 = arith.addf %25, %31 : vector<64x32xf32>
    %c0_41 = arith.constant 0 : index
    %c1_42 = arith.constant 1 : index
    %c0_43 = arith.constant 0 : index
    %33 = vector.load %arg12[%c0_41, %c1_42, %c0_43] : memref<9x9x16xf32, #tpu.memory_space<vmem>>, vector<8x8x16xf32>
    %34 = vector.shape_cast %33 : vector<8x8x16xf32> to vector<64x16xf32>
    %35 = arith.truncf %34 : vector<64x16xf32> to vector<64x16xbf16>
    %c2 = arith.constant 2 : index
    %c0_44 = arith.constant 0 : index
    %c0_45 = arith.constant 0 : index
    %36 = vector.load %arg5[%c2, %c0_44, %c0_45] : memref<9x16x32xbf16, #tpu.memory_space<vmem>>, vector<1x16x32xbf16>
    %37 = vector.shape_cast %36 : vector<1x16x32xbf16> to vector<16x32xbf16>
    %cst_46 = arith.constant dense<0.000000e+00> : vector<64x32xf32>
    %38 = tpu.matmul %35, %37, %cst_46 {dimension_numbers = #tpu.dot_dimension_numbers<[1], [0], [0], [1], [0, 0, 1, 1], [], []>} : vector<64x16xbf16>, vector<16x32xbf16>, vector<64x32xf32> -> vector<64x32xf32>
    %39 = arith.addf %32, %38 : vector<64x32xf32>
    %c0_47 = arith.constant 0 : index
    %c0_48 = arith.constant 0 : index
    %c0_49 = arith.constant 0 : index
    %40 = vector.load %arg14[%c0_47, %c0_48, %c0_49] : memref<9x9x16xf32, #tpu.memory_space<vmem>>, vector<8x8x16xf32>
    %41 = vector.shape_cast %40 : vector<8x8x16xf32> to vector<64x16xf32>
    %42 = arith.truncf %41 : vector<64x16xf32> to vector<64x16xbf16>
    %c3 = arith.constant 3 : index
    %c0_50 = arith.constant 0 : index
    %c0_51 = arith.constant 0 : index
    %43 = vector.load %arg5[%c3, %c0_50, %c0_51] : memref<9x16x32xbf16, #tpu.memory_space<vmem>>, vector<1x16x32xbf16>
    %44 = vector.shape_cast %43 : vector<1x16x32xbf16> to vector<16x32xbf16>
    %cst_52 = arith.constant dense<0.000000e+00> : vector<64x32xf32>
    %45 = tpu.matmul %42, %44, %cst_52 {dimension_numbers = #tpu.dot_dimension_numbers<[1], [0], [0], [1], [0, 0, 1, 1], [], []>} : vector<64x16xbf16>, vector<16x32xbf16>, vector<64x32xf32> -> vector<64x32xf32>
    %46 = arith.addf %39, %45 : vector<64x32xf32>
    %c0_53 = arith.constant 0 : index
    %c0_54 = arith.constant 0 : index
    %c0_55 = arith.constant 0 : index
    %47 = vector.load %arg15[%c0_53, %c0_54, %c0_55] : memref<9x9x16xf32, #tpu.memory_space<vmem>>, vector<8x8x16xf32>
    %48 = vector.shape_cast %47 : vector<8x8x16xf32> to vector<64x16xf32>
    %49 = arith.truncf %48 : vector<64x16xf32> to vector<64x16xbf16>
    %c4 = arith.constant 4 : index
    %c0_56 = arith.constant 0 : index
    %c0_57 = arith.constant 0 : index
    %50 = vector.load %arg5[%c4, %c0_56, %c0_57] : memref<9x16x32xbf16, #tpu.memory_space<vmem>>, vector<1x16x32xbf16>
    %51 = vector.shape_cast %50 : vector<1x16x32xbf16> to vector<16x32xbf16>
    %cst_58 = arith.constant dense<0.000000e+00> : vector<64x32xf32>
    %52 = tpu.matmul %49, %51, %cst_58 {dimension_numbers = #tpu.dot_dimension_numbers<[1], [0], [0], [1], [0, 0, 1, 1], [], []>} : vector<64x16xbf16>, vector<16x32xbf16>, vector<64x32xf32> -> vector<64x32xf32>
    %53 = arith.addf %46, %52 : vector<64x32xf32>
    %c0_59 = arith.constant 0 : index
    %c1_60 = arith.constant 1 : index
    %c0_61 = arith.constant 0 : index
    %54 = vector.load %arg14[%c0_59, %c1_60, %c0_61] : memref<9x9x16xf32, #tpu.memory_space<vmem>>, vector<8x8x16xf32>
    %55 = vector.shape_cast %54 : vector<8x8x16xf32> to vector<64x16xf32>
    %56 = arith.truncf %55 : vector<64x16xf32> to vector<64x16xbf16>
    %c5 = arith.constant 5 : index
    %c0_62 = arith.constant 0 : index
    %c0_63 = arith.constant 0 : index
    %57 = vector.load %arg5[%c5, %c0_62, %c0_63] : memref<9x16x32xbf16, #tpu.memory_space<vmem>>, vector<1x16x32xbf16>
    %58 = vector.shape_cast %57 : vector<1x16x32xbf16> to vector<16x32xbf16>
    %cst_64 = arith.constant dense<0.000000e+00> : vector<64x32xf32>
    %59 = tpu.matmul %56, %58, %cst_64 {dimension_numbers = #tpu.dot_dimension_numbers<[1], [0], [0], [1], [0, 0, 1, 1], [], []>} : vector<64x16xbf16>, vector<16x32xbf16>, vector<64x32xf32> -> vector<64x32xf32>
    %60 = arith.addf %53, %59 : vector<64x32xf32>
    %c1_65 = arith.constant 1 : index
    %c0_66 = arith.constant 0 : index
    %c0_67 = arith.constant 0 : index
    %61 = vector.load %arg12[%c1_65, %c0_66, %c0_67] : memref<9x9x16xf32, #tpu.memory_space<vmem>>, vector<8x8x16xf32>
    %62 = vector.shape_cast %61 : vector<8x8x16xf32> to vector<64x16xf32>
    %63 = arith.truncf %62 : vector<64x16xf32> to vector<64x16xbf16>
    %c6 = arith.constant 6 : index
    %c0_68 = arith.constant 0 : index
    %c0_69 = arith.constant 0 : index
    %64 = vector.load %arg5[%c6, %c0_68, %c0_69] : memref<9x16x32xbf16, #tpu.memory_space<vmem>>, vector<1x16x32xbf16>
    %65 = vector.shape_cast %64 : vector<1x16x32xbf16> to vector<16x32xbf16>
    %cst_70 = arith.constant dense<0.000000e+00> : vector<64x32xf32>
    %66 = tpu.matmul %63, %65, %cst_70 {dimension_numbers = #tpu.dot_dimension_numbers<[1], [0], [0], [1], [0, 0, 1, 1], [], []>} : vector<64x16xbf16>, vector<16x32xbf16>, vector<64x32xf32> -> vector<64x32xf32>
    %67 = arith.addf %60, %66 : vector<64x32xf32>
    %c1_71 = arith.constant 1 : index
    %c0_72 = arith.constant 0 : index
    %c0_73 = arith.constant 0 : index
    %68 = vector.load %arg13[%c1_71, %c0_72, %c0_73] : memref<9x9x16xf32, #tpu.memory_space<vmem>>, vector<8x8x16xf32>
    %69 = vector.shape_cast %68 : vector<8x8x16xf32> to vector<64x16xf32>
    %70 = arith.truncf %69 : vector<64x16xf32> to vector<64x16xbf16>
    %c7 = arith.constant 7 : index
    %c0_74 = arith.constant 0 : index
    %c0_75 = arith.constant 0 : index
    %71 = vector.load %arg5[%c7, %c0_74, %c0_75] : memref<9x16x32xbf16, #tpu.memory_space<vmem>>, vector<1x16x32xbf16>
    %72 = vector.shape_cast %71 : vector<1x16x32xbf16> to vector<16x32xbf16>
    %cst_76 = arith.constant dense<0.000000e+00> : vector<64x32xf32>
    %73 = tpu.matmul %70, %72, %cst_76 {dimension_numbers = #tpu.dot_dimension_numbers<[1], [0], [0], [1], [0, 0, 1, 1], [], []>} : vector<64x16xbf16>, vector<16x32xbf16>, vector<64x32xf32> -> vector<64x32xf32>
    %74 = arith.addf %67, %73 : vector<64x32xf32>
    %c1_77 = arith.constant 1 : index
    %c1_78 = arith.constant 1 : index
    %c0_79 = arith.constant 0 : index
    %75 = vector.load %arg12[%c1_77, %c1_78, %c0_79] : memref<9x9x16xf32, #tpu.memory_space<vmem>>, vector<8x8x16xf32>
    %76 = vector.shape_cast %75 : vector<8x8x16xf32> to vector<64x16xf32>
    %77 = arith.truncf %76 : vector<64x16xf32> to vector<64x16xbf16>
    %c8 = arith.constant 8 : index
    %c0_80 = arith.constant 0 : index
    %c0_81 = arith.constant 0 : index
    %78 = vector.load %arg5[%c8, %c0_80, %c0_81] : memref<9x16x32xbf16, #tpu.memory_space<vmem>>, vector<1x16x32xbf16>
    %79 = vector.shape_cast %78 : vector<1x16x32xbf16> to vector<16x32xbf16>
    %cst_82 = arith.constant dense<0.000000e+00> : vector<64x32xf32>
    %80 = tpu.matmul %77, %79, %cst_82 {dimension_numbers = #tpu.dot_dimension_numbers<[1], [0], [0], [1], [0, 0, 1, 1], [], []>} : vector<64x16xbf16>, vector<16x32xbf16>, vector<64x32xf32> -> vector<64x32xf32>
    %81 = arith.addf %74, %80 : vector<64x32xf32>
    %cst_83 = arith.constant 0.000000e+00 : f32
    %82 = vector.broadcast %cst_83 : f32 to vector<64x32xf32>
    %83 = arith.maximumf %81, %82 : vector<64x32xf32>
    %cst_84 = arith.constant 0.000000e+00 : f32
    %84 = vector.broadcast %cst_84 : f32 to vector<10x10x32xf32>
    %c0_85 = arith.constant 0 : index
    %c0_86 = arith.constant 0 : index
    %c0_87 = arith.constant 0 : index
    %85 = vector.load %arg16[%c0_85, %c0_86, %c0_87] : memref<10x10x32xf32, #tpu.memory_space<vmem>>, vector<10x10x32xf32>
    tpu.vector_store %arg16[%c0_85, %c0_86, %c0_87], %84 {strides = array<i32>} : memref<10x10x32xf32, #tpu.memory_space<vmem>>, vector<10x10x32xf32>,
    %86 = vector.shape_cast %83 : vector<64x32xf32> to vector<8x8x32xf32>
    %c1_88 = arith.constant 1 : index
    %c1_89 = arith.constant 1 : index
    %c0_90 = arith.constant 0 : index
    %87 = vector.load %arg16[%c1_88, %c1_89, %c0_90] : memref<10x10x32xf32, #tpu.memory_space<vmem>>, vector<8x8x32xf32>
    tpu.vector_store %arg16[%c1_88, %c1_89, %c0_90], %86 {strides = array<i32>} : memref<10x10x32xf32, #tpu.memory_space<vmem>>, vector<8x8x32xf32>,
    %c0_91 = arith.constant 0 : index
    %c0_92 = arith.constant 0 : index
    %c0_93 = arith.constant 0 : index
    %88 = vector.load %arg15[%c0_91, %c0_92, %c0_93] : memref<9x9x16xf32, #tpu.memory_space<vmem>>, vector<8x8x16xf32>
    %89 = vector.shape_cast %88 : vector<8x8x16xf32> to vector<64x16xf32>
    %90 = arith.truncf %89 : vector<64x16xf32> to vector<64x16xbf16>
    %c0_94 = arith.constant 0 : index
    %c0_95 = arith.constant 0 : index
    %91 = vector.load %arg7[%c0_94, %c0_95] : memref<16x32xbf16, #tpu.memory_space<vmem>>, vector<16x32xbf16>
    %cst_96 = arith.constant dense<0.000000e+00> : vector<64x32xf32>
    %92 = tpu.matmul %90, %91, %cst_96 {dimension_numbers = #tpu.dot_dimension_numbers<[1], [0], [0], [1], [0, 0, 1, 1], [], []>} : vector<64x16xbf16>, vector<16x32xbf16>, vector<64x32xf32> -> vector<64x32xf32>
    %c0_97 = arith.constant 0 : index
    %c0_98 = arith.constant 0 : index
    %93 = vector.load %arg8[%c0_97, %c0_98] : memref<1x32xf32, #tpu.memory_space<vmem>>, vector<1x32xf32>
    %94 = vector.broadcast %93 : vector<1x32xf32> to vector<64x32xf32>
    %95 = arith.addf %92, %94 : vector<64x32xf32>
    %c0_99 = arith.constant 0 : index
    %c0_100 = arith.constant 0 : index
    %96 = vector.load %arg10[%c0_99, %c0_100] : memref<1x32xf32, #tpu.memory_space<vmem>>, vector<1x32xf32>
    %97 = vector.shape_cast %96 : vector<1x32xf32> to vector<1x32xf32>
    %98 = vector.broadcast %97 : vector<1x32xf32> to vector<64x32xf32>
    %c0_101 = arith.constant 0 : index
    %c0_102 = arith.constant 0 : index
    %c0_103 = arith.constant 0 : index
    %99 = vector.load %arg16[%c0_101, %c0_102, %c0_103] : memref<10x10x32xf32, #tpu.memory_space<vmem>>, vector<8x8x32xf32>
    %100 = vector.shape_cast %99 : vector<8x8x32xf32> to vector<64x32xf32>
    %101 = arith.truncf %100 : vector<64x32xf32> to vector<64x32xbf16>
    %c0_104 = arith.constant 0 : index
    %c0_105 = arith.constant 0 : index
    %c0_106 = arith.constant 0 : index
    %102 = vector.load %arg9[%c0_104, %c0_105, %c0_106] : memref<9x32x32xbf16, #tpu.memory_space<vmem>>, vector<1x32x32xbf16>
    %103 = vector.shape_cast %102 : vector<1x32x32xbf16> to vector<32x32xbf16>
    %cst_107 = arith.constant dense<0.000000e+00> : vector<64x32xf32>
    %104 = tpu.matmul %101, %103, %cst_107 {dimension_numbers = #tpu.dot_dimension_numbers<[1], [0], [0], [1], [0, 0, 1, 1], [], []>} : vector<64x32xbf16>, vector<32x32xbf16>, vector<64x32xf32> -> vector<64x32xf32>
    %105 = arith.addf %98, %104 : vector<64x32xf32>
    %c0_108 = arith.constant 0 : index
    %c1_109 = arith.constant 1 : index
    %c0_110 = arith.constant 0 : index
    %106 = vector.load %arg16[%c0_108, %c1_109, %c0_110] : memref<10x10x32xf32, #tpu.memory_space<vmem>>, vector<8x8x32xf32>
    %107 = vector.shape_cast %106 : vector<8x8x32xf32> to vector<64x32xf32>
    %108 = arith.truncf %107 : vector<64x32xf32> to vector<64x32xbf16>
    %c1_111 = arith.constant 1 : index
    %c0_112 = arith.constant 0 : index
    %c0_113 = arith.constant 0 : index
    %109 = vector.load %arg9[%c1_111, %c0_112, %c0_113] : memref<9x32x32xbf16, #tpu.memory_space<vmem>>, vector<1x32x32xbf16>
    %110 = vector.shape_cast %109 : vector<1x32x32xbf16> to vector<32x32xbf16>
    %cst_114 = arith.constant dense<0.000000e+00> : vector<64x32xf32>
    %111 = tpu.matmul %108, %110, %cst_114 {dimension_numbers = #tpu.dot_dimension_numbers<[1], [0], [0], [1], [0, 0, 1, 1], [], []>} : vector<64x32xbf16>, vector<32x32xbf16>, vector<64x32xf32> -> vector<64x32xf32>
    %112 = arith.addf %105, %111 : vector<64x32xf32>
    %c0_115 = arith.constant 0 : index
    %c2_116 = arith.constant 2 : index
    %c0_117 = arith.constant 0 : index
    %113 = vector.load %arg16[%c0_115, %c2_116, %c0_117] : memref<10x10x32xf32, #tpu.memory_space<vmem>>, vector<8x8x32xf32>
    %114 = vector.shape_cast %113 : vector<8x8x32xf32> to vector<64x32xf32>
    %115 = arith.truncf %114 : vector<64x32xf32> to vector<64x32xbf16>
    %c2_118 = arith.constant 2 : index
    %c0_119 = arith.constant 0 : index
    %c0_120 = arith.constant 0 : index
    %116 = vector.load %arg9[%c2_118, %c0_119, %c0_120] : memref<9x32x32xbf16, #tpu.memory_space<vmem>>, vector<1x32x32xbf16>
    %117 = vector.shape_cast %116 : vector<1x32x32xbf16> to vector<32x32xbf16>
    %cst_121 = arith.constant dense<0.000000e+00> : vector<64x32xf32>
    %118 = tpu.matmul %115, %117, %cst_121 {dimension_numbers = #tpu.dot_dimension_numbers<[1], [0], [0], [1], [0, 0, 1, 1], [], []>} : vector<64x32xbf16>, vector<32x32xbf16>, vector<64x32xf32> -> vector<64x32xf32>
    %119 = arith.addf %112, %118 : vector<64x32xf32>
    %c1_122 = arith.constant 1 : index
    %c0_123 = arith.constant 0 : index
    %c0_124 = arith.constant 0 : index
    %120 = vector.load %arg16[%c1_122, %c0_123, %c0_124] : memref<10x10x32xf32, #tpu.memory_space<vmem>>, vector<8x8x32xf32>
    %121 = vector.shape_cast %120 : vector<8x8x32xf32> to vector<64x32xf32>
    %122 = arith.truncf %121 : vector<64x32xf32> to vector<64x32xbf16>
    %c3_125 = arith.constant 3 : index
    %c0_126 = arith.constant 0 : index
    %c0_127 = arith.constant 0 : index
    %123 = vector.load %arg9[%c3_125, %c0_126, %c0_127] : memref<9x32x32xbf16, #tpu.memory_space<vmem>>, vector<1x32x32xbf16>
    %124 = vector.shape_cast %123 : vector<1x32x32xbf16> to vector<32x32xbf16>
    %cst_128 = arith.constant dense<0.000000e+00> : vector<64x32xf32>
    %125 = tpu.matmul %122, %124, %cst_128 {dimension_numbers = #tpu.dot_dimension_numbers<[1], [0], [0], [1], [0, 0, 1, 1], [], []>} : vector<64x32xbf16>, vector<32x32xbf16>, vector<64x32xf32> -> vector<64x32xf32>
    %126 = arith.addf %119, %125 : vector<64x32xf32>
    %c1_129 = arith.constant 1 : index
    %c1_130 = arith.constant 1 : index
    %c0_131 = arith.constant 0 : index
    %127 = vector.load %arg16[%c1_129, %c1_130, %c0_131] : memref<10x10x32xf32, #tpu.memory_space<vmem>>, vector<8x8x32xf32>
    %128 = vector.shape_cast %127 : vector<8x8x32xf32> to vector<64x32xf32>
    %129 = arith.truncf %128 : vector<64x32xf32> to vector<64x32xbf16>
    %c4_132 = arith.constant 4 : index
    %c0_133 = arith.constant 0 : index
    %c0_134 = arith.constant 0 : index
    %130 = vector.load %arg9[%c4_132, %c0_133, %c0_134] : memref<9x32x32xbf16, #tpu.memory_space<vmem>>, vector<1x32x32xbf16>
    %131 = vector.shape_cast %130 : vector<1x32x32xbf16> to vector<32x32xbf16>
    %cst_135 = arith.constant dense<0.000000e+00> : vector<64x32xf32>
    %132 = tpu.matmul %129, %131, %cst_135 {dimension_numbers = #tpu.dot_dimension_numbers<[1], [0], [0], [1], [0, 0, 1, 1], [], []>} : vector<64x32xbf16>, vector<32x32xbf16>, vector<64x32xf32> -> vector<64x32xf32>
    %133 = arith.addf %126, %132 : vector<64x32xf32>
    %c1_136 = arith.constant 1 : index
    %c2_137 = arith.constant 2 : index
    %c0_138 = arith.constant 0 : index
    %134 = vector.load %arg16[%c1_136, %c2_137, %c0_138] : memref<10x10x32xf32, #tpu.memory_space<vmem>>, vector<8x8x32xf32>
    %135 = vector.shape_cast %134 : vector<8x8x32xf32> to vector<64x32xf32>
    %136 = arith.truncf %135 : vector<64x32xf32> to vector<64x32xbf16>
    %c5_139 = arith.constant 5 : index
    %c0_140 = arith.constant 0 : index
    %c0_141 = arith.constant 0 : index
    %137 = vector.load %arg9[%c5_139, %c0_140, %c0_141] : memref<9x32x32xbf16, #tpu.memory_space<vmem>>, vector<1x32x32xbf16>
    %138 = vector.shape_cast %137 : vector<1x32x32xbf16> to vector<32x32xbf16>
    %cst_142 = arith.constant dense<0.000000e+00> : vector<64x32xf32>
    %139 = tpu.matmul %136, %138, %cst_142 {dimension_numbers = #tpu.dot_dimension_numbers<[1], [0], [0], [1], [0, 0, 1, 1], [], []>} : vector<64x32xbf16>, vector<32x32xbf16>, vector<64x32xf32> -> vector<64x32xf32>
    %140 = arith.addf %133, %139 : vector<64x32xf32>
    %c2_143 = arith.constant 2 : index
    %c0_144 = arith.constant 0 : index
    %c0_145 = arith.constant 0 : index
    %141 = vector.load %arg16[%c2_143, %c0_144, %c0_145] : memref<10x10x32xf32, #tpu.memory_space<vmem>>, vector<8x8x32xf32>
    %142 = vector.shape_cast %141 : vector<8x8x32xf32> to vector<64x32xf32>
    %143 = arith.truncf %142 : vector<64x32xf32> to vector<64x32xbf16>
    %c6_146 = arith.constant 6 : index
    %c0_147 = arith.constant 0 : index
    %c0_148 = arith.constant 0 : index
    %144 = vector.load %arg9[%c6_146, %c0_147, %c0_148] : memref<9x32x32xbf16, #tpu.memory_space<vmem>>, vector<1x32x32xbf16>
    %145 = vector.shape_cast %144 : vector<1x32x32xbf16> to vector<32x32xbf16>
    %cst_149 = arith.constant dense<0.000000e+00> : vector<64x32xf32>
    %146 = tpu.matmul %143, %145, %cst_149 {dimension_numbers = #tpu.dot_dimension_numbers<[1], [0], [0], [1], [0, 0, 1, 1], [], []>} : vector<64x32xbf16>, vector<32x32xbf16>, vector<64x32xf32> -> vector<64x32xf32>
    %147 = arith.addf %140, %146 : vector<64x32xf32>
    %c2_150 = arith.constant 2 : index
    %c1_151 = arith.constant 1 : index
    %c0_152 = arith.constant 0 : index
    %148 = vector.load %arg16[%c2_150, %c1_151, %c0_152] : memref<10x10x32xf32, #tpu.memory_space<vmem>>, vector<8x8x32xf32>
    %149 = vector.shape_cast %148 : vector<8x8x32xf32> to vector<64x32xf32>
    %150 = arith.truncf %149 : vector<64x32xf32> to vector<64x32xbf16>
    %c7_153 = arith.constant 7 : index
    %c0_154 = arith.constant 0 : index
    %c0_155 = arith.constant 0 : index
    %151 = vector.load %arg9[%c7_153, %c0_154, %c0_155] : memref<9x32x32xbf16, #tpu.memory_space<vmem>>, vector<1x32x32xbf16>
    %152 = vector.shape_cast %151 : vector<1x32x32xbf16> to vector<32x32xbf16>
    %cst_156 = arith.constant dense<0.000000e+00> : vector<64x32xf32>
    %153 = tpu.matmul %150, %152, %cst_156 {dimension_numbers = #tpu.dot_dimension_numbers<[1], [0], [0], [1], [0, 0, 1, 1], [], []>} : vector<64x32xbf16>, vector<32x32xbf16>, vector<64x32xf32> -> vector<64x32xf32>
    %154 = arith.addf %147, %153 : vector<64x32xf32>
    %c2_157 = arith.constant 2 : index
    %c2_158 = arith.constant 2 : index
    %c0_159 = arith.constant 0 : index
    %155 = vector.load %arg16[%c2_157, %c2_158, %c0_159] : memref<10x10x32xf32, #tpu.memory_space<vmem>>, vector<8x8x32xf32>
    %156 = vector.shape_cast %155 : vector<8x8x32xf32> to vector<64x32xf32>
    %157 = arith.truncf %156 : vector<64x32xf32> to vector<64x32xbf16>
    %c8_160 = arith.constant 8 : index
    %c0_161 = arith.constant 0 : index
    %c0_162 = arith.constant 0 : index
    %158 = vector.load %arg9[%c8_160, %c0_161, %c0_162] : memref<9x32x32xbf16, #tpu.memory_space<vmem>>, vector<1x32x32xbf16>
    %159 = vector.shape_cast %158 : vector<1x32x32xbf16> to vector<32x32xbf16>
    %cst_163 = arith.constant dense<0.000000e+00> : vector<64x32xf32>
    %160 = tpu.matmul %157, %159, %cst_163 {dimension_numbers = #tpu.dot_dimension_numbers<[1], [0], [0], [1], [0, 0, 1, 1], [], []>} : vector<64x32xbf16>, vector<32x32xbf16>, vector<64x32xf32> -> vector<64x32xf32>
    %161 = arith.addf %154, %160 : vector<64x32xf32>
    %162 = arith.addf %161, %95 : vector<64x32xf32>
    %cst_164 = arith.constant 0.000000e+00 : f32
    %163 = vector.broadcast %cst_164 : f32 to vector<64x32xf32>
    %164 = arith.maximumf %162, %163 : vector<64x32xf32>
    %165 = vector.shape_cast %164 : vector<64x32xf32> to vector<1x64x32xf32>
    %166 = arith.truncf %165 : vector<1x64x32xf32> to vector<1x64x32xbf16>
    %c0_165 = arith.constant 0 : index
    %c0_166 = arith.constant 0 : index
    %c0_167 = arith.constant 0 : index
    %167 = vector.load %arg11[%c0_165, %c0_166, %c0_167] : memref<1x64x32xbf16, #tpu.memory_space<vmem>>, vector<1x64x32xbf16>
    tpu.vector_store %arg11[%c0_165, %c0_166, %c0_167], %166 {strides = array<i32>} : memref<1x64x32xbf16, #tpu.memory_space<vmem>>, vector<1x64x32xbf16>,
    return
  }
  func.func @transform_0(%arg0: i32) -> (i32, i32, i32, i32) {
    %c0_i32 = arith.constant 0 : i32
    %c0_i32_0 = arith.constant 0 : i32
    %c0_i32_1 = arith.constant 0 : i32
    %c0_i32_2 = arith.constant 0 : i32
    return %arg0, %c0_i32, %c0_i32_0, %c0_i32_1 : i32, i32, i32, i32
  }
  func.func @transform_1(%arg0: i32) -> (i32, i32, i32, i32) {
    %c0_i32 = arith.constant 0 : i32
    %c0_i32_0 = arith.constant 0 : i32
    %c0_i32_1 = arith.constant 0 : i32
    %c0_i32_2 = arith.constant 0 : i32
    return %arg0, %c0_i32, %c0_i32_0, %c0_i32_1 : i32, i32, i32, i32
  }
  func.func @transform_2(%arg0: i32) -> (i32, i32, i32, i32) {
    %c0_i32 = arith.constant 0 : i32
    %c0_i32_0 = arith.constant 0 : i32
    %c0_i32_1 = arith.constant 0 : i32
    %c0_i32_2 = arith.constant 0 : i32
    return %arg0, %c0_i32, %c0_i32_0, %c0_i32_1 : i32, i32, i32, i32
  }
  func.func @transform_3(%arg0: i32) -> (i32, i32, i32, i32) {
    %c0_i32 = arith.constant 0 : i32
    %c0_i32_0 = arith.constant 0 : i32
    %c0_i32_1 = arith.constant 0 : i32
    %c0_i32_2 = arith.constant 0 : i32
    return %arg0, %c0_i32, %c0_i32_0, %c0_i32_1 : i32, i32, i32, i32
  }
  func.func @transform_4(%arg0: i32) -> (i32, i32, i32) {
    %c0_i32 = arith.constant 0 : i32
    %c0_i32_0 = arith.constant 0 : i32
    %c0_i32_1 = arith.constant 0 : i32
    %c0_i32_2 = arith.constant 0 : i32
    return %c0_i32, %c0_i32_0, %c0_i32_1 : i32, i32, i32
  }
  func.func @transform_5(%arg0: i32) -> (i32, i32) {
    %c0_i32 = arith.constant 0 : i32
    %c0_i32_0 = arith.constant 0 : i32
    %c0_i32_1 = arith.constant 0 : i32
    return %c0_i32, %c0_i32_0 : i32, i32
  }
  func.func @transform_6(%arg0: i32) -> (i32, i32) {
    %c0_i32 = arith.constant 0 : i32
    %c0_i32_0 = arith.constant 0 : i32
    %c0_i32_1 = arith.constant 0 : i32
    return %c0_i32, %c0_i32_0 : i32, i32
  }
  func.func @transform_7(%arg0: i32) -> (i32, i32) {
    %c0_i32 = arith.constant 0 : i32
    %c0_i32_0 = arith.constant 0 : i32
    %c0_i32_1 = arith.constant 0 : i32
    return %c0_i32, %c0_i32_0 : i32, i32
  }
  func.func @transform_8(%arg0: i32) -> (i32, i32, i32) {
    %c0_i32 = arith.constant 0 : i32
    %c0_i32_0 = arith.constant 0 : i32
    %c0_i32_1 = arith.constant 0 : i32
    %c0_i32_2 = arith.constant 0 : i32
    return %c0_i32, %c0_i32_0, %c0_i32_1 : i32, i32, i32
  }
  func.func @transform_9(%arg0: i32) -> (i32, i32) {
    %c0_i32 = arith.constant 0 : i32
    %c0_i32_0 = arith.constant 0 : i32
    %c0_i32_1 = arith.constant 0 : i32
    return %c0_i32, %c0_i32_0 : i32, i32
  }
  func.func @transform_10(%arg0: i32) -> (i32, i32, i32) {
    %c0_i32 = arith.constant 0 : i32
    %c0_i32_0 = arith.constant 0 : i32
    %c0_i32_1 = arith.constant 0 : i32
    return %arg0, %c0_i32, %c0_i32_0 : i32, i32, i32
  }
}

module attributes {stable_mosaic.version = 11 : i64} {
  func.func @_block_kernel_id(%arg0: i32, %arg1: memref<1x10x10x32xbf16, #tpu.memory_space<vmem>>, %arg2: memref<9x32x32xbf16, #tpu.memory_space<vmem>>, %arg3: memref<1x32xf32, #tpu.memory_space<vmem>>, %arg4: memref<9x32x32xbf16, #tpu.memory_space<vmem>>, %arg5: memref<1x32xf32, #tpu.memory_space<vmem>>, %arg6: memref<1x64x32xbf16, #tpu.memory_space<vmem>>, %arg7: memref<10x10x32xf32, #tpu.memory_space<vmem>>, %arg8: memref<10x10x32xf32, #tpu.memory_space<vmem>>) attributes {dimension_semantics = [#tpu.dimension_semantics<parallel>], iteration_bounds = array<i64: 2>, scalar_prefetch = 0 : i64, scratch_operands = 2 : i64, tpu.core_type = #tpu.core_type<tc>, window_params = [{transform_indices = @transform_0, window_bounds = array<i64: 1, 10, 10, 32>}, {pipeline_mode = #tpu.pipeline_mode<synchronous>, transform_indices = @transform_1, window_bounds = array<i64: 9, 32, 32>}, {pipeline_mode = #tpu.pipeline_mode<synchronous>, transform_indices = @transform_2, window_bounds = array<i64: 1, 32>}, {pipeline_mode = #tpu.pipeline_mode<synchronous>, transform_indices = @transform_3, window_bounds = array<i64: 9, 32, 32>}, {pipeline_mode = #tpu.pipeline_mode<synchronous>, transform_indices = @transform_4, window_bounds = array<i64: 1, 32>}, {transform_indices = @transform_5, window_bounds = array<i64: 1, 64, 32>}]} {
    %c0 = arith.constant 0 : index
    %c0_0 = arith.constant 0 : index
    %c0_1 = arith.constant 0 : index
    %c0_2 = arith.constant 0 : index
    %0 = vector.load %arg1[%c0, %c0_0, %c0_1, %c0_2] : memref<1x10x10x32xbf16, #tpu.memory_space<vmem>>, vector<1x10x10x32xbf16>
    %1 = vector.shape_cast %0 : vector<1x10x10x32xbf16> to vector<10x10x32xbf16>
    %2 = arith.extf %1 : vector<10x10x32xbf16> to vector<10x10x32xf32>
    %c0_3 = arith.constant 0 : index
    %c0_4 = arith.constant 0 : index
    %c0_5 = arith.constant 0 : index
    %3 = vector.load %arg7[%c0_3, %c0_4, %c0_5] : memref<10x10x32xf32, #tpu.memory_space<vmem>>, vector<10x10x32xf32>
    tpu.vector_store %arg7[%c0_3, %c0_4, %c0_5], %2 {strides = array<i32>} : memref<10x10x32xf32, #tpu.memory_space<vmem>>, vector<10x10x32xf32>,
    %c0_6 = arith.constant 0 : index
    %c0_7 = arith.constant 0 : index
    %4 = vector.load %arg3[%c0_6, %c0_7] : memref<1x32xf32, #tpu.memory_space<vmem>>, vector<1x32xf32>
    %5 = vector.shape_cast %4 : vector<1x32xf32> to vector<1x32xf32>
    %6 = vector.broadcast %5 : vector<1x32xf32> to vector<64x32xf32>
    %c0_8 = arith.constant 0 : index
    %c0_9 = arith.constant 0 : index
    %c0_10 = arith.constant 0 : index
    %7 = vector.load %arg7[%c0_8, %c0_9, %c0_10] : memref<10x10x32xf32, #tpu.memory_space<vmem>>, vector<8x8x32xf32>
    %8 = vector.shape_cast %7 : vector<8x8x32xf32> to vector<64x32xf32>
    %9 = arith.truncf %8 : vector<64x32xf32> to vector<64x32xbf16>
    %c0_11 = arith.constant 0 : index
    %c0_12 = arith.constant 0 : index
    %c0_13 = arith.constant 0 : index
    %10 = vector.load %arg2[%c0_11, %c0_12, %c0_13] : memref<9x32x32xbf16, #tpu.memory_space<vmem>>, vector<1x32x32xbf16>
    %11 = vector.shape_cast %10 : vector<1x32x32xbf16> to vector<32x32xbf16>
    %cst = arith.constant dense<0.000000e+00> : vector<64x32xf32>
    %12 = tpu.matmul %9, %11, %cst {dimension_numbers = #tpu.dot_dimension_numbers<[1], [0], [0], [1], [0, 0, 1, 1], [], []>} : vector<64x32xbf16>, vector<32x32xbf16>, vector<64x32xf32> -> vector<64x32xf32>
    %13 = arith.addf %6, %12 : vector<64x32xf32>
    %c0_14 = arith.constant 0 : index
    %c1 = arith.constant 1 : index
    %c0_15 = arith.constant 0 : index
    %14 = vector.load %arg7[%c0_14, %c1, %c0_15] : memref<10x10x32xf32, #tpu.memory_space<vmem>>, vector<8x8x32xf32>
    %15 = vector.shape_cast %14 : vector<8x8x32xf32> to vector<64x32xf32>
    %16 = arith.truncf %15 : vector<64x32xf32> to vector<64x32xbf16>
    %c1_16 = arith.constant 1 : index
    %c0_17 = arith.constant 0 : index
    %c0_18 = arith.constant 0 : index
    %17 = vector.load %arg2[%c1_16, %c0_17, %c0_18] : memref<9x32x32xbf16, #tpu.memory_space<vmem>>, vector<1x32x32xbf16>
    %18 = vector.shape_cast %17 : vector<1x32x32xbf16> to vector<32x32xbf16>
    %cst_19 = arith.constant dense<0.000000e+00> : vector<64x32xf32>
    %19 = tpu.matmul %16, %18, %cst_19 {dimension_numbers = #tpu.dot_dimension_numbers<[1], [0], [0], [1], [0, 0, 1, 1], [], []>} : vector<64x32xbf16>, vector<32x32xbf16>, vector<64x32xf32> -> vector<64x32xf32>
    %20 = arith.addf %13, %19 : vector<64x32xf32>
    %c0_20 = arith.constant 0 : index
    %c2 = arith.constant 2 : index
    %c0_21 = arith.constant 0 : index
    %21 = vector.load %arg7[%c0_20, %c2, %c0_21] : memref<10x10x32xf32, #tpu.memory_space<vmem>>, vector<8x8x32xf32>
    %22 = vector.shape_cast %21 : vector<8x8x32xf32> to vector<64x32xf32>
    %23 = arith.truncf %22 : vector<64x32xf32> to vector<64x32xbf16>
    %c2_22 = arith.constant 2 : index
    %c0_23 = arith.constant 0 : index
    %c0_24 = arith.constant 0 : index
    %24 = vector.load %arg2[%c2_22, %c0_23, %c0_24] : memref<9x32x32xbf16, #tpu.memory_space<vmem>>, vector<1x32x32xbf16>
    %25 = vector.shape_cast %24 : vector<1x32x32xbf16> to vector<32x32xbf16>
    %cst_25 = arith.constant dense<0.000000e+00> : vector<64x32xf32>
    %26 = tpu.matmul %23, %25, %cst_25 {dimension_numbers = #tpu.dot_dimension_numbers<[1], [0], [0], [1], [0, 0, 1, 1], [], []>} : vector<64x32xbf16>, vector<32x32xbf16>, vector<64x32xf32> -> vector<64x32xf32>
    %27 = arith.addf %20, %26 : vector<64x32xf32>
    %c1_26 = arith.constant 1 : index
    %c0_27 = arith.constant 0 : index
    %c0_28 = arith.constant 0 : index
    %28 = vector.load %arg7[%c1_26, %c0_27, %c0_28] : memref<10x10x32xf32, #tpu.memory_space<vmem>>, vector<8x8x32xf32>
    %29 = vector.shape_cast %28 : vector<8x8x32xf32> to vector<64x32xf32>
    %30 = arith.truncf %29 : vector<64x32xf32> to vector<64x32xbf16>
    %c3 = arith.constant 3 : index
    %c0_29 = arith.constant 0 : index
    %c0_30 = arith.constant 0 : index
    %31 = vector.load %arg2[%c3, %c0_29, %c0_30] : memref<9x32x32xbf16, #tpu.memory_space<vmem>>, vector<1x32x32xbf16>
    %32 = vector.shape_cast %31 : vector<1x32x32xbf16> to vector<32x32xbf16>
    %cst_31 = arith.constant dense<0.000000e+00> : vector<64x32xf32>
    %33 = tpu.matmul %30, %32, %cst_31 {dimension_numbers = #tpu.dot_dimension_numbers<[1], [0], [0], [1], [0, 0, 1, 1], [], []>} : vector<64x32xbf16>, vector<32x32xbf16>, vector<64x32xf32> -> vector<64x32xf32>
    %34 = arith.addf %27, %33 : vector<64x32xf32>
    %c1_32 = arith.constant 1 : index
    %c1_33 = arith.constant 1 : index
    %c0_34 = arith.constant 0 : index
    %35 = vector.load %arg7[%c1_32, %c1_33, %c0_34] : memref<10x10x32xf32, #tpu.memory_space<vmem>>, vector<8x8x32xf32>
    %36 = vector.shape_cast %35 : vector<8x8x32xf32> to vector<64x32xf32>
    %37 = arith.truncf %36 : vector<64x32xf32> to vector<64x32xbf16>
    %c4 = arith.constant 4 : index
    %c0_35 = arith.constant 0 : index
    %c0_36 = arith.constant 0 : index
    %38 = vector.load %arg2[%c4, %c0_35, %c0_36] : memref<9x32x32xbf16, #tpu.memory_space<vmem>>, vector<1x32x32xbf16>
    %39 = vector.shape_cast %38 : vector<1x32x32xbf16> to vector<32x32xbf16>
    %cst_37 = arith.constant dense<0.000000e+00> : vector<64x32xf32>
    %40 = tpu.matmul %37, %39, %cst_37 {dimension_numbers = #tpu.dot_dimension_numbers<[1], [0], [0], [1], [0, 0, 1, 1], [], []>} : vector<64x32xbf16>, vector<32x32xbf16>, vector<64x32xf32> -> vector<64x32xf32>
    %41 = arith.addf %34, %40 : vector<64x32xf32>
    %c1_38 = arith.constant 1 : index
    %c2_39 = arith.constant 2 : index
    %c0_40 = arith.constant 0 : index
    %42 = vector.load %arg7[%c1_38, %c2_39, %c0_40] : memref<10x10x32xf32, #tpu.memory_space<vmem>>, vector<8x8x32xf32>
    %43 = vector.shape_cast %42 : vector<8x8x32xf32> to vector<64x32xf32>
    %44 = arith.truncf %43 : vector<64x32xf32> to vector<64x32xbf16>
    %c5 = arith.constant 5 : index
    %c0_41 = arith.constant 0 : index
    %c0_42 = arith.constant 0 : index
    %45 = vector.load %arg2[%c5, %c0_41, %c0_42] : memref<9x32x32xbf16, #tpu.memory_space<vmem>>, vector<1x32x32xbf16>
    %46 = vector.shape_cast %45 : vector<1x32x32xbf16> to vector<32x32xbf16>
    %cst_43 = arith.constant dense<0.000000e+00> : vector<64x32xf32>
    %47 = tpu.matmul %44, %46, %cst_43 {dimension_numbers = #tpu.dot_dimension_numbers<[1], [0], [0], [1], [0, 0, 1, 1], [], []>} : vector<64x32xbf16>, vector<32x32xbf16>, vector<64x32xf32> -> vector<64x32xf32>
    %48 = arith.addf %41, %47 : vector<64x32xf32>
    %c2_44 = arith.constant 2 : index
    %c0_45 = arith.constant 0 : index
    %c0_46 = arith.constant 0 : index
    %49 = vector.load %arg7[%c2_44, %c0_45, %c0_46] : memref<10x10x32xf32, #tpu.memory_space<vmem>>, vector<8x8x32xf32>
    %50 = vector.shape_cast %49 : vector<8x8x32xf32> to vector<64x32xf32>
    %51 = arith.truncf %50 : vector<64x32xf32> to vector<64x32xbf16>
    %c6 = arith.constant 6 : index
    %c0_47 = arith.constant 0 : index
    %c0_48 = arith.constant 0 : index
    %52 = vector.load %arg2[%c6, %c0_47, %c0_48] : memref<9x32x32xbf16, #tpu.memory_space<vmem>>, vector<1x32x32xbf16>
    %53 = vector.shape_cast %52 : vector<1x32x32xbf16> to vector<32x32xbf16>
    %cst_49 = arith.constant dense<0.000000e+00> : vector<64x32xf32>
    %54 = tpu.matmul %51, %53, %cst_49 {dimension_numbers = #tpu.dot_dimension_numbers<[1], [0], [0], [1], [0, 0, 1, 1], [], []>} : vector<64x32xbf16>, vector<32x32xbf16>, vector<64x32xf32> -> vector<64x32xf32>
    %55 = arith.addf %48, %54 : vector<64x32xf32>
    %c2_50 = arith.constant 2 : index
    %c1_51 = arith.constant 1 : index
    %c0_52 = arith.constant 0 : index
    %56 = vector.load %arg7[%c2_50, %c1_51, %c0_52] : memref<10x10x32xf32, #tpu.memory_space<vmem>>, vector<8x8x32xf32>
    %57 = vector.shape_cast %56 : vector<8x8x32xf32> to vector<64x32xf32>
    %58 = arith.truncf %57 : vector<64x32xf32> to vector<64x32xbf16>
    %c7 = arith.constant 7 : index
    %c0_53 = arith.constant 0 : index
    %c0_54 = arith.constant 0 : index
    %59 = vector.load %arg2[%c7, %c0_53, %c0_54] : memref<9x32x32xbf16, #tpu.memory_space<vmem>>, vector<1x32x32xbf16>
    %60 = vector.shape_cast %59 : vector<1x32x32xbf16> to vector<32x32xbf16>
    %cst_55 = arith.constant dense<0.000000e+00> : vector<64x32xf32>
    %61 = tpu.matmul %58, %60, %cst_55 {dimension_numbers = #tpu.dot_dimension_numbers<[1], [0], [0], [1], [0, 0, 1, 1], [], []>} : vector<64x32xbf16>, vector<32x32xbf16>, vector<64x32xf32> -> vector<64x32xf32>
    %62 = arith.addf %55, %61 : vector<64x32xf32>
    %c2_56 = arith.constant 2 : index
    %c2_57 = arith.constant 2 : index
    %c0_58 = arith.constant 0 : index
    %63 = vector.load %arg7[%c2_56, %c2_57, %c0_58] : memref<10x10x32xf32, #tpu.memory_space<vmem>>, vector<8x8x32xf32>
    %64 = vector.shape_cast %63 : vector<8x8x32xf32> to vector<64x32xf32>
    %65 = arith.truncf %64 : vector<64x32xf32> to vector<64x32xbf16>
    %c8 = arith.constant 8 : index
    %c0_59 = arith.constant 0 : index
    %c0_60 = arith.constant 0 : index
    %66 = vector.load %arg2[%c8, %c0_59, %c0_60] : memref<9x32x32xbf16, #tpu.memory_space<vmem>>, vector<1x32x32xbf16>
    %67 = vector.shape_cast %66 : vector<1x32x32xbf16> to vector<32x32xbf16>
    %cst_61 = arith.constant dense<0.000000e+00> : vector<64x32xf32>
    %68 = tpu.matmul %65, %67, %cst_61 {dimension_numbers = #tpu.dot_dimension_numbers<[1], [0], [0], [1], [0, 0, 1, 1], [], []>} : vector<64x32xbf16>, vector<32x32xbf16>, vector<64x32xf32> -> vector<64x32xf32>
    %69 = arith.addf %62, %68 : vector<64x32xf32>
    %cst_62 = arith.constant 0.000000e+00 : f32
    %70 = vector.broadcast %cst_62 : f32 to vector<64x32xf32>
    %71 = arith.maximumf %69, %70 : vector<64x32xf32>
    %cst_63 = arith.constant 0.000000e+00 : f32
    %72 = vector.broadcast %cst_63 : f32 to vector<10x10x32xf32>
    %c0_64 = arith.constant 0 : index
    %c0_65 = arith.constant 0 : index
    %c0_66 = arith.constant 0 : index
    %73 = vector.load %arg8[%c0_64, %c0_65, %c0_66] : memref<10x10x32xf32, #tpu.memory_space<vmem>>, vector<10x10x32xf32>
    tpu.vector_store %arg8[%c0_64, %c0_65, %c0_66], %72 {strides = array<i32>} : memref<10x10x32xf32, #tpu.memory_space<vmem>>, vector<10x10x32xf32>,
    %74 = vector.shape_cast %71 : vector<64x32xf32> to vector<8x8x32xf32>
    %c1_67 = arith.constant 1 : index
    %c1_68 = arith.constant 1 : index
    %c0_69 = arith.constant 0 : index
    %75 = vector.load %arg8[%c1_67, %c1_68, %c0_69] : memref<10x10x32xf32, #tpu.memory_space<vmem>>, vector<8x8x32xf32>
    tpu.vector_store %arg8[%c1_67, %c1_68, %c0_69], %74 {strides = array<i32>} : memref<10x10x32xf32, #tpu.memory_space<vmem>>, vector<8x8x32xf32>,
    %c1_70 = arith.constant 1 : index
    %c1_71 = arith.constant 1 : index
    %c0_72 = arith.constant 0 : index
    %76 = vector.load %arg7[%c1_70, %c1_71, %c0_72] : memref<10x10x32xf32, #tpu.memory_space<vmem>>, vector<8x8x32xf32>
    %77 = vector.shape_cast %76 : vector<8x8x32xf32> to vector<64x32xf32>
    %c0_73 = arith.constant 0 : index
    %c0_74 = arith.constant 0 : index
    %78 = vector.load %arg5[%c0_73, %c0_74] : memref<1x32xf32, #tpu.memory_space<vmem>>, vector<1x32xf32>
    %79 = vector.shape_cast %78 : vector<1x32xf32> to vector<1x32xf32>
    %80 = vector.broadcast %79 : vector<1x32xf32> to vector<64x32xf32>
    %c0_75 = arith.constant 0 : index
    %c0_76 = arith.constant 0 : index
    %c0_77 = arith.constant 0 : index
    %81 = vector.load %arg8[%c0_75, %c0_76, %c0_77] : memref<10x10x32xf32, #tpu.memory_space<vmem>>, vector<8x8x32xf32>
    %82 = vector.shape_cast %81 : vector<8x8x32xf32> to vector<64x32xf32>
    %83 = arith.truncf %82 : vector<64x32xf32> to vector<64x32xbf16>
    %c0_78 = arith.constant 0 : index
    %c0_79 = arith.constant 0 : index
    %c0_80 = arith.constant 0 : index
    %84 = vector.load %arg4[%c0_78, %c0_79, %c0_80] : memref<9x32x32xbf16, #tpu.memory_space<vmem>>, vector<1x32x32xbf16>
    %85 = vector.shape_cast %84 : vector<1x32x32xbf16> to vector<32x32xbf16>
    %cst_81 = arith.constant dense<0.000000e+00> : vector<64x32xf32>
    %86 = tpu.matmul %83, %85, %cst_81 {dimension_numbers = #tpu.dot_dimension_numbers<[1], [0], [0], [1], [0, 0, 1, 1], [], []>} : vector<64x32xbf16>, vector<32x32xbf16>, vector<64x32xf32> -> vector<64x32xf32>
    %87 = arith.addf %80, %86 : vector<64x32xf32>
    %c0_82 = arith.constant 0 : index
    %c1_83 = arith.constant 1 : index
    %c0_84 = arith.constant 0 : index
    %88 = vector.load %arg8[%c0_82, %c1_83, %c0_84] : memref<10x10x32xf32, #tpu.memory_space<vmem>>, vector<8x8x32xf32>
    %89 = vector.shape_cast %88 : vector<8x8x32xf32> to vector<64x32xf32>
    %90 = arith.truncf %89 : vector<64x32xf32> to vector<64x32xbf16>
    %c1_85 = arith.constant 1 : index
    %c0_86 = arith.constant 0 : index
    %c0_87 = arith.constant 0 : index
    %91 = vector.load %arg4[%c1_85, %c0_86, %c0_87] : memref<9x32x32xbf16, #tpu.memory_space<vmem>>, vector<1x32x32xbf16>
    %92 = vector.shape_cast %91 : vector<1x32x32xbf16> to vector<32x32xbf16>
    %cst_88 = arith.constant dense<0.000000e+00> : vector<64x32xf32>
    %93 = tpu.matmul %90, %92, %cst_88 {dimension_numbers = #tpu.dot_dimension_numbers<[1], [0], [0], [1], [0, 0, 1, 1], [], []>} : vector<64x32xbf16>, vector<32x32xbf16>, vector<64x32xf32> -> vector<64x32xf32>
    %94 = arith.addf %87, %93 : vector<64x32xf32>
    %c0_89 = arith.constant 0 : index
    %c2_90 = arith.constant 2 : index
    %c0_91 = arith.constant 0 : index
    %95 = vector.load %arg8[%c0_89, %c2_90, %c0_91] : memref<10x10x32xf32, #tpu.memory_space<vmem>>, vector<8x8x32xf32>
    %96 = vector.shape_cast %95 : vector<8x8x32xf32> to vector<64x32xf32>
    %97 = arith.truncf %96 : vector<64x32xf32> to vector<64x32xbf16>
    %c2_92 = arith.constant 2 : index
    %c0_93 = arith.constant 0 : index
    %c0_94 = arith.constant 0 : index
    %98 = vector.load %arg4[%c2_92, %c0_93, %c0_94] : memref<9x32x32xbf16, #tpu.memory_space<vmem>>, vector<1x32x32xbf16>
    %99 = vector.shape_cast %98 : vector<1x32x32xbf16> to vector<32x32xbf16>
    %cst_95 = arith.constant dense<0.000000e+00> : vector<64x32xf32>
    %100 = tpu.matmul %97, %99, %cst_95 {dimension_numbers = #tpu.dot_dimension_numbers<[1], [0], [0], [1], [0, 0, 1, 1], [], []>} : vector<64x32xbf16>, vector<32x32xbf16>, vector<64x32xf32> -> vector<64x32xf32>
    %101 = arith.addf %94, %100 : vector<64x32xf32>
    %c1_96 = arith.constant 1 : index
    %c0_97 = arith.constant 0 : index
    %c0_98 = arith.constant 0 : index
    %102 = vector.load %arg8[%c1_96, %c0_97, %c0_98] : memref<10x10x32xf32, #tpu.memory_space<vmem>>, vector<8x8x32xf32>
    %103 = vector.shape_cast %102 : vector<8x8x32xf32> to vector<64x32xf32>
    %104 = arith.truncf %103 : vector<64x32xf32> to vector<64x32xbf16>
    %c3_99 = arith.constant 3 : index
    %c0_100 = arith.constant 0 : index
    %c0_101 = arith.constant 0 : index
    %105 = vector.load %arg4[%c3_99, %c0_100, %c0_101] : memref<9x32x32xbf16, #tpu.memory_space<vmem>>, vector<1x32x32xbf16>
    %106 = vector.shape_cast %105 : vector<1x32x32xbf16> to vector<32x32xbf16>
    %cst_102 = arith.constant dense<0.000000e+00> : vector<64x32xf32>
    %107 = tpu.matmul %104, %106, %cst_102 {dimension_numbers = #tpu.dot_dimension_numbers<[1], [0], [0], [1], [0, 0, 1, 1], [], []>} : vector<64x32xbf16>, vector<32x32xbf16>, vector<64x32xf32> -> vector<64x32xf32>
    %108 = arith.addf %101, %107 : vector<64x32xf32>
    %c1_103 = arith.constant 1 : index
    %c1_104 = arith.constant 1 : index
    %c0_105 = arith.constant 0 : index
    %109 = vector.load %arg8[%c1_103, %c1_104, %c0_105] : memref<10x10x32xf32, #tpu.memory_space<vmem>>, vector<8x8x32xf32>
    %110 = vector.shape_cast %109 : vector<8x8x32xf32> to vector<64x32xf32>
    %111 = arith.truncf %110 : vector<64x32xf32> to vector<64x32xbf16>
    %c4_106 = arith.constant 4 : index
    %c0_107 = arith.constant 0 : index
    %c0_108 = arith.constant 0 : index
    %112 = vector.load %arg4[%c4_106, %c0_107, %c0_108] : memref<9x32x32xbf16, #tpu.memory_space<vmem>>, vector<1x32x32xbf16>
    %113 = vector.shape_cast %112 : vector<1x32x32xbf16> to vector<32x32xbf16>
    %cst_109 = arith.constant dense<0.000000e+00> : vector<64x32xf32>
    %114 = tpu.matmul %111, %113, %cst_109 {dimension_numbers = #tpu.dot_dimension_numbers<[1], [0], [0], [1], [0, 0, 1, 1], [], []>} : vector<64x32xbf16>, vector<32x32xbf16>, vector<64x32xf32> -> vector<64x32xf32>
    %115 = arith.addf %108, %114 : vector<64x32xf32>
    %c1_110 = arith.constant 1 : index
    %c2_111 = arith.constant 2 : index
    %c0_112 = arith.constant 0 : index
    %116 = vector.load %arg8[%c1_110, %c2_111, %c0_112] : memref<10x10x32xf32, #tpu.memory_space<vmem>>, vector<8x8x32xf32>
    %117 = vector.shape_cast %116 : vector<8x8x32xf32> to vector<64x32xf32>
    %118 = arith.truncf %117 : vector<64x32xf32> to vector<64x32xbf16>
    %c5_113 = arith.constant 5 : index
    %c0_114 = arith.constant 0 : index
    %c0_115 = arith.constant 0 : index
    %119 = vector.load %arg4[%c5_113, %c0_114, %c0_115] : memref<9x32x32xbf16, #tpu.memory_space<vmem>>, vector<1x32x32xbf16>
    %120 = vector.shape_cast %119 : vector<1x32x32xbf16> to vector<32x32xbf16>
    %cst_116 = arith.constant dense<0.000000e+00> : vector<64x32xf32>
    %121 = tpu.matmul %118, %120, %cst_116 {dimension_numbers = #tpu.dot_dimension_numbers<[1], [0], [0], [1], [0, 0, 1, 1], [], []>} : vector<64x32xbf16>, vector<32x32xbf16>, vector<64x32xf32> -> vector<64x32xf32>
    %122 = arith.addf %115, %121 : vector<64x32xf32>
    %c2_117 = arith.constant 2 : index
    %c0_118 = arith.constant 0 : index
    %c0_119 = arith.constant 0 : index
    %123 = vector.load %arg8[%c2_117, %c0_118, %c0_119] : memref<10x10x32xf32, #tpu.memory_space<vmem>>, vector<8x8x32xf32>
    %124 = vector.shape_cast %123 : vector<8x8x32xf32> to vector<64x32xf32>
    %125 = arith.truncf %124 : vector<64x32xf32> to vector<64x32xbf16>
    %c6_120 = arith.constant 6 : index
    %c0_121 = arith.constant 0 : index
    %c0_122 = arith.constant 0 : index
    %126 = vector.load %arg4[%c6_120, %c0_121, %c0_122] : memref<9x32x32xbf16, #tpu.memory_space<vmem>>, vector<1x32x32xbf16>
    %127 = vector.shape_cast %126 : vector<1x32x32xbf16> to vector<32x32xbf16>
    %cst_123 = arith.constant dense<0.000000e+00> : vector<64x32xf32>
    %128 = tpu.matmul %125, %127, %cst_123 {dimension_numbers = #tpu.dot_dimension_numbers<[1], [0], [0], [1], [0, 0, 1, 1], [], []>} : vector<64x32xbf16>, vector<32x32xbf16>, vector<64x32xf32> -> vector<64x32xf32>
    %129 = arith.addf %122, %128 : vector<64x32xf32>
    %c2_124 = arith.constant 2 : index
    %c1_125 = arith.constant 1 : index
    %c0_126 = arith.constant 0 : index
    %130 = vector.load %arg8[%c2_124, %c1_125, %c0_126] : memref<10x10x32xf32, #tpu.memory_space<vmem>>, vector<8x8x32xf32>
    %131 = vector.shape_cast %130 : vector<8x8x32xf32> to vector<64x32xf32>
    %132 = arith.truncf %131 : vector<64x32xf32> to vector<64x32xbf16>
    %c7_127 = arith.constant 7 : index
    %c0_128 = arith.constant 0 : index
    %c0_129 = arith.constant 0 : index
    %133 = vector.load %arg4[%c7_127, %c0_128, %c0_129] : memref<9x32x32xbf16, #tpu.memory_space<vmem>>, vector<1x32x32xbf16>
    %134 = vector.shape_cast %133 : vector<1x32x32xbf16> to vector<32x32xbf16>
    %cst_130 = arith.constant dense<0.000000e+00> : vector<64x32xf32>
    %135 = tpu.matmul %132, %134, %cst_130 {dimension_numbers = #tpu.dot_dimension_numbers<[1], [0], [0], [1], [0, 0, 1, 1], [], []>} : vector<64x32xbf16>, vector<32x32xbf16>, vector<64x32xf32> -> vector<64x32xf32>
    %136 = arith.addf %129, %135 : vector<64x32xf32>
    %c2_131 = arith.constant 2 : index
    %c2_132 = arith.constant 2 : index
    %c0_133 = arith.constant 0 : index
    %137 = vector.load %arg8[%c2_131, %c2_132, %c0_133] : memref<10x10x32xf32, #tpu.memory_space<vmem>>, vector<8x8x32xf32>
    %138 = vector.shape_cast %137 : vector<8x8x32xf32> to vector<64x32xf32>
    %139 = arith.truncf %138 : vector<64x32xf32> to vector<64x32xbf16>
    %c8_134 = arith.constant 8 : index
    %c0_135 = arith.constant 0 : index
    %c0_136 = arith.constant 0 : index
    %140 = vector.load %arg4[%c8_134, %c0_135, %c0_136] : memref<9x32x32xbf16, #tpu.memory_space<vmem>>, vector<1x32x32xbf16>
    %141 = vector.shape_cast %140 : vector<1x32x32xbf16> to vector<32x32xbf16>
    %cst_137 = arith.constant dense<0.000000e+00> : vector<64x32xf32>
    %142 = tpu.matmul %139, %141, %cst_137 {dimension_numbers = #tpu.dot_dimension_numbers<[1], [0], [0], [1], [0, 0, 1, 1], [], []>} : vector<64x32xbf16>, vector<32x32xbf16>, vector<64x32xf32> -> vector<64x32xf32>
    %143 = arith.addf %136, %142 : vector<64x32xf32>
    %144 = arith.addf %143, %77 : vector<64x32xf32>
    %cst_138 = arith.constant 0.000000e+00 : f32
    %145 = vector.broadcast %cst_138 : f32 to vector<64x32xf32>
    %146 = arith.maximumf %144, %145 : vector<64x32xf32>
    %147 = vector.shape_cast %146 : vector<64x32xf32> to vector<1x64x32xf32>
    %148 = arith.truncf %147 : vector<1x64x32xf32> to vector<1x64x32xbf16>
    %c0_139 = arith.constant 0 : index
    %c0_140 = arith.constant 0 : index
    %c0_141 = arith.constant 0 : index
    %149 = vector.load %arg6[%c0_139, %c0_140, %c0_141] : memref<1x64x32xbf16, #tpu.memory_space<vmem>>, vector<1x64x32xbf16>
    tpu.vector_store %arg6[%c0_139, %c0_140, %c0_141], %148 {strides = array<i32>} : memref<1x64x32xbf16, #tpu.memory_space<vmem>>, vector<1x64x32xbf16>,
    return
  }
  func.func @transform_0(%arg0: i32) -> (i32, i32, i32, i32) {
    %c0_i32 = arith.constant 0 : i32
    %c0_i32_0 = arith.constant 0 : i32
    %c0_i32_1 = arith.constant 0 : i32
    %c0_i32_2 = arith.constant 0 : i32
    return %arg0, %c0_i32, %c0_i32_0, %c0_i32_1 : i32, i32, i32, i32
  }
  func.func @transform_1(%arg0: i32) -> (i32, i32, i32) {
    %c0_i32 = arith.constant 0 : i32
    %c0_i32_0 = arith.constant 0 : i32
    %c0_i32_1 = arith.constant 0 : i32
    %c0_i32_2 = arith.constant 0 : i32
    return %c0_i32, %c0_i32_0, %c0_i32_1 : i32, i32, i32
  }
  func.func @transform_2(%arg0: i32) -> (i32, i32) {
    %c0_i32 = arith.constant 0 : i32
    %c0_i32_0 = arith.constant 0 : i32
    %c0_i32_1 = arith.constant 0 : i32
    return %c0_i32, %c0_i32_0 : i32, i32
  }
  func.func @transform_3(%arg0: i32) -> (i32, i32, i32) {
    %c0_i32 = arith.constant 0 : i32
    %c0_i32_0 = arith.constant 0 : i32
    %c0_i32_1 = arith.constant 0 : i32
    %c0_i32_2 = arith.constant 0 : i32
    return %c0_i32, %c0_i32_0, %c0_i32_1 : i32, i32, i32
  }
  func.func @transform_4(%arg0: i32) -> (i32, i32) {
    %c0_i32 = arith.constant 0 : i32
    %c0_i32_0 = arith.constant 0 : i32
    %c0_i32_1 = arith.constant 0 : i32
    return %c0_i32, %c0_i32_0 : i32, i32
  }
  func.func @transform_5(%arg0: i32) -> (i32, i32, i32) {
    %c0_i32 = arith.constant 0 : i32
    %c0_i32_0 = arith.constant 0 : i32
    %c0_i32_1 = arith.constant 0 : i32
    return %arg0, %c0_i32, %c0_i32_0 : i32, i32, i32
  }
}

</mosaic_0001>

<bundles_post_ra>
// kernel: resnet_layer_forward.3
= control target key start
LH: loop header
LB: loop body
LE: loop exit
PB: predicated region body
PF: predicated region fallthrough
CT: control target
= control target key end

     0   :  { %s3266_s18 = smov 0   ;;  %s3708_s0 = inlined_call_operand.vmem [shape: bf16[2,10,10,32], index: 0, kind: input, shape index: {}]   ;;  %s3709_s1 = inlined_call_operand.vmem [shape: bf16[9,32,32], index: 1, kind: input, shape index: {}]   ;;  %s3710_s2 = inlined_call_operand.vmem [shape: f32[1,32], index: 2, kind: input, shape index: {}]   ;;  %s3711_s3 = inlined_call_operand.vmem [shape: bf16[9,32,32], index: 3, kind: input, shape index: {}]   ;;  %s3712_s4 = inlined_call_operand.vmem [shape: f32[1,32], index: 4, kind: input, shape index: {}]   ;;  %s3713_s5 = inlined_call_operand.vmem [shape: bf16[2,64,32], index: 5, kind: output, shape index: {}]  }
   0x1 LB: > { %s2512_s19 = sadd.s32 4294967295, %s3233_s18   ;;  %p2516_p0 = scmp.ge.s32.totalorder %s3233_s18, 1  ;;  %s3233_s18 = sphi %s3266_s18, %s15_s18  }
   0x2   : > { %p187_p1 = scmp.lt.s32.totalorder %s3233_s18, 3 }
   0x4   : > { %p188_p2 = pnand %p2516_p0, %p187_p1 }
   0x5   : > { %v3191_v0 = vld [vmem:[%s3709_s1] sm:$0xff] (!%p188_p2)   ;;  %p215_p3 = scmp.lt.s32.totalorder (!%p188_p2), %s2512_s19, 1  ;;  %v3192_v1 = vld [vmem:[%s3709_s1 + $0x8] sm:$0xff] (!%p188_p2)   ;;  %v3286_v2 = vld [vmem:[%s3709_s1 + $0x10] sm:$0xff] (!%p188_p2)   ;;  %vm266_vm0 = vcmask (!%p188_p2), 261120   ;;  %vm268_vm1 = vcmask (!%p188_p2), 254976  }
   0x6   : > { %191 = sbr.rel (%p188_p2) target bundleno = 748 (0x2ec), region = 40  ;;  %2821 = vmatprep.subr.bf16.mxu0 (!%p188_p2), %v3191_v0  ;;  %v3194_v45 = vld [vmem:[%s3709_s1 + $0x18] sm:$0xff] (!%p188_p2)   ;;  %v3195_v50 = vld [vmem:[%s3709_s1 + $0x20] sm:$0xff] (!%p188_p2)   ;;  %v3196_v59 = vld [vmem:[%s3709_s1 + $0x28] sm:$0xff] (!%p188_p2)   ;;  %vm2448_vm2 = vcmask (!%p188_p2), 257024  }
   0x7   : > { %2822 = vmatpush3.bf16.msra.mxu0 (!%p188_p2), %v3191_v0 }
   0x8   : > { %2823 = vmatprep.subr.bf16.mxu0 (!%p188_p2), %v3192_v1 }
   0xb   : > { %2824 = vmatpush3.bf16.msra.mxu0 (!%p188_p2), %v3192_v1 }
   0xc   : > { %2833 = vmatprep.subr.bf16.mxu0 (!%p188_p2), %v3286_v2 }
   0xd   : > { %s3715_s19 = smov (!%p215_p3, %s2512_s19), 1 }
   0xe   : > { %s3181_s24 = smul.u32 80, %s3715_s19  ;;  %s2704_s6 = sshll.u32 %s3715_s19, 5 }
   0xf   : > { %s3685_s9 = scalar_lea.vmem %s3713_s5, %s2704_s6 }
  0x10   : > { %s3291_s29 = scalar_lea.vmem %s3708_s0, %s3181_s24 }
  0x11   : > { %v226_v3 = vld [vmem:[%s3291_s29] ss:$8 sps:$4 sm:$0xff]   ;;  %v230_v4 = vld [vmem:[%s3291_s29 + $0x10] ss:$8 sps:$4 sm:$0xff]   ;;  %v227_v11 = vld [vmem:[%s3291_s29 + $0x4] sm:$0x1] }
  0x12   : > { %v234_v5 = vld [vmem:[%s3291_s29 + $0x20] ss:$8 sps:$4 sm:$0xff]   ;;  %v246_v6 = vunpack.c.l.bf16 %v226_v3  ;;  %v248_v7 = vunpack.c.h.bf16 %v226_v3  ;;  %v250_v8 = vunpack.c.l.bf16 %v230_v4  ;;  %v252_v9 = vunpack.c.h.bf16 %v230_v4  ;;  %v238_v10 = vld [vmem:[%s3291_s29 + $0x30] ss:$8 sps:$4 sm:$0xff]   ;;  %v229_v12 = vld [vmem:[%s3291_s29 + $0xc] sm:$0x1] }
  0x13   : > { %v254_v13 = vunpack.c.l.bf16 %v234_v5  ;;  %v256_v14 = vunpack.c.h.bf16 %v234_v5  ;;  %v258_v15 = vunpack.c.l.bf16 %v238_v10  ;;  %v260_v16 = vunpack.c.h.bf16 %v238_v10  ;;  %v231_v17 = vld [vmem:[%s3291_s29 + $0x14] sm:$0x1]  ;;  %v233_v18 = vld [vmem:[%s3291_s29 + $0x1c] sm:$0x1]  ;;  %v235_v19 = vld [vmem:[%s3291_s29 + $0x24] sm:$0x1] }
  0x14   : > { %267 = vst.msk [vmem:[#allocation2] sm:$0xff] %vm266_vm0, %v246_v6  ;;  %270 = vst.msk [vmem:[#allocation2 + $0x10] sm:$0xff] %vm266_vm0, %v248_v7  ;;  %v247_v20 = vunpack.c.l.bf16 %v227_v11  ;;  %v249_v21 = vunpack.c.l.bf16 %v229_v12  ;;  %v251_v22 = vunpack.c.l.bf16 %v231_v17  ;;  %v253_v23 = vunpack.c.l.bf16 %v233_v18  ;;  %v237_v24 = vld [vmem:[%s3291_s29 + $0x2c] sm:$0x1]  ;;  %v239_v25 = vld [vmem:[%s3291_s29 + $0x34] sm:$0x1] }
  0x15   : > { %272 = vst.msk [vmem:[#allocation2 + $0x20] sm:$0xff] %vm266_vm0, %v250_v8  ;;  %274 = vst.msk [vmem:[#allocation2 + $0x30] sm:$0xff] %vm266_vm0, %v252_v9  ;;  %v241_v26 = vld [vmem:[%s3291_s29 + $0x3c] sm:$0x1]  ;;  %v255_v27 = vunpack.c.l.bf16 %v235_v19  ;;  %v257_v28 = vunpack.c.l.bf16 %v237_v24  ;;  %v259_v29 = vunpack.c.l.bf16 %v239_v25  ;;  %v242_v31 = vld [vmem:[%s3291_s29 + $0x40] ss:$8 sps:$4 sm:$0xff]  }
  0x16   : > { %276 = vst.msk [vmem:[#allocation2 + $0x40] sm:$0xff] %vm266_vm0, %v254_v13  ;;  %278 = vst.msk [vmem:[#allocation2 + $0x50] sm:$0xff] %vm266_vm0, %v256_v14  ;;  %v261_v30 = vunpack.c.l.bf16 %v241_v26  ;;  %v262_v32 = vunpack.c.l.bf16 %v242_v31  ;;  %v264_v33 = vunpack.c.h.bf16 %v242_v31  ;;  %v243_v34 = vld [vmem:[%s3291_s29 + $0x44] sm:$0x1]  ;;  %v245_v57 = vld [vmem:[%s3291_s29 + $0x4c] sm:$0x1] }
  0x17   : > { %280 = vst.msk [vmem:[#allocation2 + $0x60] sm:$0xff] %vm266_vm0, %v258_v15  ;;  %282 = vst.msk [vmem:[#allocation2 + $0x70] sm:$0xff] %vm266_vm0, %v260_v16  ;;  %v263_v38 = vunpack.c.l.bf16 %v243_v34  ;;  %v265_v60 = vunpack.c.l.bf16 %v245_v57  ;;  %v3198_v11 = vld [vmem:[%s3709_s1 + $0x38] sm:$0xff]   ;;  %v3199_v14 = vld [vmem:[%s3709_s1 + $0x40] sm:$0xff]  }
  0x18   : > { %269 = vst.msk [vmem:[#allocation2 + $0x8] sm:$0x3] %vm268_vm1, %v247_v20  ;;  %271 = vst.msk [vmem:[#allocation2 + $0x18] sm:$0x3] %vm268_vm1, %v249_v21  ;;  %v3200_v19 = vld [vmem:[%s3709_s1 + $0x48] sm:$0xff]   ;;  %v3201_v21 = vld [vmem:[%s3709_s1 + $0x50] sm:$0xff]  }
  0x19   : > { %273 = vst.msk [vmem:[#allocation2 + $0x28] sm:$0x3] %vm268_vm1, %v251_v22  ;;  %275 = vst.msk [vmem:[#allocation2 + $0x38] sm:$0x3] %vm268_vm1, %v253_v23  ;;  %v3202_v26 = vld [vmem:[%s3709_s1 + $0x58] sm:$0xff]  }
  0x1a   : > { %277 = vst.msk [vmem:[#allocation2 + $0x48] sm:$0x3] %vm268_vm1, %v255_v27  ;;  %279 = vst.msk [vmem:[#allocation2 + $0x58] sm:$0x3] %vm268_vm1, %v257_v28  ;;  %v3203_v28 = vld [vmem:[%s3709_s1 + $0x60] sm:$0xff]  }
  0x1b   : > { %281 = vst.msk [vmem:[#allocation2 + $0x68] sm:$0x3] %vm268_vm1, %v259_v29  ;;  %283 = vst.msk [vmem:[#allocation2 + $0x78] sm:$0x3] %vm268_vm1, %v261_v30  ;;  %v295_v35 = vld [vmem:[#allocation2] sm:$0xff]  ;;  %v3324_v36 = vld [vmem:[#allocation2 + $0x10] sm:$0xff] }
  0x1c   : > { %v3326_v37 = vld [vmem:[#allocation2 + $0x20] sm:$0xff]  ;;  %284 = vst.msk [vmem:[#allocation2 + $0x80] sm:$0xff] %vm266_vm0, %v262_v32  ;;  %286 = vst.msk [vmem:[#allocation2 + $0x90] sm:$0xff] %vm266_vm0, %v264_v33  ;;  %v303_v39 = vpack.c.bf16 %v3324_v36, %v295_v35  ;;  %v3331_v40 = vld [vmem:[#allocation2 + $0x30] sm:$0xff] }
  0x1d   : > { %v3333_v41 = vld [vmem:[#allocation2 + $0x40] sm:$0xff]  ;;  %v3335_v42 = vld [vmem:[#allocation2 + $0x50] sm:$0xff]  ;;  %v3339_v43 = vpack.c.bf16 %v3331_v40, %v3326_v37  ;;  %285 = vst.msk [vmem:[#allocation2 + $0x88] sm:$0x3] %vm268_vm1, %v263_v38  ;;  %287 = vst.msk [vmem:[#allocation2 + $0x98] sm:$0x3] %vm268_vm1, %v265_v60  ;;  %v645_v16 = vpack.c.bf16 %v3326_v37, %v3324_v36 }
  0x1e   : > { %v3343_v44 = vpack.c.bf16 %v3335_v42, %v3333_v41  ;;  %2825 = vmatprep.mubr.msk.bf16.mxu0 %vm266_vm0, %v303_v39  ;;  %v3355_v46 = vld [vmem:[#allocation2 + $0x60] sm:$0xff]  ;;  %v3357_v47 = vld [vmem:[#allocation2 + $0x70] sm:$0xff]  ;;  %v646_v17 = vpack.c.bf16 %v3333_v41, %v3331_v40  ;;  %v3204_v33 = vld [vmem:[%s3709_s1 + $0x68] sm:$0xff]  }
  0x1f   : > { %2826 = vmatmul.mubr.msk.bf16.vlgmr.msra.gmra.mrb[0].mxu0 %vm266_vm0, %v3339_v43  ;;  %v408_v48 = vld [vmem:[#allocation2 + $0x1] sm:$0xff]  ;;  %v3359_v49 = vld [vmem:[#allocation2 + $0x11] sm:$0xff]  ;;  %v3366_v51 = vpack.c.bf16 %v3357_v47, %v3355_v46  ;;  %v647_v18 = vpack.c.bf16 %v3355_v46, %v3335_v42  ;;  %v3235_v46 = vmov 0.0  }
  0x20   : > { %2834 = vmatpush3.bf16.msra.mxu0 %v3286_v2  ;;  %2829 = vmatprep.mubr.msk.bf16.mxu0 %vm266_vm0, %v3343_v44  ;;  %v416_v52 = vpack.c.bf16 %v3359_v49, %v408_v48  ;;  %v410_v53 = vld [vmem:[#allocation2 + $0x21] sm:$0xff]  ;;  %v3371_v54 = vld [vmem:[#allocation2 + $0x31] sm:$0xff]  ;;  %1336 = vst.msk [vmem:[#allocation3 + $0x30] sm:$0xff] %vm266_vm0, %v3235_v46  ;;  %1330 = vst.msk [vmem:[#allocation3] sm:$0xff] %vm266_vm0, %v3235_v46 }
  0x21   : > { %2835 = vmatprep.subr.bf16.mxu0 %v3194_v45  ;;  %v3374_v55 = vld [vmem:[#allocation2 + $0x41] sm:$0xff]  ;;  %v3376_v56 = vld [vmem:[#allocation2 + $0x51] sm:$0xff]  ;;  %v3380_v58 = vpack.c.bf16 %v3371_v54, %v410_v53  ;;  %v759_v23 = vpack.c.bf16 %v410_v53, %v3359_v49  ;;  %1337 = vst.msk [vmem:[#allocation3 + $0x38] sm:$0x3] %vm268_vm1, %v3235_v46  ;;  %1331 = vst.msk [vmem:[#allocation3 + $0x8] sm:$0x3] %vm268_vm1, %v3235_v46 }
  0x22   : > { %v3387_v61 = vpack.c.bf16 %v3376_v56, %v3374_v55  ;;  %v414_v62 = vld [vmem:[#allocation2 + $0x61] sm:$0xff]  ;;  %v3390_v63 = vld [vmem:[#allocation2 + $0x71] sm:$0xff]  ;;  %v760_v24 = vpack.c.bf16 %v3374_v55, %v3371_v54  ;;  %1332 = vst.msk [vmem:[#allocation3 + $0x10] sm:$0xff] %vm266_vm0, %v3235_v46  ;;  %1334 = vst.msk [vmem:[#allocation3 + $0x20] sm:$0xff] %vm266_vm0, %v3235_v46 }
  0x23   : > { %v522_v0 = vld [vmem:[#allocation2 + $0x2] sm:$0xff]  ;;  %v523_v1 = vld [vmem:[#allocation2 + $0x12] sm:$0xff]  ;;  %v3400_v3 = vpack.c.bf16 %v3390_v63, %v414_v62  ;;  %v761_v25 = vpack.c.bf16 %v414_v62, %v3376_v56  ;;  %1333 = vst.msk [vmem:[#allocation3 + $0x18] sm:$0x3] %vm268_vm1, %v3235_v46  ;;  %1335 = vst.msk [vmem:[#allocation3 + $0x28] sm:$0x3] %vm268_vm1, %v3235_v46 }
  0x24   : > { %2836 = vmatpush3.bf16.msra.mxu0 %v3194_v45  ;;  %v3197_v2 = vld [vmem:[%s3709_s1 + $0x30] sm:$0xff]   ;;  %v530_v4 = vpack.c.bf16 %v523_v1, %v522_v0  ;;  %v524_v5 = vld [vmem:[#allocation2 + $0x22] sm:$0xff]  ;;  %v3206_v37 = vld [vmem:[%s3709_s1 + $0x78] sm:$0xff]   ;;  %1338 = vst.msk [vmem:[#allocation3 + $0x40] sm:$0xff] %vm266_vm0, %v3235_v46 }
  0x25   : > { %2845 = vmatprep.subr.bf16.mxu0 %v3195_v50  ;;  %v525_v6 = vld [vmem:[#allocation2 + $0x32] sm:$0xff]  ;;  %v526_v7 = vld [vmem:[#allocation2 + $0x42] sm:$0xff]  ;;  %v873_v30 = vpack.c.bf16 %v524_v5, %v523_v1  ;;  %1339 = vst.msk [vmem:[#allocation3 + $0x48] sm:$0x3] %vm268_vm1, %v3235_v46  ;;  %1341 = vst.msk [vmem:[#allocation3 + $0x58] sm:$0x3] %vm268_vm1, %v3235_v46 }
  0x26   : > { %v527_v8 = vld [vmem:[#allocation2 + $0x52] sm:$0xff]  ;;  %v3405_v9 = vpack.c.bf16 %v525_v6, %v524_v5  ;;  %v528_v12 = vld [vmem:[#allocation2 + $0x62] sm:$0xff]  ;;  %v874_v31 = vpack.c.bf16 %v526_v7, %v525_v6  ;;  %1340 = vst.msk [vmem:[#allocation3 + $0x50] sm:$0xff] %vm266_vm0, %v3235_v46  ;;  %1342 = vst.msk [vmem:[#allocation3 + $0x60] sm:$0xff] %vm266_vm0, %v3235_v46 }
  0x27   : > { %2830 = vmatmul.mubr.msk.bf16.gmra.mrb[4].mxu0 %vm266_vm0, %v3366_v51  ;;  %v3407_v10 = vpack.c.bf16 %v527_v8, %v526_v7  ;;  %v529_v13 = vld [vmem:[#allocation2 + $0x72] sm:$0xff]  ;;  %v644_v20 = vld [vmem:[#allocation2 + $0x80] sm:$0xff]  ;;  %v875_v32 = vpack.c.bf16 %v528_v12, %v527_v8  ;;  %v3208_v41 = vld [vmem:[%s3709_s1 + $0x88] sm:$0xff]   ;;  %1343 = vst.msk [vmem:[#allocation3 + $0x68] sm:$0x3] %vm268_vm1, %v3235_v46 }
  0x28   : > { %2837 = vmatprep.mubr.msk.bf16.mxu0 %vm266_vm0, %v416_v52  ;;  %v3419_v15 = vpack.c.bf16 %v529_v13, %v528_v12  ;;  %v648_v22 = vpack.c.bf16 %v644_v20, %v3357_v47  ;;  %v3450_v27 = vld [vmem:[#allocation2 + $0x81] sm:$0xff]  ;;  %v3205_v35 = vld [vmem:[%s3709_s1 + $0x70] sm:$0xff]   ;;  %1344 = vst.msk [vmem:[#allocation3 + $0x70] sm:$0xff] %vm266_vm0, %v3235_v46  ;;  %1346 = vst.msk [vmem:[#allocation3 + $0x80] sm:$0xff] %vm266_vm0, %v3235_v46 }
  0x29   : > { %v762_v29 = vpack.c.bf16 %v3450_v27, %v3390_v63  ;;  %v872_v34 = vld [vmem:[#allocation2 + $0x82] sm:$0xff]  ;;  %v987_v38 = vld [vmem:[#allocation2 + $0x90] sm:$0xff]  ;;  %1345 = vst.msk [vmem:[#allocation3 + $0x78] sm:$0x3] %vm268_vm1, %v3235_v46  ;;  %1347 = vst.msk [vmem:[#allocation3 + $0x88] sm:$0x3] %vm268_vm1, %v3235_v46 }
  0x2a   : > { %v876_v36 = vpack.c.bf16 %v872_v34, %v529_v13  ;;  %v3207_v39 = vld [vmem:[%s3709_s1 + $0x80] sm:$0xff]   ;;  %v991_v40 = vpack.c.bf16 %v987_v38, %v644_v20  ;;  %v1101_v42 = vld [vmem:[#allocation2 + $0x91] sm:$0xff]  ;;  %1348 = vst.msk [vmem:[#allocation3 + $0x90] sm:$0xff] %vm266_vm0, %v3235_v46  ;;  %v3210_v48 = vld [vmem:[%s3711_s3 + $0x8] sm:$0xff]  }
  0x2b   : > { %1349 = vst.msk [vmem:[#allocation3 + $0x98] sm:$0x3] %vm268_vm1, %v3235_v46  ;;  %v3209_v47 = vld [vmem:[%s3711_s3] sm:$0xff]   ;;  %v3211_v49 = vld [vmem:[%s3711_s3 + $0x10] sm:$0xff]   ;;  %v3212_v20 = vld [vmem:[%s3711_s3 + $0x18] sm:$0xff]  }
  0x2c   : > { %2929 = vmatprep.subr.bf16.mxu1 %v3209_v47 }
  0x2d   : > { %2930 = vmatpush3.bf16.msra.mxu1 %v3209_v47 }
  0x2e   : > { %2931 = vmatprep.subr.bf16.mxu1 %v3210_v48 }
  0x2f   : > { %2838 = vmatmul.mubr.msk.bf16.vlgmr.msra.gmra.mrb[0].mxu0 %vm266_vm0, %v3380_v58 }
  0x30   : > { %2846 = vmatpush3.bf16.msra.mxu0 %v3195_v50  ;;  %2841 = vmatprep.mubr.msk.bf16.mxu0 %vm266_vm0, %v3387_v61  ;;  %v2520_v50 = vld [vmem:[%s3710_s2] ss:$0 sm:$0xff] }
  0x31   : > { %2847 = vmatprep.subr.bf16.mxu0 %v3196_v59  ;;  %2932 = vmatpush3.bf16.msra.mxu1 %v3210_v48 }
  0x32   : > { %2941 = vmatprep.subr.bf16.mxu1 %v3211_v49 }
  0x34   : > { %2848 = vmatpush3.bf16.msra.mxu0 %v3196_v59 }
  0x35   : > { %2857 = vmatprep.subr.bf16.mxu0 %v3197_v2 }
  0x37   : > { %2842 = vmatmul.mubr.msk.bf16.gmra.mrb[4].mxu0 %vm266_vm0, %v3400_v3 }
  0x38   : > { %2849 = vmatprep.mubr.msk.bf16.mxu0 %vm266_vm0, %v530_v4 }
  0x3f   : > { %2850 = vmatmul.mubr.msk.bf16.vlgmr.msra.gmra.mrb[0].mxu0 %vm266_vm0, %v3405_v9 }
  0x40   : > { %2858 = vmatpush3.bf16.msra.mxu0 %v3197_v2  ;;  %2853 = vmatprep.mubr.msk.bf16.mxu0 %vm266_vm0, %v3407_v10 }
  0x41   : > { %2859 = vmatprep.subr.bf16.mxu0 %v3198_v11 }
  0x44   : > { %2860 = vmatpush3.bf16.msra.mxu0 %v3198_v11 }
  0x45   : > { %2869 = vmatprep.subr.bf16.mxu0 %v3199_v14 }
  0x47   : > { %2854 = vmatmul.mubr.msk.bf16.gmra.mrb[4].mxu0 %vm266_vm0, %v3419_v15 }
  0x48   : > { %2861 = vmatprep.mubr.msk.bf16.mxu0 %vm266_vm0, %v645_v16 }
  0x4f   : > { %2862 = vmatmul.mubr.msk.bf16.vlgmr.msra.gmra.mrb[0].mxu0 %vm266_vm0, %v646_v17 }
  0x50   : > { %2870 = vmatpush3.bf16.msra.mxu0 %v3199_v14  ;;  %2865 = vmatprep.mubr.msk.bf16.mxu0 %vm266_vm0, %v647_v18 }
  0x51   : > { %2871 = vmatprep.subr.bf16.mxu0 %v3200_v19 }
  0x54   : > { %2872 = vmatpush3.bf16.msra.mxu0 %v3200_v19 }
  0x55   : > { %2881 = vmatprep.subr.bf16.mxu0 %v3201_v21 }
  0x57   : > { %2866 = vmatmul.mubr.msk.bf16.gmra.mrb[4].mxu0 %vm266_vm0, %v648_v22 }
  0x58   : > { %2873 = vmatprep.mubr.msk.bf16.mxu0 %vm266_vm0, %v759_v23 }
  0x5f   : > { %2874 = vmatmul.mubr.msk.bf16.vlgmr.msra.gmra.mrb[0].mxu0 %vm266_vm0, %v760_v24 }
  0x60   : > { %2882 = vmatpush3.bf16.msra.mxu0 %v3201_v21  ;;  %2877 = vmatprep.mubr.msk.bf16.mxu0 %vm266_vm0, %v761_v25  ;;  %v3213_v21 = vld [vmem:[%s3711_s3 + $0x20] sm:$0xff]  }
  0x61   : > { %2883 = vmatprep.subr.bf16.mxu0 %v3202_v26  ;;  %v1487_v25 = vld [vmem:[#allocation3 + $0x1] sm:$0xff] }
  0x64   : > { %2884 = vmatpush3.bf16.msra.mxu0 %v3202_v26 }
  0x65   : > { %2893 = vmatprep.subr.bf16.mxu0 %v3203_v28 }
  0x67   : > { %2878 = vmatmul.mubr.msk.bf16.gmra.mrb[4].mxu0 %vm266_vm0, %v762_v29 }
  0x68   : > { %2885 = vmatprep.mubr.msk.bf16.mxu0 %vm266_vm0, %v873_v30 }
  0x6f   : > { %2886 = vmatmul.mubr.msk.bf16.vlgmr.msra.gmra.mrb[0].mxu0 %vm266_vm0, %v874_v31 }
  0x70   : > { %2894 = vmatpush3.bf16.msra.mxu0 %v3203_v28  ;;  %2889 = vmatprep.mubr.msk.bf16.mxu0 %vm266_vm0, %v875_v32 }
  0x71   : > { %2895 = vmatprep.subr.bf16.mxu0 %v3204_v33 }
  0x74   : > { %2896 = vmatpush3.bf16.msra.mxu0 %v3204_v33 }
  0x75   : > { %2905 = vmatprep.subr.bf16.mxu0 %v3205_v35 }
  0x77   : > { %2890 = vmatmul.mubr.msk.bf16.gmra.mrb[4].mxu0 %vm266_vm0, %v876_v36 }
  0x78   : > { %2897 = vmatprep.mubr.msk.bf16.mxu0 %vm266_vm0, %v3339_v43  ;;  %v1105_v43 = vpack.c.bf16 %v1101_v42, %v3450_v27 }
  0x7f   : > { %2898 = vmatmul.mubr.msk.bf16.vlgmr.msra.gmra.mrb[0].mxu0 %vm266_vm0, %v3343_v44  ;;  %v1215_v44 = vld [vmem:[#allocation2 + $0x92] sm:$0xff] }
  0x80   : > { %2906 = vmatpush3.bf16.msra.mxu0 %v3205_v35  ;;  %2901 = vmatprep.mubr.msk.bf16.mxu0 %vm266_vm0, %v3366_v51  ;;  %v1219_v45 = vpack.c.bf16 %v1215_v44, %v872_v34 }
  0x81   : > { %2907 = vmatprep.subr.bf16.mxu0 %v3206_v37 }
  0x84   : > { %2908 = vmatpush3.bf16.msra.mxu0 %v3206_v37  ;;  %v3214_v37 = vld [vmem:[%s3711_s3 + $0x28] sm:$0xff]  }
  0x85   : > { %2917 = vmatprep.subr.bf16.mxu0 %v3207_v39 }
  0x87   : > { %2902 = vmatmul.mubr.msk.bf16.gmra.mrb[4].mxu0 %vm266_vm0, %v991_v40 }
  0x88   : > { %2909 = vmatprep.mubr.msk.bf16.mxu0 %vm266_vm0, %v3380_v58 }
  0x8f   : > { %2910 = vmatmul.mubr.msk.bf16.vlgmr.msra.gmra.mrb[0].mxu0 %vm266_vm0, %v3387_v61 }
  0x90   : > { %2918 = vmatpush3.bf16.msra.mxu0 %v3207_v39  ;;  %2913 = vmatprep.mubr.msk.bf16.mxu0 %vm266_vm0, %v3400_v3  ;;  %v3215_v39 = vld [vmem:[%s3711_s3 + $0x30] sm:$0xff]  }
  0x91   : > { %2919 = vmatprep.subr.bf16.mxu0 %v3208_v41 }
  0x94   : > { %2920 = vmatpush3.bf16.msra.mxu0 %v3208_v41  ;;  %v1601_v41 = vld [vmem:[#allocation3 + $0x2] sm:$0xff] }
  0x97   : > { %2914 = vmatmul.mubr.msk.bf16.gmra.mrb[4].mxu0 %vm266_vm0, %v1105_v43 }
  0x98   : > { %2921 = vmatprep.mubr.msk.bf16.mxu0 %vm266_vm0, %v3405_v9 }
  0x9f   : > { %2922 = vmatmul.mubr.msk.bf16.vlgmr.msra.gmra.mrb[0].mxu0 %vm266_vm0, %v3407_v10  ;;  %v1374_v10 = vld [vmem:[#allocation3] sm:$0xff] }
  0xa0   : > { %2925 = vmatprep.mubr.msk.bf16.mxu0 %vm266_vm0, %v3419_v15 }
  0xa7   : > { %2926 = vmatmul.mubr.msk.bf16.gmra.mrb[4].mxu0 %vm266_vm0, %v1219_v45 }
 0x172   : > { %v2923_v51 = vpop.f32.mrb[0].mxu0 }
 0x173   : > { %v3037_v52 = vadd.f32 %v2923_v51, %v2520_v50  ;;  %v1283_v53 = vpop.f32.mrb[1].mxu0  ;;  %v3216_v51 = vld [vmem:[%s3711_s3 + $0x38] sm:$0xff]  }
 0x174   : > { %v3038_v56 = vadd.f32 %v2520_v50, %v1283_v53  ;;  %v2924_v57 = vpop.f32.mrb[2].mxu0  ;;  %v3217_v53 = vld [vmem:[%s3711_s3 + $0x40] sm:$0xff]  }
 0x175   : > { %v1324_v58 = vmax.f32 %v3037_v52, 0.0  ;;  %v3039_v59 = vadd.f32 %v2924_v57, %v2520_v50  ;;  %v1286_v60 = vpop.f32.mrb[3].mxu0 }
 0x176   : > { %v1322_v61 = vmax.f32 %v3038_v56, 0.0  ;;  %v3040_v62 = vadd.f32 %v2520_v50, %v1286_v60 }
 0x177   : > { %1353 = vst.msk [vmem:[#allocation3 + $0x31] sm:$0xff] %vm266_vm0, %v1324_v58  ;;  %v1325_v0 = vmax.f32 %v3039_v59, 0.0 }
 0x178   : > { %1351 = vst.msk [vmem:[#allocation3 + $0x11] sm:$0xff] %vm266_vm0, %v1322_v61  ;;  %v1323_v1 = vmax.f32 %v3040_v62, 0.0  ;;  %v3218_v61 = vld [vmem:[%s3711_s3 + $0x48] sm:$0xff]  }
 0x179   : > { %1354 = vst.msk [vmem:[#allocation3 + $0x41] sm:$0xff] %vm266_vm0, %v1325_v0  ;;  %v3219_v0 = vld [vmem:[%s3711_s3 + $0x50] sm:$0xff]  }
 0x17a   : > { %1352 = vst.msk [vmem:[#allocation3 + $0x21] sm:$0xff] %vm266_vm0, %v1323_v1  ;;  %v2927_v2 = vpop.f32.mrb[4].mxu0 }
 0x17b   : > { %v3041_v3 = vadd.f32 %v2927_v2, %v2520_v50  ;;  %v1299_v4 = vpop.f32.mrb[5].mxu0 }
 0x17c   : > { %v3042_v5 = vadd.f32 %v2520_v50, %v1299_v4  ;;  %v2928_v6 = vpop.f32.mrb[6].mxu0 }
 0x17d   : > { %v1328_v7 = vmax.f32 %v3041_v3, 0.0  ;;  %v3043_v8 = vadd.f32 %v2928_v6, %v2520_v50  ;;  %v1302_v9 = vpop.f32.mrb[7].mxu0 }
 0x17e   : > { %v1326_v11 = vmax.f32 %v3042_v5, 0.0  ;;  %v3044_v12 = vadd.f32 %v2520_v50, %v1302_v9  ;;  %v3543_v18 = vld [vmem:[#allocation3 + $0x30] sm:$0xff]  ;;  %v3220_v5 = vld [vmem:[%s3711_s3 + $0x58] sm:$0xff]  }
 0x17f   : > { %1357 = vst.msk [vmem:[#allocation3 + $0x71] sm:$0xff] %vm266_vm0, %v1328_v7  ;;  %v1329_v13 = vmax.f32 %v3043_v8, 0.0  ;;  %v3536_v14 = vld [vmem:[#allocation3 + $0x10] sm:$0xff]  ;;  %v3221_v7 = vld [vmem:[%s3711_s3 + $0x60] sm:$0xff]  }
 0x180   : > { %1355 = vst.msk [vmem:[#allocation3 + $0x51] sm:$0xff] %vm266_vm0, %v1326_v11  ;;  %v1327_v15 = vmax.f32 %v3044_v12, 0.0  ;;  %v1382_v16 = vpack.c.bf16 %v3536_v14, %v1374_v10  ;;  %v1378_v22 = vld [vmem:[#allocation3 + $0x40] sm:$0xff]  ;;  %v3561_v26 = vld [vmem:[#allocation3 + $0x11] sm:$0xff]  ;;  %v3222_v12 = vld [vmem:[%s3711_s3 + $0x68] sm:$0xff]  }
 0x181   : > { %1358 = vst.msk [vmem:[#allocation3 + $0x81] sm:$0xff] %vm266_vm0, %v1329_v13  ;;  %v3541_v17 = vld [vmem:[#allocation3 + $0x20] sm:$0xff]  ;;  %v1495_v31 = vpack.c.bf16 %v3561_v26, %v1487_v25  ;;  %v1490_v34 = vld [vmem:[#allocation3 + $0x31] sm:$0xff]  ;;  %v1724_v60 = vpack.c.bf16 %v1378_v22, %v3543_v18 }
 0x182   : > { %1356 = vst.msk [vmem:[#allocation3 + $0x61] sm:$0xff] %vm266_vm0, %v1327_v15  ;;  %2933 = vmatprep.mubr.msk.bf16.mxu1 %vm266_vm0, %v1382_v16  ;;  %v3549_v19 = vpack.c.bf16 %v3543_v18, %v3541_v17  ;;  %v1489_v32 = vld [vmem:[#allocation3 + $0x21] sm:$0xff]  ;;  %v1602_v42 = vld [vmem:[#allocation3 + $0x12] sm:$0xff]  ;;  %v1723_v59 = vpack.c.bf16 %v3541_v17, %v3536_v14 }
 0x183   : > { %v3574_v35 = vpack.c.bf16 %v1490_v34, %v1489_v32  ;;  %v1491_v36 = vld [vmem:[#allocation3 + $0x41] sm:$0xff]  ;;  %v1609_v45 = vpack.c.bf16 %v1602_v42, %v1601_v41  ;;  %v1604_v48 = vld [vmem:[#allocation3 + $0x32] sm:$0xff]  ;;  %v1837_v3 = vpack.c.bf16 %v1489_v32, %v3561_v26  ;;  %v2607_v26 = vld [vmem:[%s3712_s4] ss:$0 sm:$0xff] }
 0x184   : > { %2934 = vmatmul.mubr.msk.bf16.vlgmr.msra.gmra.mrb[0].mxu1 %vm266_vm0, %v3549_v19  ;;  %v1603_v46 = vld [vmem:[#allocation3 + $0x22] sm:$0xff]  ;;  %v1838_v4 = vpack.c.bf16 %v1491_v36, %v1490_v34  ;;  %v3223_v14 = vld [vmem:[%s3711_s3 + $0x70] sm:$0xff]   ;;  %v3224_v17 = vld [vmem:[%s3711_s3 + $0x78] sm:$0xff]  }
 0x185   : > { %2942 = vmatpush3.bf16.msra.mxu1 %v3211_v49  ;;  %v3593_v49 = vpack.c.bf16 %v1604_v48, %v1603_v46  ;;  %v1605_v50 = vld [vmem:[#allocation3 + $0x42] sm:$0xff]  ;;  %v1951_v10 = vpack.c.bf16 %v1603_v46, %v1602_v42 }
 0x186   : > { %2943 = vmatprep.subr.bf16.mxu1 %v3212_v20  ;;  %v3563_v29 = vld [vmem:[#allocation3 + $0x70] sm:$0xff]  ;;  %v1952_v11 = vpack.c.bf16 %v1605_v50, %v1604_v48  ;;  %v3225_v18 = vld [vmem:[%s3711_s3 + $0x80] sm:$0xff]  }
 0x187   : > { %v1379_v23 = vld [vmem:[#allocation3 + $0x50] sm:$0xff] }
 0x188   : > { %v3559_v24 = vpack.c.bf16 %v1379_v23, %v1378_v22  ;;  %v1492_v33 = vld [vmem:[#allocation3 + $0x51] sm:$0xff]  ;;  %v1722_v1 = vld [vmem:[#allocation3 + $0x80] sm:$0xff] }
 0x189   : > { %v1380_v28 = vld [vmem:[#allocation3 + $0x60] sm:$0xff]  ;;  %2944 = vmatpush3.bf16.msra.mxu1 %v3212_v20  ;;  %v3579_v38 = vpack.c.bf16 %v1492_v33, %v1491_v36  ;;  %v1494_v43 = vld [vmem:[#allocation3 + $0x71] sm:$0xff]  ;;  %v1726_v2 = vpack.c.bf16 %v1722_v1, %v3563_v29 }
 0x18a   : > { %2937 = vmatprep.mubr.msk.bf16.mxu1 %vm266_vm0, %v3559_v24  ;;  %v3568_v30 = vpack.c.bf16 %v3563_v29, %v1380_v28  ;;  %2953 = vmatprep.subr.bf16.mxu1 %v3213_v21  ;;  %v1493_v40 = vld [vmem:[#allocation3 + $0x61] sm:$0xff]  ;;  %v1606_v47 = vld [vmem:[#allocation3 + $0x52] sm:$0xff]  ;;  %v1725_v62 = vpack.c.bf16 %v1380_v28, %v1379_v23 }
 0x18b   : > { %v3588_v44 = vpack.c.bf16 %v1494_v43, %v1493_v40  ;;  %v3598_v52 = vpack.c.bf16 %v1606_v47, %v1605_v50  ;;  %v1607_v56 = vld [vmem:[#allocation3 + $0x62] sm:$0xff]  ;;  %v1608_v57 = vld [vmem:[#allocation3 + $0x72] sm:$0xff]  ;;  %v1839_v6 = vpack.c.bf16 %v1493_v40, %v1492_v33 }
 0x18c   : > { %2938 = vmatmul.mubr.msk.bf16.gmra.mrb[4].mxu1 %vm266_vm0, %v3568_v30  ;;  %v3607_v58 = vpack.c.bf16 %v1608_v57, %v1607_v56  ;;  %v1836_v8 = vld [vmem:[#allocation3 + $0x81] sm:$0xff]  ;;  %v1953_v13 = vpack.c.bf16 %v1607_v56, %v1606_v47  ;;  %v2065_v20 = vld [vmem:[#allocation3 + $0x90] sm:$0xff] }
 0x18d   : > { %2945 = vmatprep.mubr.msk.bf16.mxu1 %vm266_vm0, %v1495_v31  ;;  %v1840_v9 = vpack.c.bf16 %v1836_v8, %v1494_v43  ;;  %v1950_v15 = vld [vmem:[#allocation3 + $0x82] sm:$0xff]  ;;  %v2179_v22 = vld [vmem:[#allocation3 + $0x91] sm:$0xff] }
 0x18e   : > { %v1954_v16 = vpack.c.bf16 %v1950_v15, %v1608_v57  ;;  %v2183_v23 = vpack.c.bf16 %v2179_v22, %v1836_v8  ;;  %v1360_v36 = vld [vmem:[#allocation2 + $0x21] sm:$0xff] }
 0x194   : > { %2946 = vmatmul.mubr.msk.bf16.vlgmr.msra.gmra.mrb[0].mxu1 %vm266_vm0, %v3574_v35 }
 0x195   : > { %2954 = vmatpush3.bf16.msra.mxu1 %v3213_v21  ;;  %2949 = vmatprep.mubr.msk.bf16.mxu1 %vm266_vm0, %v3579_v38  ;;  %v2069_v21 = vpack.c.bf16 %v2065_v20, %v1722_v1 }
 0x196   : > { %2955 = vmatprep.subr.bf16.mxu1 %v3214_v37 }
 0x199   : > { %2956 = vmatpush3.bf16.msra.mxu1 %v3214_v37 }
 0x19a   : > { %2965 = vmatprep.subr.bf16.mxu1 %v3215_v39 }
 0x19c   : > { %2950 = vmatmul.mubr.msk.bf16.gmra.mrb[4].mxu1 %vm266_vm0, %v3588_v44 }
 0x19d   : > { %2957 = vmatprep.mubr.msk.bf16.mxu1 %vm266_vm0, %v1609_v45 }
 0x1a4   : > { %2958 = vmatmul.mubr.msk.bf16.vlgmr.msra.gmra.mrb[0].mxu1 %vm266_vm0, %v3593_v49 }
 0x1a5   : > { %2966 = vmatpush3.bf16.msra.mxu1 %v3215_v39  ;;  %2961 = vmatprep.mubr.msk.bf16.mxu1 %vm266_vm0, %v3598_v52 }
 0x1a6   : > { %2967 = vmatprep.subr.bf16.mxu1 %v3216_v51 }
 0x1a9   : > { %2968 = vmatpush3.bf16.msra.mxu1 %v3216_v51 }
 0x1aa   : > { %2977 = vmatprep.subr.bf16.mxu1 %v3217_v53 }
 0x1ac   : > { %2962 = vmatmul.mubr.msk.bf16.gmra.mrb[4].mxu1 %vm266_vm0, %v3607_v58 }
 0x1ad   : > { %2969 = vmatprep.mubr.msk.bf16.mxu1 %vm266_vm0, %v1723_v59 }
 0x1b4   : > { %2970 = vmatmul.mubr.msk.bf16.vlgmr.msra.gmra.mrb[0].mxu1 %vm266_vm0, %v1724_v60 }
 0x1b5   : > { %2978 = vmatpush3.bf16.msra.mxu1 %v3217_v53  ;;  %2973 = vmatprep.mubr.msk.bf16.mxu1 %vm266_vm0, %v1725_v62 }
 0x1b6   : > { %2979 = vmatprep.subr.bf16.mxu1 %v3218_v61 }
 0x1b9   : > { %2980 = vmatpush3.bf16.msra.mxu1 %v3218_v61 }
 0x1ba   : > { %2989 = vmatprep.subr.bf16.mxu1 %v3219_v0 }
 0x1bc   : > { %2974 = vmatmul.mubr.msk.bf16.gmra.mrb[4].mxu1 %vm266_vm0, %v1726_v2 }
 0x1bd   : > { %2981 = vmatprep.mubr.msk.bf16.mxu1 %vm266_vm0, %v1837_v3 }
 0x1c4   : > { %2982 = vmatmul.mubr.msk.bf16.vlgmr.msra.gmra.mrb[0].mxu1 %vm266_vm0, %v1838_v4 }
 0x1c5   : > { %2990 = vmatpush3.bf16.msra.mxu1 %v3219_v0  ;;  %2985 = vmatprep.mubr.msk.bf16.mxu1 %vm266_vm0, %v1839_v6 }
 0x1c6   : > { %2991 = vmatprep.subr.bf16.mxu1 %v3220_v5 }
 0x1c9   : > { %2992 = vmatpush3.bf16.msra.mxu1 %v3220_v5 }
 0x1ca   : > { %3001 = vmatprep.subr.bf16.mxu1 %v3221_v7 }
 0x1cc   : > { %2986 = vmatmul.mubr.msk.bf16.gmra.mrb[4].mxu1 %vm266_vm0, %v1840_v9 }
 0x1cd   : > { %2993 = vmatprep.mubr.msk.bf16.mxu1 %vm266_vm0, %v1951_v10 }
 0x1d4   : > { %2994 = vmatmul.mubr.msk.bf16.vlgmr.msra.gmra.mrb[0].mxu1 %vm266_vm0, %v1952_v11 }
 0x1d5   : > { %3002 = vmatpush3.bf16.msra.mxu1 %v3221_v7  ;;  %2997 = vmatprep.mubr.msk.bf16.mxu1 %vm266_vm0, %v1953_v13 }
 0x1d6   : > { %3003 = vmatprep.subr.bf16.mxu1 %v3222_v12 }
 0x1d9   : > { %3004 = vmatpush3.bf16.msra.mxu1 %v3222_v12 }
 0x1da   : > { %3013 = vmatprep.subr.bf16.mxu1 %v3223_v14 }
 0x1dc   : > { %2998 = vmatmul.mubr.msk.bf16.gmra.mrb[4].mxu1 %vm266_vm0, %v1954_v16 }
 0x1dd   : > { %3005 = vmatprep.mubr.msk.bf16.mxu1 %vm266_vm0, %v3549_v19  ;;  %v3226_v19 = vld [vmem:[%s3711_s3 + $0x88] sm:$0xff]  }
 0x1e4   : > { %3006 = vmatmul.mubr.msk.bf16.vlgmr.msra.gmra.mrb[0].mxu1 %vm266_vm0, %v3559_v24  ;;  %v2293_v24 = vld [vmem:[#allocation3 + $0x92] sm:$0xff] }
 0x1e5   : > { %3014 = vmatpush3.bf16.msra.mxu1 %v3223_v14  ;;  %3009 = vmatprep.mubr.msk.bf16.mxu1 %vm266_vm0, %v3568_v30  ;;  %v2297_v25 = vpack.c.bf16 %v2293_v24, %v1950_v15  ;;  %v1359_v30 = vld [vmem:[#allocation2 + $0x11] sm:$0xff] }
 0x1e6   : > { %3015 = vmatprep.subr.bf16.mxu1 %v3224_v17 }
 0x1e9   : > { %3016 = vmatpush3.bf16.msra.mxu1 %v3224_v17 }
 0x1ea   : > { %3025 = vmatprep.subr.bf16.mxu1 %v3225_v18 }
 0x1ec   : > { %3010 = vmatmul.mubr.msk.bf16.gmra.mrb[4].mxu1 %vm266_vm0, %v2069_v21 }
 0x1ed   : > { %3017 = vmatprep.mubr.msk.bf16.mxu1 %vm266_vm0, %v3574_v35 }
 0x1f4   : > { %3018 = vmatmul.mubr.msk.bf16.vlgmr.msra.gmra.mrb[0].mxu1 %vm266_vm0, %v3579_v38 }
 0x1f5   : > { %3026 = vmatpush3.bf16.msra.mxu1 %v3225_v18  ;;  %3021 = vmatprep.mubr.msk.bf16.mxu1 %vm266_vm0, %v3588_v44 }
 0x1f6   : > { %3027 = vmatprep.subr.bf16.mxu1 %v3226_v19 }
 0x1f9   : > { %3028 = vmatpush3.bf16.msra.mxu1 %v3226_v19 }
 0x1fc   : > { %3022 = vmatmul.mubr.msk.bf16.gmra.mrb[4].mxu1 %vm266_vm0, %v2183_v23 }
 0x1fd   : > { %3029 = vmatprep.mubr.msk.bf16.mxu1 %vm266_vm0, %v3593_v49  ;;  %v1363_v49 = vld [vmem:[#allocation2 + $0x51] sm:$0xff] }
 0x204   : > { %3030 = vmatmul.mubr.msk.bf16.vlgmr.msra.gmra.mrb[0].mxu1 %vm266_vm0, %v3598_v52 }
 0x205   : > { %3033 = vmatprep.mubr.msk.bf16.mxu1 %vm266_vm0, %v3607_v58  ;;  %v1364_v58 = vld [vmem:[#allocation2 + $0x61] sm:$0xff] }
 0x20c   : > { %3034 = vmatmul.mubr.msk.bf16.gmra.mrb[4].mxu1 %vm266_vm0, %v2297_v25 }
 0x2d7   : > { %v3031_v28 = vpop.f32.mrb[0].mxu1 }
 0x2d8   : > { %v3045_v29 = vadd.f32 %v3031_v28, %v2607_v26  ;;  %v2361_v31 = vpop.f32.mrb[1].mxu1 }
 0x2d9   : > { %v3046_v32 = vadd.f32 %v2607_v26, %v2361_v31  ;;  %v3032_v33 = vpop.f32.mrb[2].mxu1 }
 0x2da   : > { %v2402_v34 = vadd.f32 %v3045_v29, %v3371_v54  ;;  %v3047_v35 = vadd.f32 %v3032_v33, %v2607_v26  ;;  %v2364_v37 = vpop.f32.mrb[3].mxu1 }
 0x2db   : > { %v2400_v38 = vadd.f32 %v3046_v32, %v1359_v30  ;;  %v3048_v39 = vadd.f32 %v2607_v26, %v2364_v37 }
 0x2dc   : > { %v2410_v40 = vmax.f32 %v2402_v34, 0.0  ;;  %v2403_v41 = vadd.f32 %v3047_v35, %v3374_v55 }
 0x2dd   : > { %v2408_v42 = vmax.f32 %v2400_v38, 0.0  ;;  %v2401_v43 = vadd.f32 %v3048_v39, %v1360_v36 }
 0x2de   : > { %v2707_v54 = vpack.c.bf16 %v2410_v40, %v2410_v40  ;;  %v2411_v44 = vmax.f32 %v2403_v41, 0.0 }
 0x2df   : > { %v2705_v45 = vpack.c.bf16 %v2408_v42, %v2408_v42  ;;  %v2409_v46 = vmax.f32 %v2401_v43, 0.0  ;;  %v3035_v47 = vpop.f32.mrb[4].mxu1 }
 0x2e0   : > { %2451 = vst.msk [vmem:[%s3685_s9 + $0x8] sm:$0xf] %vm2448_vm2, %v2707_v54  ;;  %v2708_v55 = vpack.c.bf16 %v2411_v44, %v2411_v44  ;;  %v3049_v48 = vadd.f32 %v3035_v47, %v2607_v26  ;;  %v2377_v50 = vpop.f32.mrb[5].mxu1 }
 0x2e1   : > { %2449 = vst.msk [vmem:[%s3685_s9] sm:$0xf] %vm2448_vm2, %v2705_v45  ;;  %v2706_v51 = vpack.c.bf16 %v2409_v46, %v2409_v46  ;;  %v3050_v52 = vadd.f32 %v2607_v26, %v2377_v50  ;;  %v3036_v53 = vpop.f32.mrb[6].mxu1 }
 0x2e2   : > { %2452 = vst.msk [vmem:[%s3685_s9 + $0xc] sm:$0xf] %vm2448_vm2, %v2708_v55  ;;  %v2406_v56 = vadd.f32 %v3049_v48, %v3390_v63  ;;  %v3051_v57 = vadd.f32 %v3036_v53, %v2607_v26  ;;  %v2380_v59 = vpop.f32.mrb[7].mxu1 }
 0x2e3   : > { %2450 = vst.msk [vmem:[%s3685_s9 + $0x4] sm:$0xf] %vm2448_vm2, %v2706_v51  ;;  %v2404_v60 = vadd.f32 %v3050_v52, %v1363_v49  ;;  %v3052_v61 = vadd.f32 %v2607_v26, %v2380_v59 }
 0x2e4   : > { %v2414_v62 = vmax.f32 %v2406_v56, 0.0  ;;  %v2407_v0 = vadd.f32 %v3051_v57, %v3450_v27 }
 0x2e5   : > { %v2412_v1 = vmax.f32 %v2404_v60, 0.0  ;;  %v2405_v2 = vadd.f32 %v3052_v61, %v1364_v58 }
 0x2e6   : > { %v2711_v3 = vpack.c.bf16 %v2414_v62, %v2414_v62  ;;  %v2415_v4 = vmax.f32 %v2407_v0, 0.0 }
 0x2e7   : > { %v2709_v5 = vpack.c.bf16 %v2412_v1, %v2412_v1  ;;  %v2413_v6 = vmax.f32 %v2405_v2, 0.0 }
 0x2e8   : > { %2455 = vst.msk [vmem:[%s3685_s9 + $0x18] sm:$0xf] %vm2448_vm2, %v2711_v3  ;;  %v2712_v63 = vpack.c.bf16 %v2415_v4, %v2415_v4 }
 0x2e9   : > { %2453 = vst.msk [vmem:[%s3685_s9 + $0x10] sm:$0xf] %vm2448_vm2, %v2709_v5  ;;  %v2710_v7 = vpack.c.bf16 %v2413_v6, %v2413_v6 }
 0x2ea   : > { %2456 = vst.msk [vmem:[%s3685_s9 + $0x1c] sm:$0xf] %vm2448_vm2, %v2712_v63 }
 0x2eb   : > { %2454 = vst.msk [vmem:[%s3685_s9 + $0x14] sm:$0xf] %vm2448_vm2, %v2710_v7 }
 0x2ec PF: > { %s15_s18 = sadd.s32 1, %s3233_s18  }
 0x2ed   : > { %p12_p4 = scmp.ge.s32.totalorder %s15_s18, 4  }
 0x2ef   :  { %14 = sbr.rel (!%p12_p4) target bundleno = 1 (0x1), region = 90 }

// kernel: resnet_layer_forward.2
= control target key start
LH: loop header
LB: loop body
LE: loop exit
PB: predicated region body
PF: predicated region fallthrough
CT: control target
= control target key end

     0   :  { %s3686_s13 = smov 0   ;;  %s4216_s0 = inlined_call_operand.vmem [shape: bf16[2,9,9,16], index: 0, kind: input, shape index: {}]   ;;  %s4217_s1 = inlined_call_operand.vmem [shape: bf16[2,9,9,16], index: 1, kind: input, shape index: {}]   ;;  %s4218_s2 = inlined_call_operand.vmem [shape: bf16[2,9,9,16], index: 2, kind: input, shape index: {}]   ;;  %s4219_s3 = inlined_call_operand.vmem [shape: bf16[2,9,9,16], index: 3, kind: input, shape index: {}]   ;;  %s4220_s4 = inlined_call_operand.vmem [shape: bf16[9,16,32], index: 4, kind: input, shape index: {}]   ;;  %s4221_s5 = inlined_call_operand.vmem [shape: f32[1,32], index: 5, kind: input, shape index: {}]   ;;  %s4222_s6 = inlined_call_operand.vmem [shape: bf16[16,32], index: 6, kind: input, shape index: {}]   ;;  %s4223_s7 = inlined_call_operand.vmem [shape: f32[1,32], index: 7, kind: input, shape index: {}]   ;;  %s4224_s8 = inlined_call_operand.vmem [shape: bf16[9,32,32], index: 8, kind: input, shape index: {}]   ;;  %s4225_s9 = inlined_call_operand.vmem [shape: f32[1,32], index: 9, kind: input, shape index: {}]   ;;  %s4226_s10 = inlined_call_operand.vmem [shape: bf16[2,64,32], index: 10, kind: output, shape index: {}]  }
   0x1 LB: > { %s2925_s14 = sadd.s32 4294967295, %s3628_s13   ;;  %p2929_p0 = scmp.ge.s32.totalorder %s3628_s13, 1  ;;  %s3628_s13 = sphi %s3686_s13, %s20_s13  }
   0x2   : > { %p342_p1 = scmp.lt.s32.totalorder %s3628_s13, 3 }
   0x4   : > { %p343_p2 = pnand %p2929_p0, %p342_p1 }
   0x5   : > { %v3594_v0 = vld [vmem:[%s4220_s4] sm:$0xff] (!%p343_p2)   ;;  %p395_p3 = scmp.lt.s32.totalorder (!%p343_p2), %s2925_s14, 1  ;;  %v3700_v1 = vld [vmem:[%s4220_s4 + $0x8] sm:$0xff] (!%p343_p2)   ;;  %vm457_vm0 = vcmask (!%p343_p2), 130048   ;;  %vm459_vm1 = vcmask (!%p343_p2), 122880   ;;  %vm1609_vm2 = vcmask (!%p343_p2), 261120  }
   0x6   : > { %346 = sbr.rel (%p343_p2) target bundleno = 746 (0x2ea), region = 60  ;;  %3214 = vmatprep.subr.bf16.mxu0 (!%p343_p2), %v3594_v0  ;;  %vm1611_vm3 = vcmask (!%p343_p2), 254976   ;;  %vm2825_vm4 = vcmask (!%p343_p2), 257024  }
   0x7   : > { %3215 = vmatpush3.bf16.msra.mxu0 (!%p343_p2), %v3594_v0  ;;  %v3800_v0 = vld [vmem:[%s4220_s4 + $0x10] sm:$0xff] (!%p343_p2)  }
   0x8   : > { %3224 = vmatprep.subr.bf16.mxu0 (!%p343_p2), %v3700_v1 }
   0xd   : > { %s4228_s14 = smov (!%p395_p3, %s2925_s14), 1 }
   0xe   : > { %s3705_s19 = smul.u32 72, %s4228_s14  ;;  %s3101_s18 = sshll.u32 %s4228_s14, 5 }
   0xf   : > { %s4195_s21 = scalar_lea.vmem %s4226_s10, %s3101_s18 }
  0x10   : > { %s3712_s22 = scalar_lea.vmem %s4216_s0, %s3705_s19  ;;  %s3718_s25 = scalar_lea.vmem %s4217_s1, %s3705_s19 }
  0x11   : > { %v421_v2 = vld [vmem:[%s3712_s22] ss:$8 sps:$4 sm:$0xff]   ;;  %v425_v3 = vld [vmem:[%s3712_s22 + $0x10] ss:$8 sps:$4 sm:$0xff]   ;;  %v422_v21 = vld [vmem:[%s3712_s22 + $0x4] sm:$0x1]  ;;  %s3743_s28 = scalar_lea.vmem %s4218_s2, %s3705_s19  ;;  %s3777_s11 = scalar_lea.vmem %s4219_s3, %s3705_s19 }
  0x12   : > { %v429_v4 = vld [vmem:[%s3712_s22 + $0x20] ss:$8 sps:$4 sm:$0xff]   ;;  %v439_v5 = vunpack.c.l.bf16 %v421_v2  ;;  %v441_v6 = vunpack.c.h.bf16 %v421_v2  ;;  %v443_v7 = vunpack.c.l.bf16 %v425_v3  ;;  %v445_v8 = vunpack.c.h.bf16 %v425_v3  ;;  %v433_v9 = vld [vmem:[%s3712_s22 + $0x30] ss:$8 sps:$4 sm:$0xff]   ;;  %v424_v26 = vld [vmem:[%s3712_s22 + $0xc] sm:$0x1] }
  0x13   : > { %v477_v10 = vld [vmem:[%s3718_s25] ss:$8 sps:$4 sm:$0xff]   ;;  %v447_v11 = vunpack.c.l.bf16 %v429_v4  ;;  %v449_v12 = vunpack.c.h.bf16 %v429_v4  ;;  %v451_v13 = vunpack.c.l.bf16 %v433_v9  ;;  %v453_v14 = vunpack.c.h.bf16 %v433_v9  ;;  %v481_v17 = vld [vmem:[%s3718_s25 + $0x10] ss:$8 sps:$4 sm:$0xff]   ;;  %v426_v27 = vld [vmem:[%s3712_s22 + $0x14] sm:$0x1] }
  0x14   : > { %458 = vst.msk [vmem:[#allocation2] sm:$0xff] %vm457_vm0, %v439_v5  ;;  %461 = vst.msk [vmem:[#allocation2 + $0x10] sm:$0xff] %vm457_vm0, %v441_v6  ;;  %v495_v15 = vunpack.c.l.bf16 %v477_v10  ;;  %v497_v16 = vunpack.c.h.bf16 %v477_v10  ;;  %v499_v18 = vunpack.c.l.bf16 %v481_v17  ;;  %v485_v19 = vld [vmem:[%s3718_s25 + $0x20] ss:$8 sps:$4 sm:$0xff]   ;;  %v489_v20 = vld [vmem:[%s3718_s25 + $0x30] ss:$8 sps:$4 sm:$0xff]   ;;  %v501_v22 = vunpack.c.h.bf16 %v481_v17 }
  0x15   : > { %463 = vst.msk [vmem:[#allocation2 + $0x20] sm:$0xff] %vm457_vm0, %v443_v7  ;;  %465 = vst.msk [vmem:[#allocation2 + $0x30] sm:$0xff] %vm457_vm0, %v445_v8  ;;  %v503_v23 = vunpack.c.l.bf16 %v485_v19  ;;  %v505_v24 = vunpack.c.h.bf16 %v485_v19  ;;  %v507_v25 = vunpack.c.l.bf16 %v489_v20  ;;  %v428_v28 = vld [vmem:[%s3712_s22 + $0x1c] sm:$0x1]  ;;  %v509_v29 = vunpack.c.h.bf16 %v489_v20  ;;  %v430_v33 = vld [vmem:[%s3712_s22 + $0x24] sm:$0x1] }
  0x16   : > { %467 = vst.msk [vmem:[#allocation2 + $0x40] sm:$0xff] %vm457_vm0, %v447_v11  ;;  %469 = vst.msk [vmem:[#allocation2 + $0x50] sm:$0xff] %vm457_vm0, %v449_v12  ;;  %v440_v30 = vunpack.c.l.bf16 %v422_v21  ;;  %v442_v31 = vunpack.c.l.bf16 %v424_v26  ;;  %v444_v32 = vunpack.c.l.bf16 %v426_v27  ;;  %v432_v34 = vld [vmem:[%s3712_s22 + $0x2c] sm:$0x1]  ;;  %v434_v35 = vld [vmem:[%s3712_s22 + $0x34] sm:$0x1]  ;;  %v446_v36 = vunpack.c.l.bf16 %v428_v28 }
  0x17   : > { %471 = vst.msk [vmem:[#allocation2 + $0x60] sm:$0xff] %vm457_vm0, %v451_v13  ;;  %473 = vst.msk [vmem:[#allocation2 + $0x70] sm:$0xff] %vm457_vm0, %v453_v14  ;;  %v448_v37 = vunpack.c.l.bf16 %v430_v33  ;;  %v450_v38 = vunpack.c.l.bf16 %v432_v34  ;;  %v436_v39 = vld [vmem:[%s3712_s22 + $0x3c] sm:$0x1]  ;;  %v452_v40 = vunpack.c.l.bf16 %v434_v35  ;;  %v531_v41 = vld [vmem:[%s3743_s28] ss:$8 sps:$4 sm:$0xff]  }
  0x18   : > { %513 = vst.msk [vmem:[#allocation3] sm:$0xff] %vm457_vm0, %v495_v15  ;;  %515 = vst.msk [vmem:[#allocation3 + $0x10] sm:$0xff] %vm457_vm0, %v497_v16  ;;  %v547_v42 = vld [vmem:[%s3743_s28 + $0x10] ss:$48 sps:$4 sm:$0xff]   ;;  %v454_v43 = vunpack.c.l.bf16 %v436_v39  ;;  %v549_v44 = vunpack.c.l.bf16 %v531_v41  ;;  %v551_v45 = vunpack.c.h.bf16 %v531_v41  ;;  %v545_v4 = vld [vmem:[%s3743_s28 + $0x38] sm:$0xf] }
  0x19   : > { %517 = vst.msk [vmem:[#allocation3 + $0x20] sm:$0xff] %vm457_vm0, %v499_v18  ;;  %519 = vst.msk [vmem:[#allocation3 + $0x30] sm:$0xff] %vm457_vm0, %v501_v22  ;;  %v537_v46 = vld [vmem:[%s3743_s28 + $0x18] ss:$8 sps:$4 sm:$0xff]   ;;  %v541_v47 = vld [vmem:[%s3743_s28 + $0x28] ss:$8 sps:$4 sm:$0xff]   ;;  %v553_v51 = vunpack.c.l.bf16 %v547_v42  ;;  %v563_v8 = vunpack.c.l.bf16 %v545_v4 }
  0x1a   : > { %521 = vst.msk [vmem:[#allocation3 + $0x40] sm:$0xff] %vm457_vm0, %v503_v23  ;;  %523 = vst.msk [vmem:[#allocation3 + $0x50] sm:$0xff] %vm457_vm0, %v505_v24  ;;  %v555_v52 = vunpack.c.l.bf16 %v537_v46  ;;  %v557_v53 = vunpack.c.h.bf16 %v537_v46  ;;  %v559_v58 = vunpack.c.l.bf16 %v541_v47  ;;  %v561_v59 = vunpack.c.h.bf16 %v541_v47  ;;  %v585_v5 = vld [vmem:[%s3777_s11] ss:$8 sps:$4 sm:$0xff]   ;;  %v599_v39 = vld [vmem:[%s3777_s11 + $0x38] sm:$0xf] }
  0x1b   : > { %525 = vst.msk [vmem:[#allocation3 + $0x60] sm:$0xff] %vm457_vm0, %v507_v25  ;;  %527 = vst.msk [vmem:[#allocation3 + $0x70] sm:$0xff] %vm457_vm0, %v509_v29  ;;  %v646_v48 = vld [vmem:[#allocation2] sm:$0xff]  ;;  %v3765_v49 = vld [vmem:[#allocation2 + $0x10] sm:$0xff]  ;;  %v603_v9 = vunpack.c.l.bf16 %v585_v5  ;;  %v605_v10 = vunpack.c.h.bf16 %v585_v5 }
  0x1c   : > { %460 = vst.msk [vmem:[#allocation2 + $0x8] sm:$0x1] %vm459_vm1, %v440_v30  ;;  %462 = vst.msk [vmem:[#allocation2 + $0x18] sm:$0x1] %vm459_vm1, %v442_v31  ;;  %v3767_v50 = vld [vmem:[#allocation2 + $0x20] sm:$0xff]  ;;  %v654_v54 = vpack.c.bf16 %v3765_v49, %v646_v48  ;;  %v3780_v55 = vld [vmem:[#allocation2 + $0x30] sm:$0xff] }
  0x1d   : > { %464 = vst.msk [vmem:[#allocation2 + $0x28] sm:$0x1] %vm459_vm1, %v444_v32  ;;  %466 = vst.msk [vmem:[#allocation2 + $0x38] sm:$0x1] %vm459_vm1, %v446_v36  ;;  %v3782_v56 = vld [vmem:[#allocation2 + $0x40] sm:$0xff]  ;;  %v3784_v57 = vld [vmem:[#allocation2 + $0x50] sm:$0xff]  ;;  %v1290_v60 = vpack.c.bf16 %v3767_v50, %v3765_v49  ;;  %v655_v61 = vpack.c.bf16 %v3780_v55, %v3767_v50 }
  0x1e   : > { %468 = vst.msk [vmem:[#allocation2 + $0x48] sm:$0x1] %vm459_vm1, %v448_v37  ;;  %470 = vst.msk [vmem:[#allocation2 + $0x58] sm:$0x1] %vm459_vm1, %v450_v38  ;;  %v656_v62 = vpack.c.bf16 %v3784_v57, %v3782_v56  ;;  %v3795_v63 = vld [vmem:[#allocation2 + $0x60] sm:$0xff]  ;;  %v1291_v2 = vpack.c.bf16 %v3782_v56, %v3780_v55  ;;  %3216 = vmatprep.mubr.msk.bf16.mxu0 %vm457_vm0, %v654_v54  ;;  %v3821_v11 = vld [vmem:[#allocation2 + $0x70] sm:$0xff] }
  0x1f   : > { %472 = vst.msk [vmem:[#allocation2 + $0x68] sm:$0x1] %vm459_vm1, %v452_v40  ;;  %474 = vst.msk [vmem:[#allocation2 + $0x78] sm:$0x1] %vm459_vm1, %v454_v43  ;;  %v3808_v3 = vld [vmem:[#allocation3 + $0x10] sm:$0xff]  ;;  %v1292_v6 = vpack.c.bf16 %v3795_v63, %v3784_v57  ;;  %3217 = vmatmul.mubr.msk.bf16.vlgmr.msra.gmra.mrb[0].mxu0 %vm457_vm0, %v655_v61  ;;  %v751_v15 = vld [vmem:[#allocation3] sm:$0xff]  ;;  %v657_v22 = vpack.c.bf16 %v3821_v11, %v3795_v63 }
  0x20   : > { %567 = vst.msk [vmem:[#allocation4] sm:$0xff] %vm457_vm0, %v549_v44  ;;  %569 = vst.msk [vmem:[#allocation4 + $0x10] sm:$0xff] %vm457_vm0, %v551_v45  ;;  %v3817_v7 = vld [vmem:[#allocation3 + $0x20] sm:$0xff]  ;;  %3225 = vmatpush3.bf16.msra.mxu0 %v3700_v1  ;;  %3220 = vmatprep.mubr.msk.bf16.mxu0 %vm457_vm0, %v656_v62  ;;  %v3823_v12 = vld [vmem:[#allocation3 + $0x30] sm:$0xff]  ;;  %v759_v27 = vpack.c.bf16 %v3808_v3, %v751_v15  ;;  %v617_v44 = vunpack.c.l.bf16 %v599_v39 }
  0x21   : > { %571 = vst.msk [vmem:[#allocation4 + $0x20] sm:$0xff] %vm457_vm0, %v553_v51  ;;  %573 = vst.msk [vmem:[#allocation4 + $0x30] sm:$0xff] %vm457_vm0, %v555_v52  ;;  %v3825_v13 = vld [vmem:[#allocation3 + $0x40] sm:$0xff]  ;;  %v1397_v14 = vpack.c.bf16 %v3817_v7, %v3808_v3  ;;  %3234 = vmatprep.subr.bf16.mxu0 %v3800_v0  ;;  %v3830_v16 = vld [vmem:[#allocation3 + $0x50] sm:$0xff]  ;;  %v760_v31 = vpack.c.bf16 %v3823_v12, %v3817_v7 }
  0x22   : > { %575 = vst.msk [vmem:[#allocation4 + $0x40] sm:$0xff] %vm457_vm0, %v557_v53  ;;  %577 = vst.msk [vmem:[#allocation4 + $0x50] sm:$0xff] %vm457_vm0, %v559_v58  ;;  %v3832_v17 = vld [vmem:[#allocation3 + $0x60] sm:$0xff]  ;;  %v1398_v1 = vpack.c.bf16 %v3825_v13, %v3823_v12  ;;  %v591_v32 = vld [vmem:[%s3777_s11 + $0x18] ss:$8 sps:$4 sm:$0xff]   ;;  %v761_v35 = vpack.c.bf16 %v3830_v16, %v3825_v13 }
  0x23   : > { %579 = vst.msk [vmem:[#allocation4 + $0x60] sm:$0xff] %vm457_vm0, %v561_v59  ;;  %581 = vst.msk [vmem:[#allocation4 + $0x70] sm:$0xff] %vm457_vm0, %v563_v8  ;;  %v3839_v18 = vld [vmem:[#allocation2 + $0x11] sm:$0xff]  ;;  %v1399_v21 = vpack.c.bf16 %v3832_v17, %v3830_v16  ;;  %v609_v36 = vunpack.c.l.bf16 %v591_v32  ;;  %v611_v37 = vunpack.c.h.bf16 %v591_v32  ;;  %v532_v40 = vld [vmem:[%s3743_s28 + $0x4] sm:$0x1] }
  0x24   : > { %621 = vst.msk [vmem:[#allocation5] sm:$0xff] %vm457_vm0, %v603_v9  ;;  %623 = vst.msk [vmem:[#allocation5 + $0x10] sm:$0xff] %vm457_vm0, %v605_v10  ;;  %v3841_v19 = vld [vmem:[#allocation2 + $0x21] sm:$0xff]  ;;  %v3843_v20 = vld [vmem:[#allocation2 + $0x31] sm:$0xff]  ;;  %v550_v45 = vunpack.c.l.bf16 %v532_v40 }
  0x25   : > { %v3849_v23 = vld [vmem:[#allocation2 + $0x41] sm:$0xff]  ;;  %v3851_v24 = vld [vmem:[#allocation2 + $0x51] sm:$0xff]  ;;  %v1503_v26 = vpack.c.bf16 %v3841_v19, %v3839_v18  ;;  %v534_v41 = vld [vmem:[%s3743_s28 + $0xc] sm:$0x1]  ;;  %627 = vst.msk [vmem:[#allocation5 + $0x30] sm:$0xff] %vm457_vm0, %v609_v36  ;;  %v866_v36 = vpack.c.bf16 %v3843_v20, %v3841_v19 }
  0x26   : > { %v3853_v25 = vld [vmem:[#allocation2 + $0x61] sm:$0xff]  ;;  %v1504_v28 = vpack.c.bf16 %v3849_v23, %v3843_v20  ;;  %v3597_v42 = vld [vmem:[%s4220_s4 + $0x18] sm:$0xff]   ;;  %v552_v46 = vunpack.c.l.bf16 %v534_v41  ;;  %v536_v47 = vld [vmem:[%s3743_s28 + $0x14] sm:$0x1]  ;;  %629 = vst.msk [vmem:[#allocation5 + $0x40] sm:$0xff] %vm457_vm0, %v611_v37 }
  0x27   : > { %v1505_v29 = vpack.c.bf16 %v3853_v25, %v3851_v24  ;;  %3221 = vmatmul.mubr.msk.bf16.gmra.mrb[4].mxu0 %vm457_vm0, %v657_v22  ;;  %v601_v30 = vld [vmem:[%s3777_s11 + $0x10] ss:$48 sps:$4 sm:$0xff]   ;;  %v538_v48 = vld [vmem:[%s3743_s28 + $0x1c] sm:$0x1]  ;;  %v554_v51 = vunpack.c.l.bf16 %v536_v47  ;;  %v540_v53 = vld [vmem:[%s3743_s28 + $0x24] sm:$0x1] }
  0x28   : > { %3226 = vmatprep.mubr.msk.bf16.mxu0 %vm457_vm0, %v759_v27  ;;  %v607_v33 = vunpack.c.l.bf16 %v601_v30  ;;  %v595_v34 = vld [vmem:[%s3777_s11 + $0x28] ss:$8 sps:$4 sm:$0xff]   ;;  %v556_v52 = vunpack.c.l.bf16 %v538_v48  ;;  %v542_v54 = vld [vmem:[%s3743_s28 + $0x2c] sm:$0x1]  ;;  %v544_v58 = vld [vmem:[%s3743_s28 + $0x34] sm:$0x1]  ;;  %v558_v59 = vunpack.c.l.bf16 %v540_v53 }
  0x29   : > { %v613_v38 = vunpack.c.l.bf16 %v595_v34  ;;  %v615_v43 = vunpack.c.h.bf16 %v595_v34  ;;  %635 = vst.msk [vmem:[#allocation5 + $0x70] sm:$0xff] %vm457_vm0, %v617_v44  ;;  %v560_v61 = vunpack.c.l.bf16 %v542_v54  ;;  %v546_v62 = vld [vmem:[%s3743_s28 + $0x3c] sm:$0x1]  ;;  %v562_v4 = vunpack.c.l.bf16 %v544_v58  ;;  %v437_v8 = vld [vmem:[%s3712_s22 + $0x40] sm:$0xf]  ;;  %v3921_v39 = vld [vmem:[#allocation2 + $0x71] sm:$0xff] }
  0x2a   : > { %625 = vst.msk [vmem:[#allocation5 + $0x20] sm:$0xff] %vm457_vm0, %v607_v33  ;;  %v564_v5 = vunpack.c.l.bf16 %v546_v62  ;;  %v3897_v9 = vld [vmem:[#allocation3 + $0x70] sm:$0xff]  ;;  %v455_v10 = vunpack.c.l.bf16 %v437_v8  ;;  %v964_v41 = vld [vmem:[#allocation4 + $0x10] sm:$0xff]  ;;  %v3605_v3 = vld [vmem:[%s4224_s8 + $0x8] sm:$0xff]  }
  0x2b   : > { %631 = vst.msk [vmem:[#allocation5 + $0x50] sm:$0xff] %vm457_vm0, %v613_v38  ;;  %633 = vst.msk [vmem:[#allocation5 + $0x60] sm:$0xff] %vm457_vm0, %v615_v43  ;;  %v493_v15 = vld [vmem:[%s3718_s25 + $0x40] sm:$0xf]  ;;  %v438_v30 = vld [vmem:[%s3712_s22 + $0x44] sm:$0x1]  ;;  %v867_v38 = vpack.c.bf16 %v3851_v24, %v3849_v23  ;;  %v868_v43 = vpack.c.bf16 %v3921_v39, %v3853_v25 }
  0x2c   : > { %568 = vst.msk [vmem:[#allocation4 + $0x8] sm:$0x1] %vm459_vm1, %v550_v45  ;;  %570 = vst.msk [vmem:[#allocation4 + $0x18] sm:$0x1] %vm459_vm1, %v552_v46  ;;  %v857_v22 = vld [vmem:[#allocation2 + $0x1] sm:$0xff]  ;;  %v511_v27 = vunpack.c.l.bf16 %v493_v15  ;;  %v966_v46 = vld [vmem:[#allocation4 + $0x30] sm:$0xff] }
  0x2d   : > { %572 = vst.msk [vmem:[#allocation4 + $0x28] sm:$0x1] %vm459_vm1, %v554_v51  ;;  %574 = vst.msk [vmem:[#allocation4 + $0x38] sm:$0x1] %vm459_vm1, %v556_v52  ;;  %v865_v32 = vpack.c.bf16 %v3839_v18, %v857_v22  ;;  %v1073_v33 = vld [vmem:[#allocation5 + $0x40] sm:$0xff]  ;;  %v3598_v37 = vld [vmem:[%s4220_s4 + $0x20] sm:$0xff]  }
  0x2e   : > { %576 = vst.msk [vmem:[#allocation4 + $0x48] sm:$0x1] %vm459_vm1, %v558_v59  ;;  %578 = vst.msk [vmem:[#allocation4 + $0x58] sm:$0x1] %vm459_vm1, %v560_v61  ;;  %v963_v40 = vld [vmem:[#allocation4] sm:$0xff]  ;;  %v968_v48 = vld [vmem:[#allocation4 + $0x50] sm:$0xff] }
  0x2f   : > { %3227 = vmatmul.mubr.msk.bf16.vlgmr.msra.gmra.mrb[0].mxu0 %vm457_vm0, %v760_v31  ;;  %580 = vst.msk [vmem:[#allocation4 + $0x68] sm:$0x1] %vm459_vm1, %v562_v4  ;;  %582 = vst.msk [vmem:[#allocation4 + $0x78] sm:$0x1] %vm459_vm1, %v564_v5  ;;  %v762_v31 = vpack.c.bf16 %v3897_v9, %v3832_v17  ;;  %v971_v44 = vpack.c.bf16 %v964_v41, %v963_v40  ;;  %v965_v45 = vld [vmem:[#allocation4 + $0x20] sm:$0xff]  ;;  %v970_v54 = vld [vmem:[#allocation4 + $0x70] sm:$0xff] }
  0x30   : > { %3235 = vmatpush3.bf16.msra.mxu0 %v3800_v0  ;;  %3230 = vmatprep.mubr.msk.bf16.mxu0 %vm457_vm0, %v761_v35  ;;  %475 = vst.msk [vmem:[#allocation2 + $0x80] sm:$0xff] %vm457_vm0, %v455_v10  ;;  %v456_v0 = vunpack.c.l.bf16 %v438_v30  ;;  %529 = vst.msk [vmem:[#allocation3 + $0x80] sm:$0xff] %vm457_vm0, %v511_v27  ;;  %v967_v47 = vld [vmem:[#allocation4 + $0x40] sm:$0xff]  ;;  %v972_v51 = vpack.c.bf16 %v966_v46, %v965_v45  ;;  %v1069_v58 = vld [vmem:[#allocation5] sm:$0xff] }
  0x31   : > { %3244 = vmatprep.subr.bf16.mxu0 %v3597_v42  ;;  %v973_v52 = vpack.c.bf16 %v968_v48, %v967_v47  ;;  %v969_v53 = vld [vmem:[#allocation4 + $0x60] sm:$0xff]  ;;  %v1071_v4 = vld [vmem:[#allocation5 + $0x20] sm:$0xff] }
  0x32   : > { %v1074_v34 = vld [vmem:[#allocation5 + $0x50] sm:$0xff]  ;;  %476 = vst.msk [vmem:[#allocation2 + $0x88] sm:$0x1] %vm459_vm1, %v456_v0  ;;  %v974_v61 = vpack.c.bf16 %v970_v54, %v969_v53  ;;  %v3600_v10 = vld [vmem:[%s4220_s4 + $0x30] sm:$0xff]  }
  0x33   : > { %v1079_v35 = vpack.c.bf16 %v1074_v34, %v1073_v33  ;;  %v1070_v59 = vld [vmem:[#allocation5 + $0x10] sm:$0xff]  ;;  %v1075_v15 = vld [vmem:[#allocation5 + $0x60] sm:$0xff] }
  0x34   : > { %v1077_v62 = vpack.c.bf16 %v1070_v59, %v1069_v58  ;;  %v1072_v5 = vld [vmem:[#allocation5 + $0x30] sm:$0xff]  ;;  %v1176_v30 = vld [vmem:[#allocation4 + $0x11] sm:$0xff] }
  0x35   : > { %3310 = vmatprep.mubr.msk.bf16.mxu1 %vm457_vm0, %v1079_v35  ;;  %v3936_v8 = vpack.c.bf16 %v1072_v5, %v1071_v4  ;;  %v1076_v22 = vld [vmem:[#allocation5 + $0x70] sm:$0xff]  ;;  %v1178_v33 = vld [vmem:[#allocation4 + $0x31] sm:$0xff] }
  0x36   : > { %v1175_v27 = vld [vmem:[#allocation4 + $0x1] sm:$0xff]  ;;  %v3944_v0 = vpack.c.bf16 %v1076_v22, %v1075_v15  ;;  %v1182_v41 = vld [vmem:[#allocation4 + $0x71] sm:$0xff]  ;;  %v2936_v7 = vld [vmem:[%s4221_s5] ss:$0 sm:$0xff] }
  0x37   : > { %3231 = vmatmul.mubr.msk.bf16.gmra.mrb[4].mxu0 %vm457_vm0, %v762_v31  ;;  %v1183_v31 = vpack.c.bf16 %v1176_v30, %v1175_v27  ;;  %v1179_v34 = vld [vmem:[#allocation4 + $0x41] sm:$0xff]  ;;  %v1396_v50 = vld [vmem:[#allocation3 + $0x80] sm:$0xff] }
  0x38   : > { %3236 = vmatprep.mubr.msk.bf16.mxu0 %vm457_vm0, %v865_v32  ;;  %v1177_v32 = vld [vmem:[#allocation4 + $0x21] sm:$0xff]  ;;  %v1400_v55 = vpack.c.bf16 %v1396_v50, %v3897_v9 }
  0x39   : > { %v1181_v40 = vld [vmem:[#allocation4 + $0x61] sm:$0xff] }
  0x3a   : > { %v1289_v45 = vld [vmem:[#allocation2 + $0x80] sm:$0xff] }
  0x3b   : > { %v1293_v49 = vpack.c.bf16 %v1289_v45, %v3821_v11  ;;  %v1502_v56 = vld [vmem:[#allocation2 + $0x81] sm:$0xff] }
  0x3c   : > { %v1506_v57 = vpack.c.bf16 %v1502_v56, %v3921_v39  ;;  %v3603_v63 = vld [vmem:[%s4222_s6] sm:$0xff]  }
  0x3d   : > { %3422 = vmatprep.subr.bf16.mxu1 %v3603_v63  ;;  %v3608_v4 = vld [vmem:[%s4224_s8 + $0x20] sm:$0xff]  }
  0x3e   : > { %3423 = vmatpush3.bf16.msra.mxu1 %v3603_v63 }
  0x3f   : > { %3237 = vmatmul.mubr.msk.bf16.vlgmr.msra.gmra.mrb[0].mxu0 %vm457_vm0, %v866_v36  ;;  %v1180_v36 = vld [vmem:[#allocation4 + $0x51] sm:$0xff] }
  0x40   : > { %3245 = vmatpush3.bf16.msra.mxu0 %v3597_v42  ;;  %3240 = vmatprep.mubr.msk.bf16.mxu0 %vm457_vm0, %v867_v38  ;;  %v3599_v42 = vld [vmem:[%s4220_s4 + $0x28] sm:$0xff]   ;;  %v1185_v38 = vpack.c.bf16 %v1180_v36, %v1179_v34 }
  0x41   : > { %3254 = vmatprep.subr.bf16.mxu0 %v3598_v37  ;;  %3311 = vmatmul.mubr.msk.bf16.vlgmr.msra.gmra.mrb[0].mxu1 %vm457_vm0, %v3944_v0 }
  0x47   : > { %3241 = vmatmul.mubr.msk.bf16.gmra.mrb[4].mxu0 %vm457_vm0, %v868_v43  ;;  %v1186_v43 = vpack.c.bf16 %v1182_v41, %v1181_v40  ;;  %v3610_v40 = vld [vmem:[%s4224_s8 + $0x30] sm:$0xff]  }
  0x48   : > { %3246 = vmatprep.mubr.msk.bf16.mxu0 %vm457_vm0, %v971_v44  ;;  %v3602_v44 = vld [vmem:[%s4220_s4 + $0x40] sm:$0xff]  }
  0x4f   : > { %3247 = vmatmul.mubr.msk.bf16.vlgmr.msra.gmra.mrb[0].mxu0 %vm457_vm0, %v972_v51 }
  0x50   : > { %3255 = vmatpush3.bf16.msra.mxu0 %v3598_v37  ;;  %3250 = vmatprep.mubr.msk.bf16.mxu0 %vm457_vm0, %v973_v52  ;;  %v1184_v37 = vpack.c.bf16 %v1178_v33, %v1177_v32 }
  0x51   : > { %3264 = vmatprep.subr.bf16.mxu0 %v3599_v42 }
  0x57   : > { %3251 = vmatmul.mubr.msk.bf16.gmra.mrb[4].mxu0 %vm457_vm0, %v974_v61 }
  0x58   : > { %3256 = vmatprep.mubr.msk.bf16.mxu0 %vm457_vm0, %v1077_v62 }
  0x5f   : > { %3257 = vmatmul.mubr.msk.bf16.vlgmr.msra.gmra.mrb[0].mxu0 %vm457_vm0, %v3936_v8 }
  0x60   : > { %3265 = vmatpush3.bf16.msra.mxu0 %v3599_v42  ;;  %3260 = vmatprep.mubr.msk.bf16.mxu0 %vm457_vm0, %v1079_v35  ;;  %v3601_v35 = vld [vmem:[%s4220_s4 + $0x38] sm:$0xff]  }
  0x61   : > { %3274 = vmatprep.subr.bf16.mxu0 %v3600_v10 }
  0x67   : > { %3261 = vmatmul.mubr.msk.bf16.gmra.mrb[4].mxu0 %vm457_vm0, %v3944_v0 }
  0x68   : > { %3266 = vmatprep.mubr.msk.bf16.mxu0 %vm457_vm0, %v1183_v31 }
  0x6f   : > { %3267 = vmatmul.mubr.msk.bf16.vlgmr.msra.gmra.mrb[0].mxu0 %vm457_vm0, %v1184_v37 }
  0x70   : > { %3275 = vmatpush3.bf16.msra.mxu0 %v3600_v10  ;;  %3270 = vmatprep.mubr.msk.bf16.mxu0 %vm457_vm0, %v1185_v38  ;;  %v3609_v38 = vld [vmem:[%s4224_s8 + $0x28] sm:$0xff]  }
  0x71   : > { %3284 = vmatprep.subr.bf16.mxu0 %v3601_v35 }
  0x77   : > { %3271 = vmatmul.mubr.msk.bf16.gmra.mrb[4].mxu0 %vm457_vm0, %v1186_v43 }
  0x78   : > { %3276 = vmatprep.mubr.msk.bf16.mxu0 %vm457_vm0, %v1290_v60  ;;  %v3630_v60 = vmov 0.0  }
  0x79   : > { %1617 = vst.msk [vmem:[#allocation6 + $0x30] sm:$0xff] %vm1609_vm2, %v3630_v60  ;;  %1610 = vst.msk [vmem:[#allocation6] sm:$0xff] %vm1609_vm2, %v3630_v60 }
  0x7a   : > { %1618 = vst.msk [vmem:[#allocation6 + $0x38] sm:$0x3] %vm1611_vm3, %v3630_v60  ;;  %1612 = vst.msk [vmem:[#allocation6 + $0x8] sm:$0x3] %vm1611_vm3, %v3630_v60 }
  0x7b   : > { %1613 = vst.msk [vmem:[#allocation6 + $0x10] sm:$0xff] %vm1609_vm2, %v3630_v60  ;;  %1615 = vst.msk [vmem:[#allocation6 + $0x20] sm:$0xff] %vm1609_vm2, %v3630_v60 }
  0x7c   : > { %1614 = vst.msk [vmem:[#allocation6 + $0x18] sm:$0x3] %vm1611_vm3, %v3630_v60  ;;  %1616 = vst.msk [vmem:[#allocation6 + $0x28] sm:$0x3] %vm1611_vm3, %v3630_v60 }
  0x7d   : > { %1619 = vst.msk [vmem:[#allocation6 + $0x40] sm:$0xff] %vm1609_vm2, %v3630_v60  ;;  %1621 = vst.msk [vmem:[#allocation6 + $0x50] sm:$0xff] %vm1609_vm2, %v3630_v60 }
  0x7e   : > { %1620 = vst.msk [vmem:[#allocation6 + $0x48] sm:$0x3] %vm1611_vm3, %v3630_v60  ;;  %1622 = vst.msk [vmem:[#allocation6 + $0x58] sm:$0x3] %vm1611_vm3, %v3630_v60 }
  0x7f   : > { %3277 = vmatmul.mubr.msk.bf16.vlgmr.msra.gmra.mrb[0].mxu0 %vm457_vm0, %v1291_v2  ;;  %1623 = vst.msk [vmem:[#allocation6 + $0x60] sm:$0xff] %vm1609_vm2, %v3630_v60  ;;  %1625 = vst.msk [vmem:[#allocation6 + $0x70] sm:$0xff] %vm1609_vm2, %v3630_v60  ;;  %v3604_v2 = vld [vmem:[%s4224_s8] sm:$0xff]  }
  0x80   : > { %3285 = vmatpush3.bf16.msra.mxu0 %v3601_v35  ;;  %3280 = vmatprep.mubr.msk.bf16.mxu0 %vm457_vm0, %v1292_v6  ;;  %1624 = vst.msk [vmem:[#allocation6 + $0x68] sm:$0x3] %vm1611_vm3, %v3630_v60  ;;  %1626 = vst.msk [vmem:[#allocation6 + $0x78] sm:$0x3] %vm1611_vm3, %v3630_v60  ;;  %v3606_v6 = vld [vmem:[%s4224_s8 + $0x10] sm:$0xff]   ;;  %v1751_v47 = vld [vmem:[#allocation6] sm:$0xff] }
  0x81   : > { %3294 = vmatprep.subr.bf16.mxu0 %v3602_v44  ;;  %1627 = vst.msk [vmem:[#allocation6 + $0x80] sm:$0xff] %vm1609_vm2, %v3630_v60  ;;  %1629 = vst.msk [vmem:[#allocation6 + $0x90] sm:$0xff] %vm1609_vm2, %v3630_v60  ;;  %3314 = vmatprep.subr.bf16.mxu1 %v3604_v2  ;;  %v1864_v15 = vld [vmem:[#allocation6 + $0x1] sm:$0xff] }
  0x82   : > { %1628 = vst.msk [vmem:[#allocation6 + $0x88] sm:$0x3] %vm1611_vm3, %v3630_v60  ;;  %1630 = vst.msk [vmem:[#allocation6 + $0x98] sm:$0x3] %vm1611_vm3, %v3630_v60  ;;  %3315 = vmatpush3.bf16.msra.mxu1 %v3604_v2  ;;  %v1978_v43 = vld [vmem:[#allocation6 + $0x2] sm:$0xff]  ;;  %v3611_v2 = vld [vmem:[%s4224_s8 + $0x38] sm:$0xff]  }
  0x83   : > { %3316 = vmatprep.subr.bf16.mxu1 %v3605_v3 }
  0x86   : > { %3317 = vmatpush3.bf16.msra.mxu1 %v3605_v3 }
  0x87   : > { %3281 = vmatmul.mubr.msk.bf16.gmra.mrb[4].mxu0 %vm457_vm0, %v1293_v49  ;;  %3326 = vmatprep.subr.bf16.mxu1 %v3606_v6 }
  0x88   : > { %3286 = vmatprep.mubr.msk.bf16.mxu0 %vm457_vm0, %v1397_v14 }
  0x8f   : > { %3287 = vmatmul.mubr.msk.bf16.vlgmr.msra.gmra.mrb[0].mxu0 %vm457_vm0, %v1398_v1 }
  0x90   : > { %3295 = vmatpush3.bf16.msra.mxu0 %v3602_v44  ;;  %3290 = vmatprep.mubr.msk.bf16.mxu0 %vm457_vm0, %v1399_v21 }
  0x91   : > { %3304 = vmatprep.subr.bf16.mxu0 %v3603_v63 }
  0x97   : > { %3291 = vmatmul.mubr.msk.bf16.gmra.mrb[4].mxu0 %vm457_vm0, %v1400_v55 }
  0x98   : > { %3296 = vmatprep.mubr.msk.bf16.mxu0 %vm457_vm0, %v1503_v26 }
  0x9f   : > { %3297 = vmatmul.mubr.msk.bf16.vlgmr.msra.gmra.mrb[0].mxu0 %vm457_vm0, %v1504_v28 }
  0xa0   : > { %3300 = vmatprep.mubr.msk.bf16.mxu0 %vm457_vm0, %v1505_v29  ;;  %3305 = vmatpush3.bf16.msra.mxu0 %v3603_v63 }
  0xa7   : > { %3301 = vmatmul.mubr.msk.bf16.gmra.mrb[4].mxu0 %vm457_vm0, %v1506_v57 }
  0xa8   : > { %3306 = vmatprep.mubr.msk.bf16.mxu0 %vm457_vm0, %v1077_v62  ;;  %v3607_v62 = vld [vmem:[%s4224_s8 + $0x18] sm:$0xff]  }
  0xaf   : > { %3307 = vmatmul.mubr.msk.bf16.vlgmr.msra.gmra.mrb[8].mxu0 %vm457_vm0, %v3936_v8 }
 0x172   : > { %v3298_v11 = vpop.f32.mrb[0].mxu0 }
 0x173   : > { %v3424_v12 = vadd.f32 %v3298_v11, %v2936_v7  ;;  %v1562_v13 = vpop.f32.mrb[1].mxu0 }
 0x174   : > { %v3425_v14 = vadd.f32 %v2936_v7, %v1562_v13  ;;  %v3299_v16 = vpop.f32.mrb[2].mxu0 }
 0x175   : > { %v1603_v17 = vmax.f32 %v3424_v12, 0.0  ;;  %v3426_v1 = vadd.f32 %v3299_v16, %v2936_v7  ;;  %v1565_v18 = vpop.f32.mrb[3].mxu0  ;;  %v3613_v16 = vld [vmem:[%s4224_s8 + $0x48] sm:$0xff]  }
 0x176   : > { %v1601_v19 = vmax.f32 %v3425_v14, 0.0  ;;  %v3427_v20 = vadd.f32 %v2936_v7, %v1565_v18 }
 0x177   : > { %1634 = vst.msk [vmem:[#allocation6 + $0x31] sm:$0xff] %vm1609_vm2, %v1603_v17  ;;  %v1604_v21 = vmax.f32 %v3426_v1, 0.0  ;;  %v3614_v1 = vld [vmem:[%s4224_s8 + $0x50] sm:$0xff]  }
 0x178   : > { %1632 = vst.msk [vmem:[#allocation6 + $0x11] sm:$0xff] %vm1609_vm2, %v1601_v19  ;;  %v1602_v23 = vmax.f32 %v3427_v20, 0.0 }
 0x179   : > { %1635 = vst.msk [vmem:[#allocation6 + $0x41] sm:$0xff] %vm1609_vm2, %v1604_v21 }
 0x17a   : > { %1633 = vst.msk [vmem:[#allocation6 + $0x21] sm:$0xff] %vm1609_vm2, %v1602_v23  ;;  %v3302_v24 = vpop.f32.mrb[4].mxu0  ;;  %v3615_v23 = vld [vmem:[%s4224_s8 + $0x58] sm:$0xff]  }
 0x17b   : > { %v3428_v25 = vadd.f32 %v3302_v24, %v2936_v7  ;;  %v1578_v26 = vpop.f32.mrb[5].mxu0 }
 0x17c   : > { %v3429_v28 = vadd.f32 %v2936_v7, %v1578_v26  ;;  %v3303_v29 = vpop.f32.mrb[6].mxu0 }
 0x17d   : > { %v1607_v9 = vmax.f32 %v3428_v25, 0.0  ;;  %v3430_v39 = vadd.f32 %v3303_v29, %v2936_v7  ;;  %v1581_v46 = vpop.f32.mrb[7].mxu0  ;;  %v3616_v25 = vld [vmem:[%s4224_s8 + $0x60] sm:$0xff]  }
 0x17e   : > { %v1605_v48 = vmax.f32 %v3429_v28, 0.0  ;;  %v3431_v51 = vadd.f32 %v2936_v7, %v1581_v46  ;;  %v4052_v59 = vld [vmem:[#allocation6 + $0x30] sm:$0xff] }
 0x17f   : > { %1638 = vst.msk [vmem:[#allocation6 + $0x71] sm:$0xff] %vm1609_vm2, %v1607_v9  ;;  %v1608_v52 = vmax.f32 %v3430_v39, 0.0  ;;  %v4045_v42 = vld [vmem:[#allocation6 + $0x10] sm:$0xff] }
 0x180   : > { %1636 = vst.msk [vmem:[#allocation6 + $0x51] sm:$0xff] %vm1609_vm2, %v1605_v48  ;;  %v1606_v53 = vmax.f32 %v3431_v51, 0.0  ;;  %v1759_v54 = vpack.c.bf16 %v4045_v42, %v1751_v47  ;;  %v1755_v5 = vld [vmem:[#allocation6 + $0x40] sm:$0xff]  ;;  %v4070_v22 = vld [vmem:[#allocation6 + $0x11] sm:$0xff]  ;;  %v3617_v47 = vld [vmem:[%s4224_s8 + $0x68] sm:$0xff]  }
 0x181   : > { %1639 = vst.msk [vmem:[#allocation6 + $0x81] sm:$0xff] %vm1609_vm2, %v1608_v52  ;;  %v4050_v58 = vld [vmem:[#allocation6 + $0x20] sm:$0xff]  ;;  %v1872_v31 = vpack.c.bf16 %v4070_v22, %v1864_v15  ;;  %v1867_v34 = vld [vmem:[#allocation6 + $0x31] sm:$0xff]  ;;  %v2101_v14 = vpack.c.bf16 %v1755_v5, %v4052_v59 }
 0x182   : > { %1637 = vst.msk [vmem:[#allocation6 + $0x61] sm:$0xff] %vm1609_vm2, %v1606_v53  ;;  %3318 = vmatprep.mubr.msk.bf16.mxu1 %vm1609_vm2, %v1759_v54  ;;  %v4058_v61 = vpack.c.bf16 %v4052_v59, %v4050_v58  ;;  %v1866_v32 = vld [vmem:[#allocation6 + $0x21] sm:$0xff]  ;;  %v1979_v44 = vld [vmem:[#allocation6 + $0x12] sm:$0xff]  ;;  %v2100_v13 = vpack.c.bf16 %v4050_v58, %v4045_v42  ;;  %v3308_v9 = vpop.f32.mrb[8].mxu0 }
 0x183   : > { %v4083_v36 = vpack.c.bf16 %v1867_v34, %v1866_v32  ;;  %v1868_v37 = vld [vmem:[#allocation6 + $0x41] sm:$0xff]  ;;  %v1986_v50 = vpack.c.bf16 %v1979_v44, %v1978_v43  ;;  %v1981_v57 = vld [vmem:[#allocation6 + $0x32] sm:$0xff]  ;;  %v2214_v20 = vpack.c.bf16 %v1866_v32, %v4070_v22  ;;  %v1713_v39 = vpop.f32.mrb[9].mxu0  ;;  %v2998_v22 = vld [vmem:[%s4223_s7] ss:$0 sm:$0xff] }
 0x184   : > { %3319 = vmatmul.mubr.msk.bf16.vlgmr.msra.gmra.mrb[4].mxu1 %vm1609_vm2, %v4058_v61  ;;  %v1980_v55 = vld [vmem:[#allocation6 + $0x22] sm:$0xff]  ;;  %v2215_v21 = vpack.c.bf16 %v1868_v37, %v1867_v34  ;;  %v3309_v48 = vpop.f32.mrb[10].mxu0  ;;  %v3618_v42 = vld [vmem:[%s4224_s8 + $0x70] sm:$0xff]   ;;  %v3619_v58 = vld [vmem:[%s4224_s8 + $0x78] sm:$0xff]  }
 0x185   : > { %3327 = vmatpush3.bf16.msra.mxu1 %v3606_v6  ;;  %v4102_v60 = vpack.c.bf16 %v1981_v57, %v1980_v55  ;;  %v1982_v63 = vld [vmem:[#allocation6 + $0x42] sm:$0xff]  ;;  %v2328_v29 = vpack.c.bf16 %v1980_v55, %v1979_v44  ;;  %v1716_v52 = vpop.f32.mrb[11].mxu0 }
 0x186   : > { %3328 = vmatprep.subr.bf16.mxu1 %v3607_v62  ;;  %v4072_v30 = vld [vmem:[#allocation6 + $0x70] sm:$0xff]  ;;  %v3612_v6 = vld [vmem:[%s4224_s8 + $0x40] sm:$0xff]   ;;  %v2329_v46 = vpack.c.bf16 %v1982_v63, %v1981_v57  ;;  %v1717_v32 = vadd.f32 %v2998_v22, %v1716_v52 }
 0x187   : > { %v1756_v8 = vld [vmem:[#allocation6 + $0x50] sm:$0xff]  ;;  %v3620_v59 = vld [vmem:[%s4224_s8 + $0x80] sm:$0xff]  }
 0x188   : > { %v4068_v10 = vpack.c.bf16 %v1756_v8, %v1755_v5  ;;  %v1869_v33 = vld [vmem:[#allocation6 + $0x51] sm:$0xff]  ;;  %v2099_v18 = vld [vmem:[#allocation6 + $0x80] sm:$0xff] }
 0x189   : > { %v1757_v27 = vld [vmem:[#allocation6 + $0x60] sm:$0xff]  ;;  %3329 = vmatpush3.bf16.msra.mxu1 %v3607_v62  ;;  %v4088_v35 = vpack.c.bf16 %v1869_v33, %v1868_v37  ;;  %v1871_v45 = vld [vmem:[#allocation6 + $0x71] sm:$0xff]  ;;  %v2103_v19 = vpack.c.bf16 %v2099_v18, %v4072_v30 }
 0x18a   : > { %3322 = vmatprep.mubr.msk.bf16.mxu1 %vm1609_vm2, %v4068_v10  ;;  %v4077_v0 = vpack.c.bf16 %v4072_v30, %v1757_v27  ;;  %3338 = vmatprep.subr.bf16.mxu1 %v3608_v4  ;;  %v1870_v41 = vld [vmem:[#allocation6 + $0x61] sm:$0xff]  ;;  %v1983_v56 = vld [vmem:[#allocation6 + $0x52] sm:$0xff]  ;;  %v2102_v17 = vpack.c.bf16 %v1757_v27, %v1756_v8  ;;  %v1722_v27 = vadd.f32 %v3308_v9, %v2998_v22 }
 0x18b   : > { %v4097_v49 = vpack.c.bf16 %v1871_v45, %v1870_v41  ;;  %v4107_v3 = vpack.c.bf16 %v1983_v56, %v1982_v63  ;;  %v1984_v7 = vld [vmem:[#allocation6 + $0x62] sm:$0xff]  ;;  %v1985_v11 = vld [vmem:[#allocation6 + $0x72] sm:$0xff]  ;;  %v2216_v24 = vpack.c.bf16 %v1870_v41, %v1869_v33  ;;  %v1714_v30 = vadd.f32 %v2998_v22, %v1713_v39 }
 0x18c   : > { %3323 = vmatmul.mubr.msk.bf16.gmra.mrb[0].mxu1 %vm1609_vm2, %v4077_v0  ;;  %v4116_v12 = vpack.c.bf16 %v1985_v11, %v1984_v7  ;;  %v2213_v26 = vld [vmem:[#allocation6 + $0x81] sm:$0xff]  ;;  %v2330_v51 = vpack.c.bf16 %v1984_v7, %v1983_v56  ;;  %v2442_v62 = vld [vmem:[#allocation6 + $0x90] sm:$0xff] }
 0x18d   : > { %3330 = vmatprep.mubr.msk.bf16.mxu1 %vm1609_vm2, %v1872_v31  ;;  %v2217_v28 = vpack.c.bf16 %v2213_v26, %v1871_v45  ;;  %v2327_v53 = vld [vmem:[#allocation6 + $0x82] sm:$0xff]  ;;  %v2556_v5 = vld [vmem:[#allocation6 + $0x91] sm:$0xff]  ;;  %v1725_v31 = vadd.f32 %v3309_v48, %v2998_v22 }
 0x18e   : > { %v2331_v54 = vpack.c.bf16 %v2327_v53, %v1985_v11  ;;  %v2560_v8 = vpack.c.bf16 %v2556_v5, %v2213_v26 }
 0x194   : > { %3331 = vmatmul.mubr.msk.bf16.vlgmr.msra.gmra.mrb[4].mxu1 %vm1609_vm2, %v4083_v36 }
 0x195   : > { %3339 = vmatpush3.bf16.msra.mxu1 %v3608_v4  ;;  %3334 = vmatprep.mubr.msk.bf16.mxu1 %vm1609_vm2, %v4088_v35  ;;  %v2446_v4 = vpack.c.bf16 %v2442_v62, %v2099_v18 }
 0x196   : > { %3340 = vmatprep.subr.bf16.mxu1 %v3609_v38 }
 0x199   : > { %3341 = vmatpush3.bf16.msra.mxu1 %v3609_v38 }
 0x19a   : > { %3350 = vmatprep.subr.bf16.mxu1 %v3610_v40 }
 0x19c   : > { %3335 = vmatmul.mubr.msk.bf16.gmra.mrb[0].mxu1 %vm1609_vm2, %v4097_v49 }
 0x19d   : > { %3342 = vmatprep.mubr.msk.bf16.mxu1 %vm1609_vm2, %v1986_v50 }
 0x1a4   : > { %3343 = vmatmul.mubr.msk.bf16.vlgmr.msra.gmra.mrb[4].mxu1 %vm1609_vm2, %v4102_v60 }
 0x1a5   : > { %3351 = vmatpush3.bf16.msra.mxu1 %v3610_v40  ;;  %3346 = vmatprep.mubr.msk.bf16.mxu1 %vm1609_vm2, %v4107_v3 }
 0x1a6   : > { %3352 = vmatprep.subr.bf16.mxu1 %v3611_v2 }
 0x1a9   : > { %3353 = vmatpush3.bf16.msra.mxu1 %v3611_v2 }
 0x1aa   : > { %3362 = vmatprep.subr.bf16.mxu1 %v3612_v6 }
 0x1ac   : > { %3347 = vmatmul.mubr.msk.bf16.gmra.mrb[0].mxu1 %vm1609_vm2, %v4116_v12 }
 0x1ad   : > { %3354 = vmatprep.mubr.msk.bf16.mxu1 %vm1609_vm2, %v2100_v13 }
 0x1b4   : > { %3355 = vmatmul.mubr.msk.bf16.vlgmr.msra.gmra.mrb[4].mxu1 %vm1609_vm2, %v2101_v14 }
 0x1b5   : > { %3363 = vmatpush3.bf16.msra.mxu1 %v3612_v6  ;;  %3358 = vmatprep.mubr.msk.bf16.mxu1 %vm1609_vm2, %v2102_v17 }
 0x1b6   : > { %3364 = vmatprep.subr.bf16.mxu1 %v3613_v16 }
 0x1b9   : > { %3365 = vmatpush3.bf16.msra.mxu1 %v3613_v16 }
 0x1ba   : > { %3374 = vmatprep.subr.bf16.mxu1 %v3614_v1 }
 0x1bc   : > { %3359 = vmatmul.mubr.msk.bf16.gmra.mrb[0].mxu1 %vm1609_vm2, %v2103_v19 }
 0x1bd   : > { %3366 = vmatprep.mubr.msk.bf16.mxu1 %vm1609_vm2, %v2214_v20 }
 0x1c4   : > { %3367 = vmatmul.mubr.msk.bf16.vlgmr.msra.gmra.mrb[4].mxu1 %vm1609_vm2, %v2215_v21 }
 0x1c5   : > { %3375 = vmatpush3.bf16.msra.mxu1 %v3614_v1  ;;  %3370 = vmatprep.mubr.msk.bf16.mxu1 %vm1609_vm2, %v2216_v24 }
 0x1c6   : > { %3376 = vmatprep.subr.bf16.mxu1 %v3615_v23 }
 0x1c9   : > { %3377 = vmatpush3.bf16.msra.mxu1 %v3615_v23 }
 0x1ca   : > { %3386 = vmatprep.subr.bf16.mxu1 %v3616_v25 }
 0x1cc   : > { %3371 = vmatmul.mubr.msk.bf16.gmra.mrb[0].mxu1 %vm1609_vm2, %v2217_v28 }
 0x1cd   : > { %3378 = vmatprep.mubr.msk.bf16.mxu1 %vm1609_vm2, %v2328_v29 }
 0x1d4   : > { %3379 = vmatmul.mubr.msk.bf16.vlgmr.msra.gmra.mrb[4].mxu1 %vm1609_vm2, %v2329_v46 }
 0x1d5   : > { %3387 = vmatpush3.bf16.msra.mxu1 %v3616_v25  ;;  %3382 = vmatprep.mubr.msk.bf16.mxu1 %vm1609_vm2, %v2330_v51 }
 0x1d6   : > { %3388 = vmatprep.subr.bf16.mxu1 %v3617_v47 }
 0x1d9   : > { %3389 = vmatpush3.bf16.msra.mxu1 %v3617_v47 }
 0x1da   : > { %3398 = vmatprep.subr.bf16.mxu1 %v3618_v42 }
 0x1dc   : > { %3383 = vmatmul.mubr.msk.bf16.gmra.mrb[0].mxu1 %vm1609_vm2, %v2331_v54 }
 0x1dd   : > { %3390 = vmatprep.mubr.msk.bf16.mxu1 %vm1609_vm2, %v4058_v61  ;;  %v3621_v61 = vld [vmem:[%s4224_s8 + $0x88] sm:$0xff]  }
 0x1e4   : > { %3391 = vmatmul.mubr.msk.bf16.vlgmr.msra.gmra.mrb[4].mxu1 %vm1609_vm2, %v4068_v10  ;;  %v2670_v10 = vld [vmem:[#allocation6 + $0x92] sm:$0xff] }
 0x1e5   : > { %3399 = vmatpush3.bf16.msra.mxu1 %v3618_v42  ;;  %3394 = vmatprep.mubr.msk.bf16.mxu1 %vm1609_vm2, %v4077_v0  ;;  %v2674_v15 = vpack.c.bf16 %v2670_v10, %v2327_v53  ;;  %v3004_v0 = vld [vmem:[%s4225_s9] ss:$0 sm:$0xff] }
 0x1e6   : > { %3400 = vmatprep.subr.bf16.mxu1 %v3619_v58  ;;  %v3433_v33 = vadd.f32 %v3004_v0, %v1722_v27  ;;  %v3436_v34 = vadd.f32 %v3004_v0, %v1714_v30  ;;  %v3442_v38 = vadd.f32 %v3004_v0, %v1717_v32 }
 0x1e9   : > { %3401 = vmatpush3.bf16.msra.mxu1 %v3619_v58 }
 0x1ea   : > { %3410 = vmatprep.subr.bf16.mxu1 %v3620_v59 }
 0x1ec   : > { %3395 = vmatmul.mubr.msk.bf16.gmra.mrb[0].mxu1 %vm1609_vm2, %v2446_v4 }
 0x1ed   : > { %3402 = vmatprep.mubr.msk.bf16.mxu1 %vm1609_vm2, %v4083_v36  ;;  %v3439_v36 = vadd.f32 %v3004_v0, %v1725_v31 }
 0x1f4   : > { %3403 = vmatmul.mubr.msk.bf16.vlgmr.msra.gmra.mrb[4].mxu1 %vm1609_vm2, %v4088_v35 }
 0x1f5   : > { %3411 = vmatpush3.bf16.msra.mxu1 %v3620_v59  ;;  %3406 = vmatprep.mubr.msk.bf16.mxu1 %vm1609_vm2, %v4097_v49 }
 0x1f6   : > { %3412 = vmatprep.subr.bf16.mxu1 %v3621_v61 }
 0x1f9   : > { %3413 = vmatpush3.bf16.msra.mxu1 %v3621_v61 }
 0x1fc   : > { %3407 = vmatmul.mubr.msk.bf16.gmra.mrb[0].mxu1 %vm1609_vm2, %v2560_v8 }
 0x1fd   : > { %3414 = vmatprep.mubr.msk.bf16.mxu1 %vm1609_vm2, %v4102_v60  ;;  %v3446_v60 = vadd.f32 %v3004_v0, %v2998_v22 }
 0x204   : > { %3415 = vmatmul.mubr.msk.bf16.vlgmr.msra.gmra.mrb[4].mxu1 %vm1609_vm2, %v4107_v3 }
 0x205   : > { %3418 = vmatprep.mubr.msk.bf16.mxu1 %vm1609_vm2, %v4116_v12 }
 0x20c   : > { %3419 = vmatmul.mubr.msk.bf16.gmra.mrb[0].mxu1 %vm1609_vm2, %v2674_v15 }
 0x2d7   : > { %v3416_v37 = vpop.f32.mrb[4].mxu1 }
 0x2d8   : > { %v3434_v35 = vadd.f32 %v3433_v33, %v3416_v37  ;;  %v2738_v40 = vpop.f32.mrb[5].mxu1 }
 0x2d9   : > { %v3437_v41 = vadd.f32 %v3436_v34, %v2738_v40  ;;  %v3417_v43 = vpop.f32.mrb[6].mxu1 }
 0x2da   : > { %v2787_v44 = vmax.f32 %v3434_v35, 0.0  ;;  %v3440_v45 = vadd.f32 %v3439_v36, %v3417_v43  ;;  %v2741_v49 = vpop.f32.mrb[7].mxu1 }
 0x2db   : > { %v2785_v50 = vmax.f32 %v3437_v41, 0.0  ;;  %v3443_v55 = vadd.f32 %v3442_v38, %v2741_v49 }
 0x2dc   : > { %v3104_v56 = vpack.c.bf16 %v2787_v44, %v2787_v44  ;;  %v2788_v57 = vmax.f32 %v3440_v45, 0.0 }
 0x2dd   : > { %v3102_v63 = vpack.c.bf16 %v2785_v50, %v2785_v50  ;;  %v2786_v2 = vmax.f32 %v3443_v55, 0.0 }
 0x2de   : > { %2828 = vst.msk [vmem:[%s4195_s21 + $0x8] sm:$0xf] %vm2825_vm4, %v3104_v56  ;;  %v3105_v3 = vpack.c.bf16 %v2788_v57, %v2788_v57 }
 0x2df   : > { %2826 = vst.msk [vmem:[%s4195_s21] sm:$0xf] %vm2825_vm4, %v3102_v63  ;;  %v3103_v6 = vpack.c.bf16 %v2786_v2, %v2786_v2  ;;  %v3420_v7 = vpop.f32.mrb[0].mxu1 }
 0x2e0   : > { %2829 = vst.msk [vmem:[%s4195_s21 + $0xc] sm:$0xf] %vm2825_vm4, %v3105_v3  ;;  %v3445_v11 = vadd.f32 %v3446_v60, %v3420_v7  ;;  %v2754_v12 = vpop.f32.mrb[1].mxu1 }
 0x2e1   : > { %2827 = vst.msk [vmem:[%s4195_s21 + $0x4] sm:$0xf] %vm2825_vm4, %v3103_v6  ;;  %v3447_v13 = vadd.f32 %v3446_v60, %v2754_v12  ;;  %v3421_v14 = vpop.f32.mrb[2].mxu1 }
 0x2e2   : > { %v2791_v16 = vmax.f32 %v3445_v11, 0.0  ;;  %v3449_v17 = vadd.f32 %v3446_v60, %v3421_v14  ;;  %v2757_v1 = vpop.f32.mrb[3].mxu1 }
 0x2e3   : > { %v2789_v18 = vmax.f32 %v3447_v13, 0.0  ;;  %v3451_v19 = vadd.f32 %v3446_v60, %v2757_v1 }
 0x2e4   : > { %v3108_v20 = vpack.c.bf16 %v2791_v16, %v2791_v16  ;;  %v2792_v21 = vmax.f32 %v3449_v17, 0.0 }
 0x2e5   : > { %v3106_v23 = vpack.c.bf16 %v2789_v18, %v2789_v18  ;;  %v2790_v24 = vmax.f32 %v3451_v19, 0.0 }
 0x2e6   : > { %2832 = vst.msk [vmem:[%s4195_s21 + $0x18] sm:$0xf] %vm2825_vm4, %v3108_v20  ;;  %v3109_v25 = vpack.c.bf16 %v2792_v21, %v2792_v21 }
 0x2e7   : > { %2830 = vst.msk [vmem:[%s4195_s21 + $0x10] sm:$0xf] %vm2825_vm4, %v3106_v23  ;;  %v3107_v26 = vpack.c.bf16 %v2790_v24, %v2790_v24 }
 0x2e8   : > { %2833 = vst.msk [vmem:[%s4195_s21 + $0x1c] sm:$0xf] %vm2825_vm4, %v3109_v25 }
 0x2e9   : > { %2831 = vst.msk [vmem:[%s4195_s21 + $0x14] sm:$0xf] %vm2825_vm4, %v3107_v26 }
 0x2ea PF: > { %s20_s13 = sadd.s32 1, %s3628_s13  }
 0x2eb   : > { %p17_p4 = scmp.ge.s32.totalorder %s20_s13, 4  }
 0x2ed   :  { %19 = sbr.rel (!%p17_p4) target bundleno = 1 (0x1), region = 119 }

</bundles_post_ra>
